<compile_context>
chip_gen: v7x
topology: tpu7x:2x2x1
jax: 0.10.0
libtpu: 0.0.40
codegen_flags: <defaults>
</compile_context>

<pallas_src>
import functools

import jax
import jax.numpy as jnp
from jax import lax
from jax.experimental import pallas as pl
from jax.experimental.pallas import tpu as pltpu

F32 = jnp.float32
LANES = 128


class Config:
    embed_size = 32
    qst_vocab_size = 64
    ans_vocab_size = 16
    word_embed_size = 16
    num_layers = 2          # fused kernel is specialized for 2 LSTM layers
    hidden_size = 32
    img_channels = 3
    img_hw = 16
    conv_channels = 8
    conv_k = 32             # 9 * img_channels = 27, zero-padded to 32 (aligned K)
    backbone_features = 64  # synthetic stand-in for VGG19 classifier features


_PACK_ORDER = (
    "conv_w", "conv_b", "backbone_w", "backbone_b", "img_fc_w", "img_fc_b",
    "word2vec",
    "lstm0_wih", "lstm0_whh", "lstm0_b",
    "lstm1_wih", "lstm1_whh", "lstm1_b",
    "qst_fc_w", "qst_fc_b", "fc1_w", "fc1_b", "fc2_w", "fc2_b",
)


def _round_up(x, m):
    return ((x + m - 1) // m) * m


def _pack_params(params):
    """Pack every weight/bias into ONE (rows, 128) f32 slab (single DMA).

    Returns (slab, offsets) with offsets[name] = (row_off, rows, cols); every
    param starts at a sublane-aligned (multiple-of-8) row and is zero-padded
    to 128 lanes, so in-kernel static slices are aligned views.
    """
    offsets = {}
    pieces = []
    row = 0
    for name in _PACK_ORDER:
        arr = params[name]
        nr, nc = arr.shape
        nr_pad = _round_up(nr, 8)
        offsets[name] = (row, nr, nc)
        pieces.append(jnp.pad(arr.astype(F32),
                              ((0, nr_pad - nr), (0, LANES - nc))))
        row += nr_pad
    return jnp.concatenate(pieces, axis=0), offsets


# ----------------------------------------------------------------------------
# the single fused kernel (one batch tile per grid step)
# ----------------------------------------------------------------------------
def _make_vqa_kernel(offsets, *, tb, hw, seq_len, hidden, vocab):
    H, T, V = hidden, seq_len, vocab

    def kernel(patches_ref, ids_ref, slab_ref, out_ref):
        def w(name, cols=None):
            r0, nr, nc = offsets[name]
            nc = cols if cols is not None else nc
            return slab_ref[r0:r0 + nr, 0:nc]

        # ------------------------------ ImgEncoder --------------------------
        # TODO(synk): pretrained VGG19 features cannot be loaded here; synthetic
        # backbone = 3x3 conv + ReLU -> global mean pool -> linear + ReLU.
        conv = jnp.maximum(
            jnp.dot(patches_ref[...], w("conv_w"),
                    preferred_element_type=F32) + w("conv_b"), 0.0)     # (tb*hw, Cc)
        # Global mean pool as ONE MXU matmul against a block-diagonal
        # averaging matrix (no per-sample cross-sublane reductions/concats).
        r_idx = lax.broadcasted_iota(jnp.int32, (tb, tb * hw), 1)
        b_idx = lax.broadcasted_iota(jnp.int32, (tb, tb * hw), 0)
        in_blk = (r_idx >= b_idx * hw) & (r_idx < (b_idx + 1) * hw)
        pool = jnp.where(in_blk, 1.0 / hw, 0.0).astype(F32)             # (tb, tb*hw)
        pooled = jnp.dot(pool, conv, preferred_element_type=F32)        # (tb, Cc)
        feat = jnp.maximum(
            jnp.dot(pooled, w("backbone_w"),
                    preferred_element_type=F32) + w("backbone_b"), 0.0)  # (tb, Fb)
        img = jnp.dot(feat, w("img_fc_w"),
                      preferred_element_type=F32) + w("img_fc_b")        # (tb, E)
        img = img * lax.rsqrt(jnp.sum(img * img, axis=1, keepdims=True) + 1e-12)

        # ------------------------------ QstEncoder --------------------------
        # nn.Embedding as one-hot @ table on the MXU, then tanh.
        iota_v = lax.broadcasted_iota(jnp.int32, (T * tb, V), 1)
        onehot = (iota_v == ids_ref[...]).astype(F32)                    # (T*tb, V)
        emb = jnp.tanh(jnp.dot(onehot, w("word2vec"),
                               preferred_element_type=F32))              # (T*tb, We)

        # Hoisted gate helpers: one tanh per step; sigmoid(x)=0.5*tanh(x/2)+0.5
        # folded into a lane mask.  PyTorch gate order [i, f, g, o].
        lane = lax.broadcasted_iota(jnp.int32, (tb, 4 * H), 1)
        is_g = (lane >= 2 * H) & (lane < 3 * H)
        pre_scale = jnp.where(is_g, 1.0, 0.5).astype(F32)

        def cell(gates, c):
            t_all = jnp.tanh(gates * pre_scale)
            act = jnp.where(is_g, t_all, 0.5 * t_all + 0.5)              # (tb, 4H)
            i_g = act[:, 0:H]
            f_g = act[:, H:2 * H]
            g_g = act[:, 2 * H:3 * H]
            o_g = act[:, 3 * H:4 * H]
            c_new = f_g * c + i_g * g_g
            h_new = o_g * jnp.tanh(c_new)
            return h_new, c_new

        # Layer-0 input projection hoisted out of the recurrence: ONE matmul
        # over all T*tb rows (rows are time-major within the tile).
        xw0 = jnp.dot(emb, w("lstm0_wih"),
                      preferred_element_type=F32) + w("lstm0_b")         # (T*tb, 4H)
        whh0 = w("lstm0_whh")
        wih1, whh1, b1 = w("lstm1_wih"), w("lstm1_whh"), w("lstm1_b")

        h0 = jnp.zeros((tb, H), F32)
        c0 = jnp.zeros((tb, H), F32)
        h1 = jnp.zeros((tb, H), F32)
        c1 = jnp.zeros((tb, H), F32)
        # Fully unrolled recurrence, two layers interleaved per step: no
        # (T*tb, H) concatenate; layer 1 consumes h0_t straight from vregs.
        for t in range(T):
            g0 = xw0[t * tb:(t + 1) * tb, :] + jnp.dot(
                h0, whh0, preferred_element_type=F32)
            h0, c0 = cell(g0, c0)
            g1 = (jnp.dot(h0, wih1, preferred_element_type=F32) + b1
                  + jnp.dot(h1, whh1, preferred_element_type=F32))
            h1, c1 = cell(g1, c1)

        # qst_feature = fc(tanh([h0, c0, h1, c1])) as a single K=4H matmul
        # (one MXU push instead of four K=H pushes).
        qcat = jnp.concatenate(
            [jnp.tanh(h0), jnp.tanh(c0), jnp.tanh(h1), jnp.tanh(c1)], axis=1)
        qst = jnp.dot(qcat, w("qst_fc_w"),
                      preferred_element_type=F32) + w("qst_fc_b")        # (tb, E)

        # ------------------------------ fusion head -------------------------
        # TODO(synk): nn.Dropout(0.5) is treated as eval-mode identity (no RNG mask).
        comb = jnp.tanh(img * qst)
        z = jnp.tanh(jnp.dot(comb, w("fc1_w"),
                             preferred_element_type=F32) + w("fc1_b"))
        # fc2 columns zero-padded to 128 lanes -> lane-dense (unmasked) store.
        out_ref[...] = (jnp.dot(z, w("fc2_w", cols=LANES),
                                preferred_element_type=F32)
                        + w("fc2_b", cols=LANES))

    return kernel


# ----------------------------------------------------------------------------
# params / forward wrapper
# ----------------------------------------------------------------------------
def init_params(key, cfg):
    assert cfg.num_layers == 2, "fused kernel is specialized for num_layers=2"
    keys = jax.random.split(key, 22)

    def nrm(k, shape, scale=0.1):
        return (scale * jax.random.normal(k, shape)).astype(F32)

    p = {}
    p["conv_w"] = nrm(keys[0], (cfg.conv_k, cfg.conv_channels))
    p["conv_b"] = nrm(keys[1], (1, cfg.conv_channels))
    p["backbone_w"] = nrm(keys[2], (cfg.conv_channels, cfg.backbone_features))
    p["backbone_b"] = nrm(keys[3], (1, cfg.backbone_features))
    p["img_fc_w"] = nrm(keys[4], (cfg.backbone_features, cfg.embed_size))
    p["img_fc_b"] = nrm(keys[5], (1, cfg.embed_size))
    p["word2vec"] = nrm(keys[6], (cfg.qst_vocab_size, cfg.word_embed_size), 1.0)
    idx = 7
    in_dim = cfg.word_embed_size
    for l in range(cfg.num_layers):
        # NOTE: real PyTorch weights need W_ih/W_hh transposed to (in, 4H) and
        # the two bias vectors summed into the single bias row used here.
        p[f"lstm{l}_wih"] = nrm(keys[idx], (in_dim, 4 * cfg.hidden_size)); idx += 1
        p[f"lstm{l}_whh"] = nrm(keys[idx], (cfg.hidden_size, 4 * cfg.hidden_size)); idx += 1
        p[f"lstm{l}_b"] = nrm(keys[idx], (1, 4 * cfg.hidden_size)); idx += 1
        in_dim = cfg.hidden_size
    p["qst_fc_w"] = nrm(keys[idx], (2 * cfg.num_layers * cfg.hidden_size,
                                    cfg.embed_size)); idx += 1
    p["qst_fc_b"] = nrm(keys[idx], (1, cfg.embed_size)); idx += 1
    p["fc1_w"] = nrm(keys[idx], (cfg.embed_size, cfg.ans_vocab_size)); idx += 1
    p["fc1_b"] = nrm(keys[idx], (1, cfg.ans_vocab_size)); idx += 1
    p["fc2_w"] = nrm(keys[idx], (cfg.ans_vocab_size, cfg.ans_vocab_size)); idx += 1
    p["fc2_b"] = nrm(keys[idx], (1, cfg.ans_vocab_size)); idx += 1
    return p


def vqa_forward(params, img_nchw, qst, cfg):
    B, C, Hs, Ws = img_nchw.shape
    T = qst.shape[1]
    HW = Hs * Ws

    # batch tile: >=8 (fills sublanes), capped at 32 (keeps per-tile VMEM small);
    # larger batches become more grid steps in the SAME pallas_call (parallel
    # across TensorCores on v7x).
    tb = min(32, _round_up(B, 8))
    n_tiles = _round_up(B, tb) // tb
    b_pad = n_tiles * tb

    # --- cheap wrapper-side prep (tiny tensors, single XLA pass each) ---
    # batch zero-pad, NCHW -> NHWC, 3x3 im2col; K = 9*C is zero-padded to
    # conv_k so the conv matmul K dim is sublane-aligned.
    img_p = jnp.pad(img_nchw.astype(F32),
                    ((0, b_pad - B), (0, 0), (0, 0), (0, 0)))
    x = jnp.transpose(img_p, (0, 2, 3, 1))
    xp = jnp.pad(x, ((0, 0), (1, 1), (1, 1), (0, 0)))
    cols = [xp[:, dy:dy + Hs, dx:dx + Ws, :] for dy in range(3) for dx in range(3)]
    patches = jnp.concatenate(cols, axis=-1).reshape(b_pad * HW, 9 * C)
    patches = jnp.pad(patches, ((0, 0), (0, cfg.conv_k - 9 * C)))

    # question ids, time-major WITHIN each batch tile (row = t*tb + b_local) so
    # every grid step reads one contiguous (T*tb, 1) block.
    qst_p = jnp.pad(qst.astype(jnp.int32), ((0, b_pad - B), (0, 0)))
    ids = qst_p.reshape(n_tiles, tb, T).transpose(0, 2, 1).reshape(
        n_tiles * T * tb, 1)

    # all weights/biases -> ONE (rows, 128) VMEM slab (single resident DMA).
    slab, offsets = _pack_params(params)
    slab_rows = slab.shape[0]

    kernel = _make_vqa_kernel(
        offsets, tb=tb, hw=HW, seq_len=T, hidden=cfg.hidden_size,
        vocab=cfg.qst_vocab_size)

    out = pl.pallas_call(
        kernel,
        out_shape=jax.ShapeDtypeStruct((b_pad, LANES), F32),
        grid=(n_tiles,),
        in_specs=[
            # patches: row-tiled -> auto double-buffered DMA overlaps compute
            pl.BlockSpec((tb * HW, cfg.conv_k), lambda i: (i, 0)),
            pl.BlockSpec((T * tb, 1), lambda i: (i, 0)),
            # weight slab: constant block index -> fetched once, stays resident
            pl.BlockSpec((slab_rows, LANES), lambda i: (0, 0)),
        ],
        out_specs=pl.BlockSpec((tb, LANES), lambda i: (i, 0)),
        compiler_params=pltpu.CompilerParams(
            dimension_semantics=("parallel",)),
    )(patches, ids, slab)

    return out[:B, :cfg.ans_vocab_size]


# ----------------------------------------------------------------------------
# pure-JAX reference (same semantics) for a correctness check
# ----------------------------------------------------------------------------
def _hdot(a, b):
    return jnp.dot(a, b, precision=jax.lax.Precision.HIGHEST)


def vqa_reference(params, img_nchw, qst, cfg):
    B, C, Hs, Ws = img_nchw.shape
    T = qst.shape[1]
    HW = Hs * Ws
    H = cfg.hidden_size

    x = jnp.transpose(img_nchw.astype(F32), (0, 2, 3, 1))
    xp = jnp.pad(x, ((0, 0), (1, 1), (1, 1), (0, 0)))
    cols = [xp[:, dy:dy + Hs, dx:dx + Ws, :] for dy in range(3) for dx in range(3)]
    patches = jnp.concatenate(cols, axis=-1).reshape(B * HW, 9 * C)
    patches = jnp.pad(patches, ((0, 0), (0, cfg.conv_k - 9 * C)))
    conv = jnp.maximum(_hdot(patches, params["conv_w"]) + params["conv_b"], 0.0)
    pooled = conv.reshape(B, HW, -1).mean(axis=1)
    feat = jnp.maximum(_hdot(pooled, params["backbone_w"]) + params["backbone_b"], 0.0)
    img = _hdot(feat, params["img_fc_w"]) + params["img_fc_b"]
    img = img * lax.rsqrt(jnp.sum(img * img, axis=1, keepdims=True) + 1e-12)

    emb = jnp.tanh(params["word2vec"][qst])                    # (B, T, We)

    def lstm_layer(x_seq, wih, whh, b):
        h = jnp.zeros((B, H), F32)
        c = jnp.zeros((B, H), F32)
        hs = []
        for t in range(T):
            g = _hdot(x_seq[:, t, :], wih) + b + _hdot(h, whh)
            i = jax.nn.sigmoid(g[:, 0:H])
            f = jax.nn.sigmoid(g[:, H:2 * H])
            gg = jnp.tanh(g[:, 2 * H:3 * H])
            o = jax.nn.sigmoid(g[:, 3 * H:4 * H])
            c = f * c + i * gg
            h = o * jnp.tanh(c)
            hs.append(h)
        return jnp.stack(hs, axis=1), h, c

    _, h0, c0 = (y := lstm_layer(emb, params["lstm0_wih"],
                                 params["lstm0_whh"], params["lstm0_b"]))[0], y[1], y[2]
    y0 = y[0]
    _, h1, c1 = lstm_layer(y0, params["lstm1_wih"],
                           params["lstm1_whh"], params["lstm1_b"])
    qcat = jnp.tanh(jnp.concatenate([h0, c0, h1, c1], axis=1))
    qstf = _hdot(qcat, params["qst_fc_w"]) + params["qst_fc_b"]

    comb = jnp.tanh(img * qstf)
    z = jnp.tanh(_hdot(comb, params["fc1_w"]) + params["fc1_b"])
    return _hdot(z, params["fc2_w"]) + params["fc2_b"]


if __name__ == "__main__":
    cfg = Config()
    key = jax.random.PRNGKey(0)
    pkey, ikey, qkey = jax.random.split(key, 3)

    params = init_params(pkey, cfg)
    img = jax.random.normal(ikey, (2, cfg.img_channels, cfg.img_hw, cfg.img_hw),
                            dtype=F32)
    qst = jax.random.randint(qkey, (2, 8), 0, cfg.qst_vocab_size, dtype=jnp.int32)

    fwd = jax.jit(functools.partial(vqa_forward, cfg=cfg))
    out = fwd(params, img, qst)
    jax.block_until_ready(out)
    assert out.shape == (2, cfg.ans_vocab_size)
    assert bool(jnp.all(jnp.isfinite(out)))

    # structural correctness check against the pure-JAX reference (loose
    # tolerance to allow for MXU pass-precision differences).
    ref = vqa_reference(params, img, qst, cfg)
    max_err = float(jnp.max(jnp.abs(out - ref)))
    assert max_err < 2e-2, f"kernel/reference mismatch: max_abs_err={max_err}"

    print("KERNEL_OK")
</pallas_src>

<mosaic_0001>
module attributes {stable_mosaic.version = 11 : i64} {
  func.func @kernel(%arg0: i32, %arg1: memref<2048x32xf32, #tpu.memory_space<vmem>>, %arg2: memref<64x1xi32, #tpu.memory_space<vmem>>, %arg3: memref<520x128xf32, #tpu.memory_space<vmem>>, %arg4: memref<8x128xf32, #tpu.memory_space<vmem>>) attributes {dimension_semantics = [#tpu.dimension_semantics<parallel>], iteration_bounds = array<i64: 1>, scalar_prefetch = 0 : i64, scratch_operands = 0 : i64, tpu.core_type = #tpu.core_type<tc>, window_params = [{transform_indices = @transform_0, window_bounds = array<i64: 2048, 32>}, {transform_indices = @transform_1, window_bounds = array<i64: 64, 1>}, {pipeline_mode = #tpu.pipeline_mode<synchronous>, transform_indices = @transform_2, window_bounds = array<i64: 520, 128>}, {transform_indices = @transform_3, window_bounds = array<i64: 8, 128>}]} {
    %c0 = arith.constant 0 : index
    %c0_0 = arith.constant 0 : index
    %0 = vector.load %arg1[%c0, %c0_0] : memref<2048x32xf32, #tpu.memory_space<vmem>>, vector<2048x32xf32>
    %c0_1 = arith.constant 0 : index
    %c0_2 = arith.constant 0 : index
    %1 = vector.load %arg3[%c0_1, %c0_2] : memref<520x128xf32, #tpu.memory_space<vmem>>, vector<32x8xf32>
    %cst = arith.constant dense<0.000000e+00> : vector<2048x8xf32>
    %2 = tpu.matmul %0, %1, %cst {dimension_numbers = #tpu.dot_dimension_numbers<[1], [0], [0], [1], [0, 0, 1, 1], [], []>} : vector<2048x32xf32>, vector<32x8xf32>, vector<2048x8xf32> -> vector<2048x8xf32>
    %c32 = arith.constant 32 : index
    %c0_3 = arith.constant 0 : index
    %3 = vector.load %arg3[%c32, %c0_3] : memref<520x128xf32, #tpu.memory_space<vmem>>, vector<1x8xf32>
    %4 = vector.broadcast %3 : vector<1x8xf32> to vector<2048x8xf32>
    %5 = arith.addf %2, %4 : vector<2048x8xf32>
    %cst_4 = arith.constant 0.000000e+00 : f32
    %6 = vector.broadcast %cst_4 : f32 to vector<2048x8xf32>
    %7 = arith.maximumf %5, %6 : vector<2048x8xf32>
    %8 = tpu.iota {dimensions = array<i32: 1>} : vector<8x2048xi32>
    %9 = tpu.iota {dimensions = array<i32: 0>} : vector<8x2048xi32>
    %c256_i32 = arith.constant 256 : i32
    %10 = vector.broadcast %c256_i32 : i32 to vector<8x2048xi32>
    %11 = arith.muli %9, %10 : vector<8x2048xi32>
    %12 = arith.cmpi sge, %8, %11 : vector<8x2048xi32>
    %c1_i32 = arith.constant 1 : i32
    %13 = vector.broadcast %c1_i32 : i32 to vector<8x2048xi32>
    %14 = arith.addi %9, %13 : vector<8x2048xi32>
    %c256_i32_5 = arith.constant 256 : i32
    %15 = vector.broadcast %c256_i32_5 : i32 to vector<8x2048xi32>
    %16 = arith.muli %14, %15 : vector<8x2048xi32>
    %17 = arith.cmpi slt, %8, %16 : vector<8x2048xi32>
    %18 = arith.andi %12, %17 : vector<8x2048xi1>
    %cst_6 = arith.constant 3.906250e-03 : f32
    %cst_7 = arith.constant 0.000000e+00 : f32
    %19 = vector.broadcast %cst_6 : f32 to vector<8x2048xf32>
    %20 = vector.broadcast %cst_7 : f32 to vector<8x2048xf32>
    %21 = arith.select %18, %19, %20 : vector<8x2048xi1>, vector<8x2048xf32>
    %cst_8 = arith.constant dense<0.000000e+00> : vector<8x8xf32>
    %22 = tpu.matmul %21, %7, %cst_8 {dimension_numbers = #tpu.dot_dimension_numbers<[1], [0], [0], [1], [0, 0, 1, 1], [], []>} : vector<8x2048xf32>, vector<2048x8xf32>, vector<8x8xf32> -> vector<8x8xf32>
    %c40 = arith.constant 40 : index
    %c0_9 = arith.constant 0 : index
    %23 = vector.load %arg3[%c40, %c0_9] : memref<520x128xf32, #tpu.memory_space<vmem>>, vector<8x64xf32>
    %cst_10 = arith.constant dense<0.000000e+00> : vector<8x64xf32>
    %24 = tpu.matmul %22, %23, %cst_10 {dimension_numbers = #tpu.dot_dimension_numbers<[1], [0], [0], [1], [0, 0, 1, 1], [], []>} : vector<8x8xf32>, vector<8x64xf32>, vector<8x64xf32> -> vector<8x64xf32>
    %c48 = arith.constant 48 : index
    %c0_11 = arith.constant 0 : index
    %25 = vector.load %arg3[%c48, %c0_11] : memref<520x128xf32, #tpu.memory_space<vmem>>, vector<1x64xf32>
    %26 = vector.broadcast %25 : vector<1x64xf32> to vector<8x64xf32>
    %27 = arith.addf %24, %26 : vector<8x64xf32>
    %cst_12 = arith.constant 0.000000e+00 : f32
    %28 = vector.broadcast %cst_12 : f32 to vector<8x64xf32>
    %29 = arith.maximumf %27, %28 : vector<8x64xf32>
    %c56 = arith.constant 56 : index
    %c0_13 = arith.constant 0 : index
    %30 = vector.load %arg3[%c56, %c0_13] : memref<520x128xf32, #tpu.memory_space<vmem>>, vector<64x32xf32>
    %cst_14 = arith.constant dense<0.000000e+00> : vector<8x32xf32>
    %31 = tpu.matmul %29, %30, %cst_14 {dimension_numbers = #tpu.dot_dimension_numbers<[1], [0], [0], [1], [0, 0, 1, 1], [], []>} : vector<8x64xf32>, vector<64x32xf32>, vector<8x32xf32> -> vector<8x32xf32>
    %c120 = arith.constant 120 : index
    %c0_15 = arith.constant 0 : index
    %32 = vector.load %arg3[%c120, %c0_15] : memref<520x128xf32, #tpu.memory_space<vmem>>, vector<1x32xf32>
    %33 = vector.broadcast %32 : vector<1x32xf32> to vector<8x32xf32>
    %34 = arith.addf %31, %33 : vector<8x32xf32>
    %35 = arith.mulf %34, %34 : vector<8x32xf32>
    %cst_16 = arith.constant dense<0.000000e+00> : vector<8xf32>
    %36 = vector.multi_reduction <add>, %35, %cst_16 [1] : vector<8x32xf32> to vector<8xf32>
    %37 = vector.shape_cast %36 : vector<8xf32> to vector<8x1xf32>
    %cst_17 = arith.constant 9.99999996E-13 : f32
    %38 = vector.broadcast %cst_17 : f32 to vector<8x1xf32>
    %39 = arith.addf %37, %38 : vector<8x1xf32>
    %40 = math.rsqrt %39 : vector<8x1xf32>
    %41 = vector.broadcast %40 : vector<8x1xf32> to vector<8x32xf32>
    %42 = arith.mulf %34, %41 : vector<8x32xf32>
    %43 = tpu.iota {dimensions = array<i32: 1>} : vector<64x64xi32>
    %c0_18 = arith.constant 0 : index
    %c0_19 = arith.constant 0 : index
    %44 = vector.load %arg2[%c0_18, %c0_19] : memref<64x1xi32, #tpu.memory_space<vmem>>, vector<64x1xi32>
    %45 = vector.broadcast %44 : vector<64x1xi32> to vector<64x64xi32>
    %46 = arith.cmpi eq, %43, %45 : vector<64x64xi32>
    %47 = arith.extui %46 : vector<64x64xi1> to vector<64x64xi32>
    %48 = arith.sitofp %47 : vector<64x64xi32> to vector<64x64xf32>
    %c128 = arith.constant 128 : index
    %c0_20 = arith.constant 0 : index
    %49 = vector.load %arg3[%c128, %c0_20] : memref<520x128xf32, #tpu.memory_space<vmem>>, vector<64x16xf32>
    %cst_21 = arith.constant dense<0.000000e+00> : vector<64x16xf32>
    %50 = tpu.matmul %48, %49, %cst_21 {dimension_numbers = #tpu.dot_dimension_numbers<[1], [0], [0], [1], [0, 0, 1, 1], [], []>} : vector<64x64xf32>, vector<64x16xf32>, vector<64x16xf32> -> vector<64x16xf32>
    %51 = math.tanh %50 : vector<64x16xf32>
    %52 = tpu.iota {dimensions = array<i32: 1>} : vector<8x128xi32>
    %c64_i32 = arith.constant 64 : i32
    %53 = vector.broadcast %c64_i32 : i32 to vector<8x128xi32>
    %54 = arith.cmpi sge, %52, %53 : vector<8x128xi32>
    %c96_i32 = arith.constant 96 : i32
    %55 = vector.broadcast %c96_i32 : i32 to vector<8x128xi32>
    %56 = arith.cmpi slt, %52, %55 : vector<8x128xi32>
    %57 = arith.andi %54, %56 : vector<8x128xi1>
    %cst_22 = arith.constant 1.000000e+00 : f32
    %cst_23 = arith.constant 5.000000e-01 : f32
    %58 = vector.broadcast %cst_22 : f32 to vector<8x128xf32>
    %59 = vector.broadcast %cst_23 : f32 to vector<8x128xf32>
    %60 = arith.select %57, %58, %59 : vector<8x128xi1>, vector<8x128xf32>
    %c192 = arith.constant 192 : index
    %c0_24 = arith.constant 0 : index
    %61 = vector.load %arg3[%c192, %c0_24] : memref<520x128xf32, #tpu.memory_space<vmem>>, vector<16x128xf32>
    %cst_25 = arith.constant dense<0.000000e+00> : vector<64x128xf32>
    %62 = tpu.matmul %51, %61, %cst_25 {dimension_numbers = #tpu.dot_dimension_numbers<[1], [0], [0], [1], [0, 0, 1, 1], [], []>} : vector<64x16xf32>, vector<16x128xf32>, vector<64x128xf32> -> vector<64x128xf32>
    %c240 = arith.constant 240 : index
    %c0_26 = arith.constant 0 : index
    %63 = vector.load %arg3[%c240, %c0_26] : memref<520x128xf32, #tpu.memory_space<vmem>>, vector<1x128xf32>
    %64 = vector.broadcast %63 : vector<1x128xf32> to vector<64x128xf32>
    %65 = arith.addf %62, %64 : vector<64x128xf32>
    %c208 = arith.constant 208 : index
    %c0_27 = arith.constant 0 : index
    %66 = vector.load %arg3[%c208, %c0_27] : memref<520x128xf32, #tpu.memory_space<vmem>>, vector<32x128xf32>
    %c248 = arith.constant 248 : index
    %c0_28 = arith.constant 0 : index
    %67 = vector.load %arg3[%c248, %c0_28] : memref<520x128xf32, #tpu.memory_space<vmem>>, vector<32x128xf32>
    %c280 = arith.constant 280 : index
    %c0_29 = arith.constant 0 : index
    %68 = vector.load %arg3[%c280, %c0_29] : memref<520x128xf32, #tpu.memory_space<vmem>>, vector<32x128xf32>
    %c312 = arith.constant 312 : index
    %c0_30 = arith.constant 0 : index
    %69 = vector.load %arg3[%c312, %c0_30] : memref<520x128xf32, #tpu.memory_space<vmem>>, vector<1x128xf32>
    %cst_31 = arith.constant 0.000000e+00 : f32
    %70 = vector.broadcast %cst_31 : f32 to vector<8x32xf32>
    %cst_32 = arith.constant 0.000000e+00 : f32
    %71 = vector.broadcast %cst_32 : f32 to vector<8x32xf32>
    %cst_33 = arith.constant 0.000000e+00 : f32
    %72 = vector.broadcast %cst_33 : f32 to vector<8x32xf32>
    %cst_34 = arith.constant 0.000000e+00 : f32
    %73 = vector.broadcast %cst_34 : f32 to vector<8x32xf32>
    %74 = vector.extract_strided_slice %65 {offsets = [0, 0], sizes = [8, 128], strides = [1, 1]} : vector<64x128xf32> to vector<8x128xf32>
    %cst_35 = arith.constant dense<0.000000e+00> : vector<8x128xf32>
    %75 = tpu.matmul %70, %66, %cst_35 {dimension_numbers = #tpu.dot_dimension_numbers<[1], [0], [0], [1], [0, 0, 1, 1], [], []>} : vector<8x32xf32>, vector<32x128xf32>, vector<8x128xf32> -> vector<8x128xf32>
    %76 = arith.addf %74, %75 : vector<8x128xf32>
    %77 = arith.mulf %76, %60 : vector<8x128xf32>
    %78 = math.tanh %77 : vector<8x128xf32>
    %cst_36 = arith.constant 5.000000e-01 : f32
    %79 = vector.broadcast %cst_36 : f32 to vector<8x128xf32>
    %80 = arith.mulf %79, %78 : vector<8x128xf32>
    %cst_37 = arith.constant 5.000000e-01 : f32
    %81 = vector.broadcast %cst_37 : f32 to vector<8x128xf32>
    %82 = arith.addf %80, %81 : vector<8x128xf32>
    %83 = arith.select %57, %78, %82 : vector<8x128xi1>, vector<8x128xf32>
    %84 = vector.extract_strided_slice %83 {offsets = [0, 0], sizes = [8, 32], strides = [1, 1]} : vector<8x128xf32> to vector<8x32xf32>
    %85 = vector.extract_strided_slice %83 {offsets = [0, 32], sizes = [8, 32], strides = [1, 1]} : vector<8x128xf32> to vector<8x32xf32>
    %86 = vector.extract_strided_slice %83 {offsets = [0, 64], sizes = [8, 32], strides = [1, 1]} : vector<8x128xf32> to vector<8x32xf32>
    %87 = vector.extract_strided_slice %83 {offsets = [0, 96], sizes = [8, 32], strides = [1, 1]} : vector<8x128xf32> to vector<8x32xf32>
    %88 = arith.mulf %85, %71 : vector<8x32xf32>
    %89 = arith.mulf %84, %86 : vector<8x32xf32>
    %90 = arith.addf %88, %89 : vector<8x32xf32>
    %91 = math.tanh %90 : vector<8x32xf32>
    %92 = arith.mulf %87, %91 : vector<8x32xf32>
    %cst_38 = arith.constant dense<0.000000e+00> : vector<8x128xf32>
    %93 = tpu.matmul %92, %67, %cst_38 {dimension_numbers = #tpu.dot_dimension_numbers<[1], [0], [0], [1], [0, 0, 1, 1], [], []>} : vector<8x32xf32>, vector<32x128xf32>, vector<8x128xf32> -> vector<8x128xf32>
    %94 = vector.broadcast %69 : vector<1x128xf32> to vector<8x128xf32>
    %95 = arith.addf %93, %94 : vector<8x128xf32>
    %cst_39 = arith.constant dense<0.000000e+00> : vector<8x128xf32>
    %96 = tpu.matmul %72, %68, %cst_39 {dimension_numbers = #tpu.dot_dimension_numbers<[1], [0], [0], [1], [0, 0, 1, 1], [], []>} : vector<8x32xf32>, vector<32x128xf32>, vector<8x128xf32> -> vector<8x128xf32>
    %97 = arith.addf %95, %96 : vector<8x128xf32>
    %98 = arith.mulf %97, %60 : vector<8x128xf32>
    %99 = math.tanh %98 : vector<8x128xf32>
    %cst_40 = arith.constant 5.000000e-01 : f32
    %100 = vector.broadcast %cst_40 : f32 to vector<8x128xf32>
    %101 = arith.mulf %100, %99 : vector<8x128xf32>
    %cst_41 = arith.constant 5.000000e-01 : f32
    %102 = vector.broadcast %cst_41 : f32 to vector<8x128xf32>
    %103 = arith.addf %101, %102 : vector<8x128xf32>
    %104 = arith.select %57, %99, %103 : vector<8x128xi1>, vector<8x128xf32>
    %105 = vector.extract_strided_slice %104 {offsets = [0, 0], sizes = [8, 32], strides = [1, 1]} : vector<8x128xf32> to vector<8x32xf32>
    %106 = vector.extract_strided_slice %104 {offsets = [0, 32], sizes = [8, 32], strides = [1, 1]} : vector<8x128xf32> to vector<8x32xf32>
    %107 = vector.extract_strided_slice %104 {offsets = [0, 64], sizes = [8, 32], strides = [1, 1]} : vector<8x128xf32> to vector<8x32xf32>
    %108 = vector.extract_strided_slice %104 {offsets = [0, 96], sizes = [8, 32], strides = [1, 1]} : vector<8x128xf32> to vector<8x32xf32>
    %109 = arith.mulf %106, %73 : vector<8x32xf32>
    %110 = arith.mulf %105, %107 : vector<8x32xf32>
    %111 = arith.addf %109, %110 : vector<8x32xf32>
    %112 = math.tanh %111 : vector<8x32xf32>
    %113 = arith.mulf %108, %112 : vector<8x32xf32>
    %114 = vector.extract_strided_slice %65 {offsets = [8, 0], sizes = [8, 128], strides = [1, 1]} : vector<64x128xf32> to vector<8x128xf32>
    %cst_42 = arith.constant dense<0.000000e+00> : vector<8x128xf32>
    %115 = tpu.matmul %92, %66, %cst_42 {dimension_numbers = #tpu.dot_dimension_numbers<[1], [0], [0], [1], [0, 0, 1, 1], [], []>} : vector<8x32xf32>, vector<32x128xf32>, vector<8x128xf32> -> vector<8x128xf32>
    %116 = arith.addf %114, %115 : vector<8x128xf32>
    %117 = arith.mulf %116, %60 : vector<8x128xf32>
    %118 = math.tanh %117 : vector<8x128xf32>
    %cst_43 = arith.constant 5.000000e-01 : f32
    %119 = vector.broadcast %cst_43 : f32 to vector<8x128xf32>
    %120 = arith.mulf %119, %118 : vector<8x128xf32>
    %cst_44 = arith.constant 5.000000e-01 : f32
    %121 = vector.broadcast %cst_44 : f32 to vector<8x128xf32>
    %122 = arith.addf %120, %121 : vector<8x128xf32>
    %123 = arith.select %57, %118, %122 : vector<8x128xi1>, vector<8x128xf32>
    %124 = vector.extract_strided_slice %123 {offsets = [0, 0], sizes = [8, 32], strides = [1, 1]} : vector<8x128xf32> to vector<8x32xf32>
    %125 = vector.extract_strided_slice %123 {offsets = [0, 32], sizes = [8, 32], strides = [1, 1]} : vector<8x128xf32> to vector<8x32xf32>
    %126 = vector.extract_strided_slice %123 {offsets = [0, 64], sizes = [8, 32], strides = [1, 1]} : vector<8x128xf32> to vector<8x32xf32>
    %127 = vector.extract_strided_slice %123 {offsets = [0, 96], sizes = [8, 32], strides = [1, 1]} : vector<8x128xf32> to vector<8x32xf32>
    %128 = arith.mulf %125, %90 : vector<8x32xf32>
    %129 = arith.mulf %124, %126 : vector<8x32xf32>
    %130 = arith.addf %128, %129 : vector<8x32xf32>
    %131 = math.tanh %130 : vector<8x32xf32>
    %132 = arith.mulf %127, %131 : vector<8x32xf32>
    %cst_45 = arith.constant dense<0.000000e+00> : vector<8x128xf32>
    %133 = tpu.matmul %132, %67, %cst_45 {dimension_numbers = #tpu.dot_dimension_numbers<[1], [0], [0], [1], [0, 0, 1, 1], [], []>} : vector<8x32xf32>, vector<32x128xf32>, vector<8x128xf32> -> vector<8x128xf32>
    %134 = vector.broadcast %69 : vector<1x128xf32> to vector<8x128xf32>
    %135 = arith.addf %133, %134 : vector<8x128xf32>
    %cst_46 = arith.constant dense<0.000000e+00> : vector<8x128xf32>
    %136 = tpu.matmul %113, %68, %cst_46 {dimension_numbers = #tpu.dot_dimension_numbers<[1], [0], [0], [1], [0, 0, 1, 1], [], []>} : vector<8x32xf32>, vector<32x128xf32>, vector<8x128xf32> -> vector<8x128xf32>
    %137 = arith.addf %135, %136 : vector<8x128xf32>
    %138 = arith.mulf %137, %60 : vector<8x128xf32>
    %139 = math.tanh %138 : vector<8x128xf32>
    %cst_47 = arith.constant 5.000000e-01 : f32
    %140 = vector.broadcast %cst_47 : f32 to vector<8x128xf32>
    %141 = arith.mulf %140, %139 : vector<8x128xf32>
    %cst_48 = arith.constant 5.000000e-01 : f32
    %142 = vector.broadcast %cst_48 : f32 to vector<8x128xf32>
    %143 = arith.addf %141, %142 : vector<8x128xf32>
    %144 = arith.select %57, %139, %143 : vector<8x128xi1>, vector<8x128xf32>
    %145 = vector.extract_strided_slice %144 {offsets = [0, 0], sizes = [8, 32], strides = [1, 1]} : vector<8x128xf32> to vector<8x32xf32>
    %146 = vector.extract_strided_slice %144 {offsets = [0, 32], sizes = [8, 32], strides = [1, 1]} : vector<8x128xf32> to vector<8x32xf32>
    %147 = vector.extract_strided_slice %144 {offsets = [0, 64], sizes = [8, 32], strides = [1, 1]} : vector<8x128xf32> to vector<8x32xf32>
    %148 = vector.extract_strided_slice %144 {offsets = [0, 96], sizes = [8, 32], strides = [1, 1]} : vector<8x128xf32> to vector<8x32xf32>
    %149 = arith.mulf %146, %111 : vector<8x32xf32>
    %150 = arith.mulf %145, %147 : vector<8x32xf32>
    %151 = arith.addf %149, %150 : vector<8x32xf32>
    %152 = math.tanh %151 : vector<8x32xf32>
    %153 = arith.mulf %148, %152 : vector<8x32xf32>
    %154 = vector.extract_strided_slice %65 {offsets = [16, 0], sizes = [8, 128], strides = [1, 1]} : vector<64x128xf32> to vector<8x128xf32>
    %cst_49 = arith.constant dense<0.000000e+00> : vector<8x128xf32>
    %155 = tpu.matmul %132, %66, %cst_49 {dimension_numbers = #tpu.dot_dimension_numbers<[1], [0], [0], [1], [0, 0, 1, 1], [], []>} : vector<8x32xf32>, vector<32x128xf32>, vector<8x128xf32> -> vector<8x128xf32>
    %156 = arith.addf %154, %155 : vector<8x128xf32>
    %157 = arith.mulf %156, %60 : vector<8x128xf32>
    %158 = math.tanh %157 : vector<8x128xf32>
    %cst_50 = arith.constant 5.000000e-01 : f32
    %159 = vector.broadcast %cst_50 : f32 to vector<8x128xf32>
    %160 = arith.mulf %159, %158 : vector<8x128xf32>
    %cst_51 = arith.constant 5.000000e-01 : f32
    %161 = vector.broadcast %cst_51 : f32 to vector<8x128xf32>
    %162 = arith.addf %160, %161 : vector<8x128xf32>
    %163 = arith.select %57, %158, %162 : vector<8x128xi1>, vector<8x128xf32>
    %164 = vector.extract_strided_slice %163 {offsets = [0, 0], sizes = [8, 32], strides = [1, 1]} : vector<8x128xf32> to vector<8x32xf32>
    %165 = vector.extract_strided_slice %163 {offsets = [0, 32], sizes = [8, 32], strides = [1, 1]} : vector<8x128xf32> to vector<8x32xf32>
    %166 = vector.extract_strided_slice %163 {offsets = [0, 64], sizes = [8, 32], strides = [1, 1]} : vector<8x128xf32> to vector<8x32xf32>
    %167 = vector.extract_strided_slice %163 {offsets = [0, 96], sizes = [8, 32], strides = [1, 1]} : vector<8x128xf32> to vector<8x32xf32>
    %168 = arith.mulf %165, %130 : vector<8x32xf32>
    %169 = arith.mulf %164, %166 : vector<8x32xf32>
    %170 = arith.addf %168, %169 : vector<8x32xf32>
    %171 = math.tanh %170 : vector<8x32xf32>
    %172 = arith.mulf %167, %171 : vector<8x32xf32>
    %cst_52 = arith.constant dense<0.000000e+00> : vector<8x128xf32>
    %173 = tpu.matmul %172, %67, %cst_52 {dimension_numbers = #tpu.dot_dimension_numbers<[1], [0], [0], [1], [0, 0, 1, 1], [], []>} : vector<8x32xf32>, vector<32x128xf32>, vector<8x128xf32> -> vector<8x128xf32>
    %174 = vector.broadcast %69 : vector<1x128xf32> to vector<8x128xf32>
    %175 = arith.addf %173, %174 : vector<8x128xf32>
    %cst_53 = arith.constant dense<0.000000e+00> : vector<8x128xf32>
    %176 = tpu.matmul %153, %68, %cst_53 {dimension_numbers = #tpu.dot_dimension_numbers<[1], [0], [0], [1], [0, 0, 1, 1], [], []>} : vector<8x32xf32>, vector<32x128xf32>, vector<8x128xf32> -> vector<8x128xf32>
    %177 = arith.addf %175, %176 : vector<8x128xf32>
    %178 = arith.mulf %177, %60 : vector<8x128xf32>
    %179 = math.tanh %178 : vector<8x128xf32>
    %cst_54 = arith.constant 5.000000e-01 : f32
    %180 = vector.broadcast %cst_54 : f32 to vector<8x128xf32>
    %181 = arith.mulf %180, %179 : vector<8x128xf32>
    %cst_55 = arith.constant 5.000000e-01 : f32
    %182 = vector.broadcast %cst_55 : f32 to vector<8x128xf32>
    %183 = arith.addf %181, %182 : vector<8x128xf32>
    %184 = arith.select %57, %179, %183 : vector<8x128xi1>, vector<8x128xf32>
    %185 = vector.extract_strided_slice %184 {offsets = [0, 0], sizes = [8, 32], strides = [1, 1]} : vector<8x128xf32> to vector<8x32xf32>
    %186 = vector.extract_strided_slice %184 {offsets = [0, 32], sizes = [8, 32], strides = [1, 1]} : vector<8x128xf32> to vector<8x32xf32>
    %187 = vector.extract_strided_slice %184 {offsets = [0, 64], sizes = [8, 32], strides = [1, 1]} : vector<8x128xf32> to vector<8x32xf32>
    %188 = vector.extract_strided_slice %184 {offsets = [0, 96], sizes = [8, 32], strides = [1, 1]} : vector<8x128xf32> to vector<8x32xf32>
    %189 = arith.mulf %186, %151 : vector<8x32xf32>
    %190 = arith.mulf %185, %187 : vector<8x32xf32>
    %191 = arith.addf %189, %190 : vector<8x32xf32>
    %192 = math.tanh %191 : vector<8x32xf32>
    %193 = arith.mulf %188, %192 : vector<8x32xf32>
    %194 = vector.extract_strided_slice %65 {offsets = [24, 0], sizes = [8, 128], strides = [1, 1]} : vector<64x128xf32> to vector<8x128xf32>
    %cst_56 = arith.constant dense<0.000000e+00> : vector<8x128xf32>
    %195 = tpu.matmul %172, %66, %cst_56 {dimension_numbers = #tpu.dot_dimension_numbers<[1], [0], [0], [1], [0, 0, 1, 1], [], []>} : vector<8x32xf32>, vector<32x128xf32>, vector<8x128xf32> -> vector<8x128xf32>
    %196 = arith.addf %194, %195 : vector<8x128xf32>
    %197 = arith.mulf %196, %60 : vector<8x128xf32>
    %198 = math.tanh %197 : vector<8x128xf32>
    %cst_57 = arith.constant 5.000000e-01 : f32
    %199 = vector.broadcast %cst_57 : f32 to vector<8x128xf32>
    %200 = arith.mulf %199, %198 : vector<8x128xf32>
    %cst_58 = arith.constant 5.000000e-01 : f32
    %201 = vector.broadcast %cst_58 : f32 to vector<8x128xf32>
    %202 = arith.addf %200, %201 : vector<8x128xf32>
    %203 = arith.select %57, %198, %202 : vector<8x128xi1>, vector<8x128xf32>
    %204 = vector.extract_strided_slice %203 {offsets = [0, 0], sizes = [8, 32], strides = [1, 1]} : vector<8x128xf32> to vector<8x32xf32>
    %205 = vector.extract_strided_slice %203 {offsets = [0, 32], sizes = [8, 32], strides = [1, 1]} : vector<8x128xf32> to vector<8x32xf32>
    %206 = vector.extract_strided_slice %203 {offsets = [0, 64], sizes = [8, 32], strides = [1, 1]} : vector<8x128xf32> to vector<8x32xf32>
    %207 = vector.extract_strided_slice %203 {offsets = [0, 96], sizes = [8, 32], strides = [1, 1]} : vector<8x128xf32> to vector<8x32xf32>
    %208 = arith.mulf %205, %170 : vector<8x32xf32>
    %209 = arith.mulf %204, %206 : vector<8x32xf32>
    %210 = arith.addf %208, %209 : vector<8x32xf32>
    %211 = math.tanh %210 : vector<8x32xf32>
    %212 = arith.mulf %207, %211 : vector<8x32xf32>
    %cst_59 = arith.constant dense<0.000000e+00> : vector<8x128xf32>
    %213 = tpu.matmul %212, %67, %cst_59 {dimension_numbers = #tpu.dot_dimension_numbers<[1], [0], [0], [1], [0, 0, 1, 1], [], []>} : vector<8x32xf32>, vector<32x128xf32>, vector<8x128xf32> -> vector<8x128xf32>
    %214 = vector.broadcast %69 : vector<1x128xf32> to vector<8x128xf32>
    %215 = arith.addf %213, %214 : vector<8x128xf32>
    %cst_60 = arith.constant dense<0.000000e+00> : vector<8x128xf32>
    %216 = tpu.matmul %193, %68, %cst_60 {dimension_numbers = #tpu.dot_dimension_numbers<[1], [0], [0], [1], [0, 0, 1, 1], [], []>} : vector<8x32xf32>, vector<32x128xf32>, vector<8x128xf32> -> vector<8x128xf32>
    %217 = arith.addf %215, %216 : vector<8x128xf32>
    %218 = arith.mulf %217, %60 : vector<8x128xf32>
    %219 = math.tanh %218 : vector<8x128xf32>
    %cst_61 = arith.constant 5.000000e-01 : f32
    %220 = vector.broadcast %cst_61 : f32 to vector<8x128xf32>
    %221 = arith.mulf %220, %219 : vector<8x128xf32>
    %cst_62 = arith.constant 5.000000e-01 : f32
    %222 = vector.broadcast %cst_62 : f32 to vector<8x128xf32>
    %223 = arith.addf %221, %222 : vector<8x128xf32>
    %224 = arith.select %57, %219, %223 : vector<8x128xi1>, vector<8x128xf32>
    %225 = vector.extract_strided_slice %224 {offsets = [0, 0], sizes = [8, 32], strides = [1, 1]} : vector<8x128xf32> to vector<8x32xf32>
    %226 = vector.extract_strided_slice %224 {offsets = [0, 32], sizes = [8, 32], strides = [1, 1]} : vector<8x128xf32> to vector<8x32xf32>
    %227 = vector.extract_strided_slice %224 {offsets = [0, 64], sizes = [8, 32], strides = [1, 1]} : vector<8x128xf32> to vector<8x32xf32>
    %228 = vector.extract_strided_slice %224 {offsets = [0, 96], sizes = [8, 32], strides = [1, 1]} : vector<8x128xf32> to vector<8x32xf32>
    %229 = arith.mulf %226, %191 : vector<8x32xf32>
    %230 = arith.mulf %225, %227 : vector<8x32xf32>
    %231 = arith.addf %229, %230 : vector<8x32xf32>
    %232 = math.tanh %231 : vector<8x32xf32>
    %233 = arith.mulf %228, %232 : vector<8x32xf32>
    %234 = vector.extract_strided_slice %65 {offsets = [32, 0], sizes = [8, 128], strides = [1, 1]} : vector<64x128xf32> to vector<8x128xf32>
    %cst_63 = arith.constant dense<0.000000e+00> : vector<8x128xf32>
    %235 = tpu.matmul %212, %66, %cst_63 {dimension_numbers = #tpu.dot_dimension_numbers<[1], [0], [0], [1], [0, 0, 1, 1], [], []>} : vector<8x32xf32>, vector<32x128xf32>, vector<8x128xf32> -> vector<8x128xf32>
    %236 = arith.addf %234, %235 : vector<8x128xf32>
    %237 = arith.mulf %236, %60 : vector<8x128xf32>
    %238 = math.tanh %237 : vector<8x128xf32>
    %cst_64 = arith.constant 5.000000e-01 : f32
    %239 = vector.broadcast %cst_64 : f32 to vector<8x128xf32>
    %240 = arith.mulf %239, %238 : vector<8x128xf32>
    %cst_65 = arith.constant 5.000000e-01 : f32
    %241 = vector.broadcast %cst_65 : f32 to vector<8x128xf32>
    %242 = arith.addf %240, %241 : vector<8x128xf32>
    %243 = arith.select %57, %238, %242 : vector<8x128xi1>, vector<8x128xf32>
    %244 = vector.extract_strided_slice %243 {offsets = [0, 0], sizes = [8, 32], strides = [1, 1]} : vector<8x128xf32> to vector<8x32xf32>
    %245 = vector.extract_strided_slice %243 {offsets = [0, 32], sizes = [8, 32], strides = [1, 1]} : vector<8x128xf32> to vector<8x32xf32>
    %246 = vector.extract_strided_slice %243 {offsets = [0, 64], sizes = [8, 32], strides = [1, 1]} : vector<8x128xf32> to vector<8x32xf32>
    %247 = vector.extract_strided_slice %243 {offsets = [0, 96], sizes = [8, 32], strides = [1, 1]} : vector<8x128xf32> to vector<8x32xf32>
    %248 = arith.mulf %245, %210 : vector<8x32xf32>
    %249 = arith.mulf %244, %246 : vector<8x32xf32>
    %250 = arith.addf %248, %249 : vector<8x32xf32>
    %251 = math.tanh %250 : vector<8x32xf32>
    %252 = arith.mulf %247, %251 : vector<8x32xf32>
    %cst_66 = arith.constant dense<0.000000e+00> : vector<8x128xf32>
    %253 = tpu.matmul %252, %67, %cst_66 {dimension_numbers = #tpu.dot_dimension_numbers<[1], [0], [0], [1], [0, 0, 1, 1], [], []>} : vector<8x32xf32>, vector<32x128xf32>, vector<8x128xf32> -> vector<8x128xf32>
    %254 = vector.broadcast %69 : vector<1x128xf32> to vector<8x128xf32>
    %255 = arith.addf %253, %254 : vector<8x128xf32>
    %cst_67 = arith.constant dense<0.000000e+00> : vector<8x128xf32>
    %256 = tpu.matmul %233, %68, %cst_67 {dimension_numbers = #tpu.dot_dimension_numbers<[1], [0], [0], [1], [0, 0, 1, 1], [], []>} : vector<8x32xf32>, vector<32x128xf32>, vector<8x128xf32> -> vector<8x128xf32>
    %257 = arith.addf %255, %256 : vector<8x128xf32>
    %258 = arith.mulf %257, %60 : vector<8x128xf32>
    %259 = math.tanh %258 : vector<8x128xf32>
    %cst_68 = arith.constant 5.000000e-01 : f32
    %260 = vector.broadcast %cst_68 : f32 to vector<8x128xf32>
    %261 = arith.mulf %260, %259 : vector<8x128xf32>
    %cst_69 = arith.constant 5.000000e-01 : f32
    %262 = vector.broadcast %cst_69 : f32 to vector<8x128xf32>
    %263 = arith.addf %261, %262 : vector<8x128xf32>
    %264 = arith.select %57, %259, %263 : vector<8x128xi1>, vector<8x128xf32>
    %265 = vector.extract_strided_slice %264 {offsets = [0, 0], sizes = [8, 32], strides = [1, 1]} : vector<8x128xf32> to vector<8x32xf32>
    %266 = vector.extract_strided_slice %264 {offsets = [0, 32], sizes = [8, 32], strides = [1, 1]} : vector<8x128xf32> to vector<8x32xf32>
    %267 = vector.extract_strided_slice %264 {offsets = [0, 64], sizes = [8, 32], strides = [1, 1]} : vector<8x128xf32> to vector<8x32xf32>
    %268 = vector.extract_strided_slice %264 {offsets = [0, 96], sizes = [8, 32], strides = [1, 1]} : vector<8x128xf32> to vector<8x32xf32>
    %269 = arith.mulf %266, %231 : vector<8x32xf32>
    %270 = arith.mulf %265, %267 : vector<8x32xf32>
    %271 = arith.addf %269, %270 : vector<8x32xf32>
    %272 = math.tanh %271 : vector<8x32xf32>
    %273 = arith.mulf %268, %272 : vector<8x32xf32>
    %274 = vector.extract_strided_slice %65 {offsets = [40, 0], sizes = [8, 128], strides = [1, 1]} : vector<64x128xf32> to vector<8x128xf32>
    %cst_70 = arith.constant dense<0.000000e+00> : vector<8x128xf32>
    %275 = tpu.matmul %252, %66, %cst_70 {dimension_numbers = #tpu.dot_dimension_numbers<[1], [0], [0], [1], [0, 0, 1, 1], [], []>} : vector<8x32xf32>, vector<32x128xf32>, vector<8x128xf32> -> vector<8x128xf32>
    %276 = arith.addf %274, %275 : vector<8x128xf32>
    %277 = arith.mulf %276, %60 : vector<8x128xf32>
    %278 = math.tanh %277 : vector<8x128xf32>
    %cst_71 = arith.constant 5.000000e-01 : f32
    %279 = vector.broadcast %cst_71 : f32 to vector<8x128xf32>
    %280 = arith.mulf %279, %278 : vector<8x128xf32>
    %cst_72 = arith.constant 5.000000e-01 : f32
    %281 = vector.broadcast %cst_72 : f32 to vector<8x128xf32>
    %282 = arith.addf %280, %281 : vector<8x128xf32>
    %283 = arith.select %57, %278, %282 : vector<8x128xi1>, vector<8x128xf32>
    %284 = vector.extract_strided_slice %283 {offsets = [0, 0], sizes = [8, 32], strides = [1, 1]} : vector<8x128xf32> to vector<8x32xf32>
    %285 = vector.extract_strided_slice %283 {offsets = [0, 32], sizes = [8, 32], strides = [1, 1]} : vector<8x128xf32> to vector<8x32xf32>
    %286 = vector.extract_strided_slice %283 {offsets = [0, 64], sizes = [8, 32], strides = [1, 1]} : vector<8x128xf32> to vector<8x32xf32>
    %287 = vector.extract_strided_slice %283 {offsets = [0, 96], sizes = [8, 32], strides = [1, 1]} : vector<8x128xf32> to vector<8x32xf32>
    %288 = arith.mulf %285, %250 : vector<8x32xf32>
    %289 = arith.mulf %284, %286 : vector<8x32xf32>
    %290 = arith.addf %288, %289 : vector<8x32xf32>
    %291 = math.tanh %290 : vector<8x32xf32>
    %292 = arith.mulf %287, %291 : vector<8x32xf32>
    %cst_73 = arith.constant dense<0.000000e+00> : vector<8x128xf32>
    %293 = tpu.matmul %292, %67, %cst_73 {dimension_numbers = #tpu.dot_dimension_numbers<[1], [0], [0], [1], [0, 0, 1, 1], [], []>} : vector<8x32xf32>, vector<32x128xf32>, vector<8x128xf32> -> vector<8x128xf32>
    %294 = vector.broadcast %69 : vector<1x128xf32> to vector<8x128xf32>
    %295 = arith.addf %293, %294 : vector<8x128xf32>
    %cst_74 = arith.constant dense<0.000000e+00> : vector<8x128xf32>
    %296 = tpu.matmul %273, %68, %cst_74 {dimension_numbers = #tpu.dot_dimension_numbers<[1], [0], [0], [1], [0, 0, 1, 1], [], []>} : vector<8x32xf32>, vector<32x128xf32>, vector<8x128xf32> -> vector<8x128xf32>
    %297 = arith.addf %295, %296 : vector<8x128xf32>
    %298 = arith.mulf %297, %60 : vector<8x128xf32>
    %299 = math.tanh %298 : vector<8x128xf32>
    %cst_75 = arith.constant 5.000000e-01 : f32
    %300 = vector.broadcast %cst_75 : f32 to vector<8x128xf32>
    %301 = arith.mulf %300, %299 : vector<8x128xf32>
    %cst_76 = arith.constant 5.000000e-01 : f32
    %302 = vector.broadcast %cst_76 : f32 to vector<8x128xf32>
    %303 = arith.addf %301, %302 : vector<8x128xf32>
    %304 = arith.select %57, %299, %303 : vector<8x128xi1>, vector<8x128xf32>
    %305 = vector.extract_strided_slice %304 {offsets = [0, 0], sizes = [8, 32], strides = [1, 1]} : vector<8x128xf32> to vector<8x32xf32>
    %306 = vector.extract_strided_slice %304 {offsets = [0, 32], sizes = [8, 32], strides = [1, 1]} : vector<8x128xf32> to vector<8x32xf32>
    %307 = vector.extract_strided_slice %304 {offsets = [0, 64], sizes = [8, 32], strides = [1, 1]} : vector<8x128xf32> to vector<8x32xf32>
    %308 = vector.extract_strided_slice %304 {offsets = [0, 96], sizes = [8, 32], strides = [1, 1]} : vector<8x128xf32> to vector<8x32xf32>
    %309 = arith.mulf %306, %271 : vector<8x32xf32>
    %310 = arith.mulf %305, %307 : vector<8x32xf32>
    %311 = arith.addf %309, %310 : vector<8x32xf32>
    %312 = math.tanh %311 : vector<8x32xf32>
    %313 = arith.mulf %308, %312 : vector<8x32xf32>
    %314 = vector.extract_strided_slice %65 {offsets = [48, 0], sizes = [8, 128], strides = [1, 1]} : vector<64x128xf32> to vector<8x128xf32>
    %cst_77 = arith.constant dense<0.000000e+00> : vector<8x128xf32>
    %315 = tpu.matmul %292, %66, %cst_77 {dimension_numbers = #tpu.dot_dimension_numbers<[1], [0], [0], [1], [0, 0, 1, 1], [], []>} : vector<8x32xf32>, vector<32x128xf32>, vector<8x128xf32> -> vector<8x128xf32>
    %316 = arith.addf %314, %315 : vector<8x128xf32>
    %317 = arith.mulf %316, %60 : vector<8x128xf32>
    %318 = math.tanh %317 : vector<8x128xf32>
    %cst_78 = arith.constant 5.000000e-01 : f32
    %319 = vector.broadcast %cst_78 : f32 to vector<8x128xf32>
    %320 = arith.mulf %319, %318 : vector<8x128xf32>
    %cst_79 = arith.constant 5.000000e-01 : f32
    %321 = vector.broadcast %cst_79 : f32 to vector<8x128xf32>
    %322 = arith.addf %320, %321 : vector<8x128xf32>
    %323 = arith.select %57, %318, %322 : vector<8x128xi1>, vector<8x128xf32>
    %324 = vector.extract_strided_slice %323 {offsets = [0, 0], sizes = [8, 32], strides = [1, 1]} : vector<8x128xf32> to vector<8x32xf32>
    %325 = vector.extract_strided_slice %323 {offsets = [0, 32], sizes = [8, 32], strides = [1, 1]} : vector<8x128xf32> to vector<8x32xf32>
    %326 = vector.extract_strided_slice %323 {offsets = [0, 64], sizes = [8, 32], strides = [1, 1]} : vector<8x128xf32> to vector<8x32xf32>
    %327 = vector.extract_strided_slice %323 {offsets = [0, 96], sizes = [8, 32], strides = [1, 1]} : vector<8x128xf32> to vector<8x32xf32>
    %328 = arith.mulf %325, %290 : vector<8x32xf32>
    %329 = arith.mulf %324, %326 : vector<8x32xf32>
    %330 = arith.addf %328, %329 : vector<8x32xf32>
    %331 = math.tanh %330 : vector<8x32xf32>
    %332 = arith.mulf %327, %331 : vector<8x32xf32>
    %cst_80 = arith.constant dense<0.000000e+00> : vector<8x128xf32>
    %333 = tpu.matmul %332, %67, %cst_80 {dimension_numbers = #tpu.dot_dimension_numbers<[1], [0], [0], [1], [0, 0, 1, 1], [], []>} : vector<8x32xf32>, vector<32x128xf32>, vector<8x128xf32> -> vector<8x128xf32>
    %334 = vector.broadcast %69 : vector<1x128xf32> to vector<8x128xf32>
    %335 = arith.addf %333, %334 : vector<8x128xf32>
    %cst_81 = arith.constant dense<0.000000e+00> : vector<8x128xf32>
    %336 = tpu.matmul %313, %68, %cst_81 {dimension_numbers = #tpu.dot_dimension_numbers<[1], [0], [0], [1], [0, 0, 1, 1], [], []>} : vector<8x32xf32>, vector<32x128xf32>, vector<8x128xf32> -> vector<8x128xf32>
    %337 = arith.addf %335, %336 : vector<8x128xf32>
    %338 = arith.mulf %337, %60 : vector<8x128xf32>
    %339 = math.tanh %338 : vector<8x128xf32>
    %cst_82 = arith.constant 5.000000e-01 : f32
    %340 = vector.broadcast %cst_82 : f32 to vector<8x128xf32>
    %341 = arith.mulf %340, %339 : vector<8x128xf32>
    %cst_83 = arith.constant 5.000000e-01 : f32
    %342 = vector.broadcast %cst_83 : f32 to vector<8x128xf32>
    %343 = arith.addf %341, %342 : vector<8x128xf32>
    %344 = arith.select %57, %339, %343 : vector<8x128xi1>, vector<8x128xf32>
    %345 = vector.extract_strided_slice %344 {offsets = [0, 0], sizes = [8, 32], strides = [1, 1]} : vector<8x128xf32> to vector<8x32xf32>
    %346 = vector.extract_strided_slice %344 {offsets = [0, 32], sizes = [8, 32], strides = [1, 1]} : vector<8x128xf32> to vector<8x32xf32>
    %347 = vector.extract_strided_slice %344 {offsets = [0, 64], sizes = [8, 32], strides = [1, 1]} : vector<8x128xf32> to vector<8x32xf32>
    %348 = vector.extract_strided_slice %344 {offsets = [0, 96], sizes = [8, 32], strides = [1, 1]} : vector<8x128xf32> to vector<8x32xf32>
    %349 = arith.mulf %346, %311 : vector<8x32xf32>
    %350 = arith.mulf %345, %347 : vector<8x32xf32>
    %351 = arith.addf %349, %350 : vector<8x32xf32>
    %352 = math.tanh %351 : vector<8x32xf32>
    %353 = arith.mulf %348, %352 : vector<8x32xf32>
    %354 = vector.extract_strided_slice %65 {offsets = [56, 0], sizes = [8, 128], strides = [1, 1]} : vector<64x128xf32> to vector<8x128xf32>
    %cst_84 = arith.constant dense<0.000000e+00> : vector<8x128xf32>
    %355 = tpu.matmul %332, %66, %cst_84 {dimension_numbers = #tpu.dot_dimension_numbers<[1], [0], [0], [1], [0, 0, 1, 1], [], []>} : vector<8x32xf32>, vector<32x128xf32>, vector<8x128xf32> -> vector<8x128xf32>
    %356 = arith.addf %354, %355 : vector<8x128xf32>
    %357 = arith.mulf %356, %60 : vector<8x128xf32>
    %358 = math.tanh %357 : vector<8x128xf32>
    %cst_85 = arith.constant 5.000000e-01 : f32
    %359 = vector.broadcast %cst_85 : f32 to vector<8x128xf32>
    %360 = arith.mulf %359, %358 : vector<8x128xf32>
    %cst_86 = arith.constant 5.000000e-01 : f32
    %361 = vector.broadcast %cst_86 : f32 to vector<8x128xf32>
    %362 = arith.addf %360, %361 : vector<8x128xf32>
    %363 = arith.select %57, %358, %362 : vector<8x128xi1>, vector<8x128xf32>
    %364 = vector.extract_strided_slice %363 {offsets = [0, 0], sizes = [8, 32], strides = [1, 1]} : vector<8x128xf32> to vector<8x32xf32>
    %365 = vector.extract_strided_slice %363 {offsets = [0, 32], sizes = [8, 32], strides = [1, 1]} : vector<8x128xf32> to vector<8x32xf32>
    %366 = vector.extract_strided_slice %363 {offsets = [0, 64], sizes = [8, 32], strides = [1, 1]} : vector<8x128xf32> to vector<8x32xf32>
    %367 = vector.extract_strided_slice %363 {offsets = [0, 96], sizes = [8, 32], strides = [1, 1]} : vector<8x128xf32> to vector<8x32xf32>
    %368 = arith.mulf %365, %330 : vector<8x32xf32>
    %369 = arith.mulf %364, %366 : vector<8x32xf32>
    %370 = arith.addf %368, %369 : vector<8x32xf32>
    %371 = math.tanh %370 : vector<8x32xf32>
    %372 = arith.mulf %367, %371 : vector<8x32xf32>
    %cst_87 = arith.constant dense<0.000000e+00> : vector<8x128xf32>
    %373 = tpu.matmul %372, %67, %cst_87 {dimension_numbers = #tpu.dot_dimension_numbers<[1], [0], [0], [1], [0, 0, 1, 1], [], []>} : vector<8x32xf32>, vector<32x128xf32>, vector<8x128xf32> -> vector<8x128xf32>
    %374 = vector.broadcast %69 : vector<1x128xf32> to vector<8x128xf32>
    %375 = arith.addf %373, %374 : vector<8x128xf32>
    %cst_88 = arith.constant dense<0.000000e+00> : vector<8x128xf32>
    %376 = tpu.matmul %353, %68, %cst_88 {dimension_numbers = #tpu.dot_dimension_numbers<[1], [0], [0], [1], [0, 0, 1, 1], [], []>} : vector<8x32xf32>, vector<32x128xf32>, vector<8x128xf32> -> vector<8x128xf32>
    %377 = arith.addf %375, %376 : vector<8x128xf32>
    %378 = arith.mulf %377, %60 : vector<8x128xf32>
    %379 = math.tanh %378 : vector<8x128xf32>
    %cst_89 = arith.constant 5.000000e-01 : f32
    %380 = vector.broadcast %cst_89 : f32 to vector<8x128xf32>
    %381 = arith.mulf %380, %379 : vector<8x128xf32>
    %cst_90 = arith.constant 5.000000e-01 : f32
    %382 = vector.broadcast %cst_90 : f32 to vector<8x128xf32>
    %383 = arith.addf %381, %382 : vector<8x128xf32>
    %384 = arith.select %57, %379, %383 : vector<8x128xi1>, vector<8x128xf32>
    %385 = vector.extract_strided_slice %384 {offsets = [0, 0], sizes = [8, 32], strides = [1, 1]} : vector<8x128xf32> to vector<8x32xf32>
    %386 = vector.extract_strided_slice %384 {offsets = [0, 32], sizes = [8, 32], strides = [1, 1]} : vector<8x128xf32> to vector<8x32xf32>
    %387 = vector.extract_strided_slice %384 {offsets = [0, 64], sizes = [8, 32], strides = [1, 1]} : vector<8x128xf32> to vector<8x32xf32>
    %388 = vector.extract_strided_slice %384 {offsets = [0, 96], sizes = [8, 32], strides = [1, 1]} : vector<8x128xf32> to vector<8x32xf32>
    %389 = arith.mulf %386, %351 : vector<8x32xf32>
    %390 = arith.mulf %385, %387 : vector<8x32xf32>
    %391 = arith.addf %389, %390 : vector<8x32xf32>
    %392 = math.tanh %391 : vector<8x32xf32>
    %393 = arith.mulf %388, %392 : vector<8x32xf32>
    %394 = math.tanh %372 : vector<8x32xf32>
    %395 = math.tanh %370 : vector<8x32xf32>
    %396 = math.tanh %393 : vector<8x32xf32>
    %397 = math.tanh %391 : vector<8x32xf32>
    %398 = tpu.concatenate %394, %395, %396, %397 in 1 : vector<8x32xf32>, vector<8x32xf32>, vector<8x32xf32>, vector<8x32xf32> -> vector<8x128xf32>
    %c320 = arith.constant 320 : index
    %c0_91 = arith.constant 0 : index
    %399 = vector.load %arg3[%c320, %c0_91] : memref<520x128xf32, #tpu.memory_space<vmem>>, vector<128x32xf32>
    %cst_92 = arith.constant dense<0.000000e+00> : vector<8x32xf32>
    %400 = tpu.matmul %398, %399, %cst_92 {dimension_numbers = #tpu.dot_dimension_numbers<[1], [0], [0], [1], [0, 0, 1, 1], [], []>} : vector<8x128xf32>, vector<128x32xf32>, vector<8x32xf32> -> vector<8x32xf32>
    %c448 = arith.constant 448 : index
    %c0_93 = arith.constant 0 : index
    %401 = vector.load %arg3[%c448, %c0_93] : memref<520x128xf32, #tpu.memory_space<vmem>>, vector<1x32xf32>
    %402 = vector.broadcast %401 : vector<1x32xf32> to vector<8x32xf32>
    %403 = arith.addf %400, %402 : vector<8x32xf32>
    %404 = arith.mulf %42, %403 : vector<8x32xf32>
    %405 = math.tanh %404 : vector<8x32xf32>
    %c456 = arith.constant 456 : index
    %c0_94 = arith.constant 0 : index
    %406 = vector.load %arg3[%c456, %c0_94] : memref<520x128xf32, #tpu.memory_space<vmem>>, vector<32x16xf32>
    %cst_95 = arith.constant dense<0.000000e+00> : vector<8x16xf32>
    %407 = tpu.matmul %405, %406, %cst_95 {dimension_numbers = #tpu.dot_dimension_numbers<[1], [0], [0], [1], [0, 0, 1, 1], [], []>} : vector<8x32xf32>, vector<32x16xf32>, vector<8x16xf32> -> vector<8x16xf32>
    %c488 = arith.constant 488 : index
    %c0_96 = arith.constant 0 : index
    %408 = vector.load %arg3[%c488, %c0_96] : memref<520x128xf32, #tpu.memory_space<vmem>>, vector<1x16xf32>
    %409 = vector.broadcast %408 : vector<1x16xf32> to vector<8x16xf32>
    %410 = arith.addf %407, %409 : vector<8x16xf32>
    %411 = math.tanh %410 : vector<8x16xf32>
    %c496 = arith.constant 496 : index
    %c0_97 = arith.constant 0 : index
    %412 = vector.load %arg3[%c496, %c0_97] : memref<520x128xf32, #tpu.memory_space<vmem>>, vector<16x128xf32>
    %cst_98 = arith.constant dense<0.000000e+00> : vector<8x128xf32>
    %413 = tpu.matmul %411, %412, %cst_98 {dimension_numbers = #tpu.dot_dimension_numbers<[1], [0], [0], [1], [0, 0, 1, 1], [], []>} : vector<8x16xf32>, vector<16x128xf32>, vector<8x128xf32> -> vector<8x128xf32>
    %c512 = arith.constant 512 : index
    %c0_99 = arith.constant 0 : index
    %414 = vector.load %arg3[%c512, %c0_99] : memref<520x128xf32, #tpu.memory_space<vmem>>, vector<1x128xf32>
    %415 = vector.broadcast %414 : vector<1x128xf32> to vector<8x128xf32>
    %416 = arith.addf %413, %415 : vector<8x128xf32>
    %c0_100 = arith.constant 0 : index
    %c0_101 = arith.constant 0 : index
    %417 = vector.load %arg4[%c0_100, %c0_101] : memref<8x128xf32, #tpu.memory_space<vmem>>, vector<8x128xf32>
    tpu.vector_store %arg4[%c0_100, %c0_101], %416 {strides = array<i32>} : memref<8x128xf32, #tpu.memory_space<vmem>>, vector<8x128xf32>,
    return
  }
  func.func @transform_0(%arg0: i32) -> (i32, i32) {
    %c0_i32 = arith.constant 0 : i32
    %c0_i32_0 = arith.constant 0 : i32
    return %arg0, %c0_i32 : i32, i32
  }
  func.func @transform_1(%arg0: i32) -> (i32, i32) {
    %c0_i32 = arith.constant 0 : i32
    %c0_i32_0 = arith.constant 0 : i32
    return %arg0, %c0_i32 : i32, i32
  }
  func.func @transform_2(%arg0: i32) -> (i32, i32) {
    %c0_i32 = arith.constant 0 : i32
    %c0_i32_0 = arith.constant 0 : i32
    %c0_i32_1 = arith.constant 0 : i32
    return %c0_i32, %c0_i32_0 : i32, i32
  }
  func.func @transform_3(%arg0: i32) -> (i32, i32) {
    %c0_i32 = arith.constant 0 : i32
    %c0_i32_0 = arith.constant 0 : i32
    return %arg0, %c0_i32 : i32, i32
  }
}

</mosaic_0001>

<bundles_post_ra>
// kernel: vqa_forward.1
= control target key start
LH: loop header
LB: loop body
LE: loop exit
PB: predicated region body
PF: predicated region fallthrough
CT: control target
= control target key end

     0   :  { %vm279_vm0 = vcmask 261120   ;;  %s8665_s5 = smov 64   ;;  %s8666_s6 = smov 32   ;;  %s10886_s2 = inlined_call_operand.vmem [shape: f32[520,128], index: 2, kind: input, shape index: {}]   ;;  %s10887_s0 = inlined_call_operand.vmem [shape: f32[2048,32], index: 0, kind: input, shape index: {}]   ;;  %s10888_s1 = inlined_call_operand.vmem [shape: s32[64,1], index: 1, kind: input, shape index: {}]   ;;  %s10889_s3 = inlined_call_operand.vmem [shape: f32[8,128], index: 3, kind: output, shape index: {}]  }
   0x1   :  { %v270_v0 = vld [vmem:[%s10886_s2] sm:$0xff]  ;;  %v271_v1 = vld [vmem:[%s10886_s2 + $0x8] sm:$0xff]  ;;  %v272_v2 = vld [vmem:[%s10886_s2 + $0x10] sm:$0xff]  ;;  %s8667_s29 = smov 96  }
   0x2   :  { %v8059_v3 = vpack.c.bf16 %v271_v1, %v270_v0  ;;  %v273_v4 = vld [vmem:[%s10886_s2 + $0x18] sm:$0xff]  ;;  %v14_v5 = vld [vmem:[%s10887_s0] sm:$0xff]  ;;  %v15_v7 = vld [vmem:[%s10887_s0 + $0x8] sm:$0xff] }
   0x3   :  { %v8063_v6 = vpack.c.bf16 %v273_v4, %v272_v2  ;;  %7290 = vmatprep.mubr.msk.f32.mxu0 %vm279_vm0, %v14_v5  ;;  %v16_v8 = vld [vmem:[%s10887_s0 + $0x10] sm:$0xff]  ;;  %v17_v9 = vld [vmem:[%s10887_s0 + $0x18] sm:$0xff]  ;;  %v18_v10 = vld [vmem:[%s10887_s0 + $0x20] sm:$0xff] }
   0x4   :  { %8060 = vmatprep.subr.bf16.mxu0 %v8059_v3  ;;  %v19_v11 = vld [vmem:[%s10887_s0 + $0x28] sm:$0xff]  ;;  %v20_v12 = vld [vmem:[%s10887_s0 + $0x30] sm:$0xff]  ;;  %v21_v13 = vld [vmem:[%s10887_s0 + $0x38] sm:$0xff] }
   0x5   :  { %8062 = vmatpush3.bf16.msra.mxu0 %v8059_v3  ;;  %v22_v14 = vld [vmem:[%s10887_s0 + $0x40] sm:$0xff]  ;;  %v23_v15 = vld [vmem:[%s10887_s0 + $0x48] sm:$0xff]  ;;  %v24_v16 = vld [vmem:[%s10887_s0 + $0x50] sm:$0xff] }
   0x6   :  { %8064 = vmatprep.subr.bf16.mxu0 %v8063_v6  ;;  %v25_v17 = vld [vmem:[%s10887_s0 + $0x58] sm:$0xff]  ;;  %v26_v18 = vld [vmem:[%s10887_s0 + $0x60] sm:$0xff]  ;;  %v27_v19 = vld [vmem:[%s10887_s0 + $0x68] sm:$0xff] }
   0x7   :  { %v28_v20 = vld [vmem:[%s10887_s0 + $0x70] sm:$0xff]  ;;  %v29_v21 = vld [vmem:[%s10887_s0 + $0x78] sm:$0xff]  ;;  %v30_v22 = vld [vmem:[%s10887_s0 + $0x80] sm:$0xff] }
   0x8   :  { %v31_v23 = vld [vmem:[%s10887_s0 + $0x88] sm:$0xff]  ;;  %v32_v24 = vld [vmem:[%s10887_s0 + $0x90] sm:$0xff]  ;;  %v33_v25 = vld [vmem:[%s10887_s0 + $0x98] sm:$0xff] }
   0x9   :  { %8066 = vmatpush3.bf16.msra.mxu0 %v8063_v6  ;;  %v34_v26 = vld [vmem:[%s10887_s0 + $0xa0] sm:$0xff]  ;;  %v35_v27 = vld [vmem:[%s10887_s0 + $0xa8] sm:$0xff]  ;;  %v36_v28 = vld [vmem:[%s10887_s0 + $0xb0] sm:$0xff] }
   0xa   :  { %v37_v29 = vld [vmem:[%s10887_s0 + $0xb8] sm:$0xff]  ;;  %v38_v30 = vld [vmem:[%s10887_s0 + $0xc0] sm:$0xff]  ;;  %v39_v31 = vld [vmem:[%s10887_s0 + $0xc8] sm:$0xff] }
   0xb   :  { %v40_v32 = vld [vmem:[%s10887_s0 + $0xd0] sm:$0xff]  ;;  %v41_v33 = vld [vmem:[%s10887_s0 + $0xd8] sm:$0xff]  ;;  %v42_v34 = vld [vmem:[%s10887_s0 + $0xe0] sm:$0xff] }
   0xc   :  { %7291 = vmatmul.mubr.msk.f32.vlgmr.msra.gmra.mrb[0].mxu0 %vm279_vm0, %v15_v7  ;;  %v43_v35 = vld [vmem:[%s10887_s0 + $0xe8] sm:$0xff]  ;;  %v44_v36 = vld [vmem:[%s10887_s0 + $0xf0] sm:$0xff]  ;;  %v45_v37 = vld [vmem:[%s10887_s0 + $0xf8] sm:$0xff] }
   0xd   :  { %7293 = vmatprep.mubr.msk.f32.mxu0 %vm279_vm0, %v16_v8  ;;  %v46_v38 = vld [vmem:[%s10887_s0 + $0x100] sm:$0xff]  ;;  %v47_v39 = vld [vmem:[%s10887_s0 + $0x108] sm:$0xff]  ;;  %v48_v40 = vld [vmem:[%s10887_s0 + $0x110] sm:$0xff] }
   0xe   :  { %v49_v41 = vld [vmem:[%s10887_s0 + $0x118] sm:$0xff]  ;;  %v50_v42 = vld [vmem:[%s10887_s0 + $0x120] sm:$0xff]  ;;  %v51_v43 = vld [vmem:[%s10887_s0 + $0x128] sm:$0xff] }
   0xf   :  { %v52_v44 = vld [vmem:[%s10887_s0 + $0x130] sm:$0xff]  ;;  %v53_v45 = vld [vmem:[%s10887_s0 + $0x138] sm:$0xff]  ;;  %v54_v46 = vld [vmem:[%s10887_s0 + $0x140] sm:$0xff] }
  0x10   :  { %7294 = vmatmul.mubr.msk.f32.gmra.mrb[2].mxu0 %vm279_vm0, %v17_v9  ;;  %v55_v47 = vld [vmem:[%s10887_s0 + $0x148] sm:$0xff]  ;;  %v56_v48 = vld [vmem:[%s10887_s0 + $0x150] sm:$0xff]  ;;  %v57_v49 = vld [vmem:[%s10887_s0 + $0x158] sm:$0xff] }
  0x11   :  { %7296 = vmatprep.mubr.msk.f32.mxu0 %vm279_vm0, %v18_v10  ;;  %v58_v50 = vld [vmem:[%s10887_s0 + $0x160] sm:$0xff]  ;;  %v59_v51 = vld [vmem:[%s10887_s0 + $0x168] sm:$0xff]  ;;  %v60_v52 = vld [vmem:[%s10887_s0 + $0x170] sm:$0xff] }
  0x12   :  { %v61_v53 = vld [vmem:[%s10887_s0 + $0x178] sm:$0xff]  ;;  %v62_v54 = vld [vmem:[%s10887_s0 + $0x180] sm:$0xff]  ;;  %v63_v55 = vld [vmem:[%s10887_s0 + $0x188] sm:$0xff] }
  0x13   :  { %v64_v56 = vld [vmem:[%s10887_s0 + $0x190] sm:$0xff]  ;;  %v65_v57 = vld [vmem:[%s10887_s0 + $0x198] sm:$0xff]  ;;  %v66_v58 = vld [vmem:[%s10887_s0 + $0x1a0] sm:$0xff] }
  0x14   :  { %7297 = vmatmul.mubr.msk.f32.gmra.mrb[4].mxu0 %vm279_vm0, %v19_v11  ;;  %v67_v59 = vld [vmem:[%s10887_s0 + $0x1a8] sm:$0xff]  ;;  %v68_v60 = vld [vmem:[%s10887_s0 + $0x1b0] sm:$0xff]  ;;  %v69_v61 = vld [vmem:[%s10887_s0 + $0x1b8] sm:$0xff] }
  0x15   :  { %7299 = vmatprep.mubr.msk.f32.mxu0 %vm279_vm0, %v20_v12  ;;  %v70_v62 = vld [vmem:[%s10887_s0 + $0x1c0] sm:$0xff]  ;;  %v71_v63 = vld [vmem:[%s10887_s0 + $0x1c8] sm:$0xff]  ;;  %v72_v0 = vld [vmem:[%s10887_s0 + $0x1d0] sm:$0xff] }
  0x16   :  { %v73_v1 = vld [vmem:[%s10887_s0 + $0x1d8] sm:$0xff]  ;;  %v74_v2 = vld [vmem:[%s10887_s0 + $0x1e0] sm:$0xff]  ;;  %v75_v3 = vld [vmem:[%s10887_s0 + $0x1e8] sm:$0xff] }
  0x17   :  { %v76_v4 = vld [vmem:[%s10887_s0 + $0x1f0] sm:$0xff]  ;;  %v77_v5 = vld [vmem:[%s10887_s0 + $0x1f8] sm:$0xff]  ;;  %v78_v6 = vld [vmem:[%s10887_s0 + $0x200] sm:$0xff] }
  0x18   :  { %7300 = vmatmul.mubr.msk.f32.gmra.mrb[6].mxu0 %vm279_vm0, %v21_v13  ;;  %v79_v7 = vld [vmem:[%s10887_s0 + $0x208] sm:$0xff]  ;;  %v80_v8 = vld [vmem:[%s10887_s0 + $0x210] sm:$0xff]  ;;  %v81_v9 = vld [vmem:[%s10887_s0 + $0x218] sm:$0xff] }
  0x19   :  { %7302 = vmatprep.mubr.msk.f32.mxu0 %vm279_vm0, %v22_v14  ;;  %v82_v10 = vld [vmem:[%s10887_s0 + $0x220] sm:$0xff]  ;;  %v83_v11 = vld [vmem:[%s10887_s0 + $0x228] sm:$0xff]  ;;  %v84_v12 = vld [vmem:[%s10887_s0 + $0x230] sm:$0xff] }
  0x1a   :  { %v85_v13 = vld [vmem:[%s10887_s0 + $0x238] sm:$0xff]  ;;  %v86_v14 = vld [vmem:[%s10887_s0 + $0x240] sm:$0xff] }
  0x1c   :  { %7303 = vmatmul.mubr.msk.f32.gmra.mrb[8].mxu0 %vm279_vm0, %v23_v15  ;;  %v87_v15 = vld [vmem:[%s10887_s0 + $0x248] sm:$0xff] }
  0x1d   :  { %7305 = vmatprep.mubr.msk.f32.mxu0 %vm279_vm0, %v24_v16  ;;  %v88_v16 = vld [vmem:[%s10887_s0 + $0x250] sm:$0xff] }
  0x20   :  { %7306 = vmatmul.mubr.msk.f32.gmra.mrb[10].mxu0 %vm279_vm0, %v25_v17  ;;  %v89_v17 = vld [vmem:[%s10887_s0 + $0x258] sm:$0xff] }
  0x21   :  { %7308 = vmatprep.mubr.msk.f32.mxu0 %vm279_vm0, %v26_v18  ;;  %v90_v18 = vld [vmem:[%s10887_s0 + $0x260] sm:$0xff] }
  0x24   :  { %7309 = vmatmul.mubr.msk.f32.gmra.mrb[12].mxu0 %vm279_vm0, %v27_v19  ;;  %v91_v19 = vld [vmem:[%s10887_s0 + $0x268] sm:$0xff] }
  0x25   :  { %7311 = vmatprep.mubr.msk.f32.mxu0 %vm279_vm0, %v28_v20  ;;  %v92_v20 = vld [vmem:[%s10887_s0 + $0x270] sm:$0xff] }
  0x28   :  { %7312 = vmatmul.mubr.msk.f32.gmra.mrb[14].mxu0 %vm279_vm0, %v29_v21  ;;  %v93_v21 = vld [vmem:[%s10887_s0 + $0x278] sm:$0xff] }
  0x29   :  { %7314 = vmatprep.mubr.msk.f32.mxu0 %vm279_vm0, %v30_v22  ;;  %v94_v22 = vld [vmem:[%s10887_s0 + $0x280] sm:$0xff] }
  0x2c   :  { %7315 = vmatmul.mubr.msk.f32.gmra.mrb[16].mxu0 %vm279_vm0, %v31_v23  ;;  %v95_v23 = vld [vmem:[%s10887_s0 + $0x288] sm:$0xff] }
  0x2d   :  { %7317 = vmatprep.mubr.msk.f32.mxu0 %vm279_vm0, %v32_v24  ;;  %v96_v24 = vld [vmem:[%s10887_s0 + $0x290] sm:$0xff] }
  0x30   :  { %7318 = vmatmul.mubr.msk.f32.gmra.mrb[18].mxu0 %vm279_vm0, %v33_v25  ;;  %v97_v25 = vld [vmem:[%s10887_s0 + $0x298] sm:$0xff] }
  0x31   :  { %7320 = vmatprep.mubr.msk.f32.mxu0 %vm279_vm0, %v34_v26  ;;  %v98_v26 = vld [vmem:[%s10887_s0 + $0x2a0] sm:$0xff] }
  0x34   :  { %7321 = vmatmul.mubr.msk.f32.gmra.mrb[20].mxu0 %vm279_vm0, %v35_v27  ;;  %v99_v27 = vld [vmem:[%s10887_s0 + $0x2a8] sm:$0xff] }
  0x35   :  { %7323 = vmatprep.mubr.msk.f32.mxu0 %vm279_vm0, %v36_v28  ;;  %v100_v28 = vld [vmem:[%s10887_s0 + $0x2b0] sm:$0xff] }
  0x38   :  { %7324 = vmatmul.mubr.msk.f32.gmra.mrb[22].mxu0 %vm279_vm0, %v37_v29  ;;  %v101_v29 = vld [vmem:[%s10887_s0 + $0x2b8] sm:$0xff] }
  0x39   :  { %7326 = vmatprep.mubr.msk.f32.mxu0 %vm279_vm0, %v38_v30  ;;  %v102_v30 = vld [vmem:[%s10887_s0 + $0x2c0] sm:$0xff] }
  0x3c   :  { %7327 = vmatmul.mubr.msk.f32.gmra.mrb[24].mxu0 %vm279_vm0, %v39_v31  ;;  %v103_v31 = vld [vmem:[%s10887_s0 + $0x2c8] sm:$0xff] }
  0x3d   :  { %7329 = vmatprep.mubr.msk.f32.mxu0 %vm279_vm0, %v40_v32  ;;  %v104_v32 = vld [vmem:[%s10887_s0 + $0x2d0] sm:$0xff] }
  0x40   :  { %7330 = vmatmul.mubr.msk.f32.gmra.mrb[26].mxu0 %vm279_vm0, %v41_v33  ;;  %v105_v33 = vld [vmem:[%s10887_s0 + $0x2d8] sm:$0xff] }
  0x41   :  { %7332 = vmatprep.mubr.msk.f32.mxu0 %vm279_vm0, %v42_v34  ;;  %v2649_v34 = vlaneseq }
  0x44   :  { %7333 = vmatmul.mubr.msk.f32.gmra.mrb[28].mxu0 %vm279_vm0, %v43_v35  ;;  %v106_v35 = vld [vmem:[%s10887_s0 + $0x2e0] sm:$0xff] }
  0x45   :  { %7335 = vmatprep.mubr.msk.f32.mxu0 %vm279_vm0, %v44_v36  ;;  %v2667_v36 = vshrl.u32 %v2649_v34, 7 }
  0x48   :  { %7336 = vmatmul.mubr.msk.f32.gmra.mrb[30].mxu0 %vm279_vm0, %v45_v37  ;;  %v107_v37 = vld [vmem:[%s10887_s0 + $0x2e8] sm:$0xff] }
  0x49   :  { %7338 = vmatprep.mubr.msk.f32.mxu0 %vm279_vm0, %v46_v38  ;;  %v9075_v38 = vand.u32 127, %v2649_v34 }
  0x4c   :  { %7339 = vmatmul.mubr.msk.f32.gmra.mrb[32].mxu0 %vm279_vm0, %v47_v39  ;;  %v2685_v39 = vadd.s32 1, %v2667_v36 }
  0x4d   :  { %7341 = vmatprep.mubr.msk.f32.mxu0 %vm279_vm0, %v48_v40  ;;  %v108_v40 = vld [vmem:[%s10887_s0 + $0x2f0] sm:$0xff] }
  0x50   :  { %7342 = vmatmul.mubr.msk.f32.gmra.mrb[34].mxu0 %vm279_vm0, %v49_v41  ;;  %v2651_v41 = vadd.s32 128, %v9075_v38 }
  0x51   :  { %7344 = vmatprep.mubr.msk.f32.mxu0 %vm279_vm0, %v50_v42  ;;  %v9081_v42 = vmul.u32 256, %v2667_v36  ;;  %v131_v36 = vld [vmem:[%s10887_s0 + $0x3a8] sm:$0xff] }
  0x53   :  { %vm2670_vm1 = vcmp.ge.s32.totalorder %v2651_v41, %v9081_v42  ;;  %vm2669_vm4 = vcmp.ge.s32.totalorder %v9075_v38, %v9081_v42 }
  0x54   :  { %7345 = vmatmul.mubr.msk.f32.gmra.mrb[36].mxu0 %vm279_vm0, %v51_v43  ;;  %v9083_v43 = vmul.u32 256, %v2685_v39  ;;  %v132_v39 = vld [vmem:[%s10887_s0 + $0x3b0] sm:$0xff] }
  0x55   :  { %7347 = vmatprep.mubr.msk.f32.mxu0 %vm279_vm0, %v52_v44  ;;  %v109_v44 = vld [vmem:[%s10887_s0 + $0x2f8] sm:$0xff] }
  0x56   :  { %vm2688_vm2 = vcmp.lt.s32.totalorder %v2651_v41, %v9083_v43  ;;  %vm2687_vm5 = vcmp.lt.s32.totalorder %v9075_v38, %v9083_v43 }
  0x57   :  { %vm2704_vm3 = vmand %vm2670_vm1, %vm2688_vm2 }
  0x58   :  { %7348 = vmatmul.mubr.msk.f32.gmra.mrb[38].mxu0 %vm279_vm0, %v53_v45  ;;  %v110_v45 = vld [vmem:[%s10887_s0 + $0x300] sm:$0xff]  ;;  %vm2703_vm8 = vmand %vm2669_vm4, %vm2687_vm5 }
  0x59   :  { %7350 = vmatprep.mubr.msk.f32.mxu0 %vm279_vm0, %v54_v46  ;;  %v8659_v46 = vmov 0.00390625  }
  0x5a   :  { %6487 = vmatprep.mubr.msk.f32.mxu1 %vm2704_vm3, %v8659_v46 }
  0x5c   :  { %7351 = vmatmul.mubr.msk.f32.gmra.mrb[40].mxu0 %vm279_vm0, %v55_v47  ;;  %v111_v47 = vld [vmem:[%s10887_s0 + $0x308] sm:$0xff] }
  0x5d   :  { %7353 = vmatprep.mubr.msk.f32.mxu0 %vm279_vm0, %v56_v48  ;;  %v112_v48 = vld [vmem:[%s10887_s0 + $0x310] sm:$0xff] }
  0x60   :  { %7354 = vmatmul.mubr.msk.f32.gmra.mrb[42].mxu0 %vm279_vm0, %v57_v49  ;;  %v113_v49 = vld [vmem:[%s10887_s0 + $0x318] sm:$0xff] }
  0x61   :  { %7356 = vmatprep.mubr.msk.f32.mxu0 %vm279_vm0, %v58_v50  ;;  %v114_v50 = vld [vmem:[%s10887_s0 + $0x320] sm:$0xff] }
  0x64   :  { %7357 = vmatmul.mubr.msk.f32.gmra.mrb[44].mxu0 %vm279_vm0, %v59_v51  ;;  %v115_v51 = vld [vmem:[%s10887_s0 + $0x328] sm:$0xff] }
  0x65   :  { %7359 = vmatprep.mubr.msk.f32.mxu0 %vm279_vm0, %v60_v52  ;;  %v116_v52 = vld [vmem:[%s10887_s0 + $0x330] sm:$0xff] }
  0x68   :  { %7360 = vmatmul.mubr.msk.f32.gmra.mrb[46].mxu0 %vm279_vm0, %v61_v53  ;;  %v117_v53 = vld [vmem:[%s10887_s0 + $0x338] sm:$0xff] }
  0x69   :  { %7362 = vmatprep.mubr.msk.f32.mxu0 %vm279_vm0, %v62_v54  ;;  %v118_v54 = vld [vmem:[%s10887_s0 + $0x340] sm:$0xff] }
  0x6c   :  { %7363 = vmatmul.mubr.msk.f32.gmra.mrb[48].mxu0 %vm279_vm0, %v63_v55  ;;  %v119_v55 = vld [vmem:[%s10887_s0 + $0x348] sm:$0xff] }
  0x6d   :  { %7365 = vmatprep.mubr.msk.f32.mxu0 %vm279_vm0, %v64_v56  ;;  %v120_v56 = vld [vmem:[%s10887_s0 + $0x350] sm:$0xff] }
  0x70   :  { %7366 = vmatmul.mubr.msk.f32.gmra.mrb[50].mxu0 %vm279_vm0, %v65_v57  ;;  %v9140_v57 = vld [vmem:[%s10886_s2 + $0x20] ss:$0 sm:$0xff] }
  0x71   :  { %7368 = vmatprep.mubr.msk.f32.mxu0 %vm279_vm0, %v66_v58  ;;  %v121_v58 = vld [vmem:[%s10887_s0 + $0x358] sm:$0xff] }
  0x74   :  { %7369 = vmatmul.mubr.msk.f32.gmra.mrb[52].mxu0 %vm279_vm0, %v67_v59  ;;  %v122_v59 = vld [vmem:[%s10887_s0 + $0x360] sm:$0xff] }
  0x75   :  { %7371 = vmatprep.mubr.msk.f32.mxu0 %vm279_vm0, %v68_v60 }
  0x78   :  { %7372 = vmatmul.mubr.msk.f32.gmra.mrb[54].mxu0 %vm279_vm0, %v69_v61 }
  0x79   :  { %7374 = vmatprep.mubr.msk.f32.mxu0 %vm279_vm0, %v70_v62 }
  0x7c   :  { %7375 = vmatmul.mubr.msk.f32.gmra.mrb[56].mxu0 %vm279_vm0, %v71_v63 }
  0x7d   :  { %7377 = vmatprep.mubr.msk.f32.mxu0 %vm279_vm0, %v72_v0  ;;  %v123_v0 = vld [vmem:[%s10887_s0 + $0x368] sm:$0xff] }
  0x80   :  { %7378 = vmatmul.mubr.msk.f32.gmra.mrb[58].mxu0 %vm279_vm0, %v73_v1  ;;  %v124_v1 = vld [vmem:[%s10887_s0 + $0x370] sm:$0xff] }
  0x81   :  { %7380 = vmatprep.mubr.msk.f32.mxu0 %vm279_vm0, %v74_v2 }
  0x84   :  { %7381 = vmatmul.mubr.msk.f32.gmra.mrb[60].mxu0 %vm279_vm0, %v75_v3 }
  0x85   :  { %7383 = vmatprep.mubr.msk.f32.mxu0 %vm279_vm0, %v76_v4 }
  0x88   :  { %7384 = vmatmul.mubr.msk.f32.gmra.mrb[62].mxu0 %vm279_vm0, %v77_v5 }
  0x89   :  { %7386 = vmatprep.mubr.msk.f32.mxu0 %vm279_vm0, %v78_v6 }
  0x8c   :  { %7387 = vmatmul.mubr.msk.f32.gmra.mrb[64].mxu0 %vm279_vm0, %v79_v7 }
  0x8d   :  { %7389 = vmatprep.mubr.msk.f32.mxu0 %vm279_vm0, %v80_v8  ;;  %v125_v8 = vld [vmem:[%s10887_s0 + $0x378] sm:$0xff] }
  0x90   :  { %7390 = vmatmul.mubr.msk.f32.gmra.mrb[66].mxu0 %vm279_vm0, %v81_v9 }
  0x91   :  { %7392 = vmatprep.mubr.msk.f32.mxu0 %vm279_vm0, %v82_v10 }
  0x94   :  { %7393 = vmatmul.mubr.msk.f32.gmra.mrb[68].mxu0 %vm279_vm0, %v83_v11  ;;  %v126_v11 = vld [vmem:[%s10887_s0 + $0x380] sm:$0xff] }
  0x95   :  { %7395 = vmatprep.mubr.msk.f32.mxu0 %vm279_vm0, %v84_v12 }
  0x98   :  { %7396 = vmatmul.mubr.msk.f32.gmra.mrb[70].mxu0 %vm279_vm0, %v85_v13 }
  0x99   :  { %7398 = vmatprep.mubr.msk.f32.mxu0 %vm279_vm0, %v86_v14 }
  0x9c   :  { %7399 = vmatmul.mubr.msk.f32.gmra.mrb[72].mxu0 %vm279_vm0, %v87_v15 }
  0x9d   :  { %7401 = vmatprep.mubr.msk.f32.mxu0 %vm279_vm0, %v88_v16 }
  0xa0   :  { %7402 = vmatmul.mubr.msk.f32.gmra.mrb[74].mxu0 %vm279_vm0, %v89_v17 }
  0xa1   :  { %7404 = vmatprep.mubr.msk.f32.mxu0 %vm279_vm0, %v90_v18  ;;  %v127_v18 = vld [vmem:[%s10887_s0 + $0x388] sm:$0xff] }
  0xa4   :  { %7405 = vmatmul.mubr.msk.f32.gmra.mrb[76].mxu0 %vm279_vm0, %v91_v19 }
  0xa5   :  { %7407 = vmatprep.mubr.msk.f32.mxu0 %vm279_vm0, %v92_v20  ;;  %v128_v20 = vld [vmem:[%s10887_s0 + $0x390] sm:$0xff] }
  0xa8   :  { %7408 = vmatmul.mubr.msk.f32.gmra.mrb[78].mxu0 %vm279_vm0, %v93_v21 }
  0xa9   :  { %7410 = vmatprep.mubr.msk.f32.mxu0 %vm279_vm0, %v94_v22 }
  0xac   :  { %7411 = vmatmul.mubr.msk.f32.gmra.mrb[80].mxu0 %vm279_vm0, %v95_v23 }
  0xad   :  { %7413 = vmatprep.mubr.msk.f32.mxu0 %vm279_vm0, %v96_v24 }
  0xb0   :  { %7414 = vmatmul.mubr.msk.f32.gmra.mrb[82].mxu0 %vm279_vm0, %v97_v25 }
  0xb1   :  { %7416 = vmatprep.mubr.msk.f32.mxu0 %vm279_vm0, %v98_v26 }
  0xb4   :  { %7417 = vmatmul.mubr.msk.f32.gmra.mrb[84].mxu0 %vm279_vm0, %v99_v27  ;;  %v129_v27 = vld [vmem:[%s10887_s0 + $0x398] sm:$0xff] }
  0xb5   :  { %7419 = vmatprep.mubr.msk.f32.mxu0 %vm279_vm0, %v100_v28 }
  0xb8   :  { %7420 = vmatmul.mubr.msk.f32.gmra.mrb[86].mxu0 %vm279_vm0, %v101_v29  ;;  %v130_v29 = vld [vmem:[%s10887_s0 + $0x3a0] sm:$0xff] }
  0xb9   :  { %7422 = vmatprep.mubr.msk.f32.mxu0 %vm279_vm0, %v102_v30 }
  0xbc   :  { %7423 = vmatmul.mubr.msk.f32.gmra.mrb[88].mxu0 %vm279_vm0, %v103_v31 }
  0xbd   :  { %7425 = vmatprep.mubr.msk.f32.mxu0 %vm279_vm0, %v104_v32 }
  0xc0   :  { %7426 = vmatmul.mubr.msk.f32.gmra.mrb[90].mxu0 %vm279_vm0, %v105_v33 }
  0xc1   :  { %7428 = vmatprep.mubr.msk.f32.mxu0 %vm279_vm0, %v106_v35 }
  0xc4   :  { %7429 = vmatmul.mubr.msk.f32.gmra.mrb[92].mxu0 %vm279_vm0, %v107_v37 }
  0xc5   :  { %7431 = vmatprep.mubr.msk.f32.mxu0 %vm279_vm0, %v108_v40 }
  0xc8   :  { %7432 = vmatmul.mubr.msk.f32.gmra.mrb[94].mxu0 %vm279_vm0, %v109_v44 }
  0xc9   :  { %7434 = vmatprep.mubr.msk.f32.mxu0 %vm279_vm0, %v110_v45 }
  0xcc   :  { %7435 = vmatmul.mubr.msk.f32.gmra.mrb[96].mxu0 %vm279_vm0, %v111_v47 }
  0xcd   :  { %7437 = vmatprep.mubr.msk.f32.mxu0 %vm279_vm0, %v112_v48 }
  0xd0   :  { %7438 = vmatmul.mubr.msk.f32.gmra.mrb[98].mxu0 %vm279_vm0, %v113_v49  ;;  %v133_v49 = vld [vmem:[%s10887_s0 + $0x3b8] sm:$0xff] }
  0xd1   :  { %7440 = vmatprep.mubr.msk.f32.mxu0 %vm279_vm0, %v114_v50 }
  0xd4   :  { %7441 = vmatmul.mubr.msk.f32.gmra.mrb[100].mxu0 %vm279_vm0, %v115_v51  ;;  %v134_v51 = vld [vmem:[%s10887_s0 + $0x3c0] sm:$0xff] }
  0xd5   :  { %7443 = vmatprep.mubr.msk.f32.mxu0 %vm279_vm0, %v116_v52 }
  0xd8   :  { %7444 = vmatmul.mubr.msk.f32.gmra.mrb[102].mxu0 %vm279_vm0, %v117_v53 }
  0xd9   :  { %7446 = vmatprep.mubr.msk.f32.mxu0 %vm279_vm0, %v118_v54 }
  0xdc   :  { %7447 = vmatmul.mubr.msk.f32.gmra.mrb[104].mxu0 %vm279_vm0, %v119_v55 }
  0xdd   :  { %7449 = vmatprep.mubr.msk.f32.mxu0 %vm279_vm0, %v120_v56 }
  0xdf   :  { %v7292_v60 = vpop.f32.mrb[0].mxu0 }
  0xe0   :  { %v1120_v61 = vadd.f32 %v7292_v60, %v9140_v57  ;;  %v1114_v62 = vpop.f32.mrb[1].mxu0  ;;  %7450 = vmatmul.mubr.msk.f32.gmra.mrb[106].mxu0 %vm279_vm0, %v121_v58 }
  0xe1   :  { %v1115_v63 = vadd.f32 %v9140_v57, %v1114_v62  ;;  %7452 = vmatprep.mubr.msk.f32.mxu0 %vm279_vm0, %v122_v59  ;;  %v135_v59 = vld [vmem:[%s10887_s0 + $0x3c8] sm:$0xff] }
  0xe2   :  { %v2394_v2 = vmax.f32 %v1120_v61, 0.0  ;;  %v136_v61 = vld [vmem:[%s10887_s0 + $0x3d0] sm:$0xff] }
  0xe3   :  { %v7295_v3 = vpop.f32.mrb[2].mxu0  ;;  %v2393_v4 = vmax.f32 %v1115_v63, 0.0 }
  0xe4   :  { %v1130_v5 = vadd.f32 %v7295_v3, %v9140_v57  ;;  %v1124_v6 = vpop.f32.mrb[3].mxu0  ;;  %7453 = vmatmul.mubr.msk.f32.gmra.mrb[108].mxu0 %vm279_vm0, %v123_v0 }
  0xe5   :  { %v1125_v7 = vadd.f32 %v9140_v57, %v1124_v6  ;;  %7455 = vmatprep.mubr.msk.f32.mxu0 %vm279_vm0, %v124_v1  ;;  %v9166_v9 = vpack.c.bf16 %v2394_v2, %v2393_v4  ;;  %v137_v4 = vld [vmem:[%s10887_s0 + $0x3d8] sm:$0xff]  ;;  %v138_v6 = vld [vmem:[%s10887_s0 + $0x3e0] sm:$0xff] }
  0xe6   :  { %v2396_v10 = vmax.f32 %v1130_v5, 0.0 }
  0xe7   :  { %v2395_v12 = vmax.f32 %v1125_v7, 0.0  ;;  %v7298_v13 = vpop.f32.mrb[4].mxu0 }
  0xe8   :  { %v1140_v14 = vadd.f32 %v7298_v13, %v9140_v57  ;;  %v1134_v15 = vpop.f32.mrb[5].mxu0  ;;  %7456 = vmatmul.mubr.msk.f32.gmra.mrb[110].mxu0 %vm279_vm0, %v125_v8 }
  0xe9   :  { %v9173_v16 = vpack.c.bf16 %v2396_v10, %v2395_v12  ;;  %v1135_v17 = vadd.f32 %v9140_v57, %v1134_v15  ;;  %7458 = vmatprep.mubr.msk.f32.mxu0 %vm279_vm0, %v126_v11 }
  0xea   :  { %v2398_v19 = vmax.f32 %v1140_v14, 0.0  ;;  %v139_v14 = vld [vmem:[%s10887_s0 + $0x3e8] sm:$0xff] }
  0xeb   :  { %v2397_v21 = vmax.f32 %v1135_v17, 0.0  ;;  %v7301_v22 = vpop.f32.mrb[6].mxu0  ;;  %v140_v17 = vld [vmem:[%s10887_s0 + $0x3f0] sm:$0xff] }
  0xec   :  { %v1150_v23 = vadd.f32 %v7301_v22, %v9140_v57  ;;  %v1144_v24 = vpop.f32.mrb[7].mxu0  ;;  %7459 = vmatmul.mubr.msk.f32.gmra.mrb[112].mxu0 %vm279_vm0, %v127_v18 }
  0xed   :  { %v9185_v25 = vpack.c.bf16 %v2398_v19, %v2397_v21  ;;  %v1145_v26 = vadd.f32 %v9140_v57, %v1144_v24  ;;  %7461 = vmatprep.mubr.msk.f32.mxu0 %vm279_vm0, %v128_v20  ;;  %v141_v24 = vld [vmem:[%s10887_s0 + $0x3f8] sm:$0xff] }
  0xee   :  { %v2400_v28 = vmax.f32 %v1150_v23, 0.0 }
  0xef   :  { %v2399_v30 = vmax.f32 %v1145_v26, 0.0  ;;  %v7304_v31 = vpop.f32.mrb[8].mxu0 }
  0xf0   :  { %v1160_v32 = vadd.f32 %v7304_v31, %v9140_v57  ;;  %v1154_v33 = vpop.f32.mrb[9].mxu0  ;;  %7462 = vmatmul.mubr.msk.f32.gmra.mrb[114].mxu0 %vm279_vm0, %v129_v27  ;;  %v142_v27 = vld [vmem:[%s10887_s0 + $0x400] sm:$0xff] }
  0xf1   :  { %v9197_v34 = vpack.c.bf16 %v2400_v28, %v2399_v30  ;;  %v1155_v35 = vadd.f32 %v9140_v57, %v1154_v33  ;;  %7464 = vmatprep.mubr.msk.f32.mxu0 %vm279_vm0, %v130_v29 }
  0xf2   :  { %v2402_v37 = vmax.f32 %v1160_v32, 0.0 }
  0xf3   :  { %v2401_v40 = vmax.f32 %v1155_v35, 0.0  ;;  %v7307_v41 = vpop.f32.mrb[10].mxu0  ;;  %v143_v35 = vld [vmem:[%s10887_s0 + $0x408] sm:$0xff] }
  0xf4   :  { %v1170_v44 = vadd.f32 %v7307_v41, %v9140_v57  ;;  %v1164_v45 = vpop.f32.mrb[11].mxu0  ;;  %7465 = vmatmul.mubr.msk.f32.gmra.mrb[116].mxu0 %vm279_vm0, %v131_v36 }
  0xf5   :  { %v9209_v47 = vpack.c.bf16 %v2402_v37, %v2401_v40  ;;  %v1165_v48 = vadd.f32 %v9140_v57, %v1164_v45  ;;  %7467 = vmatprep.mubr.msk.f32.mxu0 %vm279_vm0, %v132_v39  ;;  %v144_v37 = vld [vmem:[%s10887_s0 + $0x410] sm:$0xff] }
  0xf6   :  { %v2404_v50 = vmax.f32 %v1170_v44, 0.0 }
  0xf7   :  { %v2403_v52 = vmax.f32 %v1165_v48, 0.0  ;;  %v7310_v53 = vpop.f32.mrb[12].mxu0  ;;  %v145_v48 = vld [vmem:[%s10887_s0 + $0x418] sm:$0xff] }
  0xf8   :  { %v1180_v54 = vadd.f32 %v7310_v53, %v9140_v57  ;;  %v1174_v55 = vpop.f32.mrb[13].mxu0  ;;  %7468 = vmatmul.mubr.msk.f32.gmra.mrb[118].mxu0 %vm279_vm0, %v133_v49 }
  0xf9   :  { %v9221_v56 = vpack.c.bf16 %v2404_v50, %v2403_v52  ;;  %v1175_v58 = vadd.f32 %v9140_v57, %v1174_v55  ;;  %7470 = vmatprep.mubr.msk.f32.mxu0 %vm279_vm0, %v134_v51  ;;  %v146_v50 = vld [vmem:[%s10887_s0 + $0x420] sm:$0xff] }
  0xfa   :  { %v2406_v60 = vmax.f32 %v1180_v54, 0.0 }
  0xfb   :  { %v2405_v62 = vmax.f32 %v1175_v58, 0.0  ;;  %v7313_v63 = vpop.f32.mrb[14].mxu0  ;;  %v147_v58 = vld [vmem:[%s10887_s0 + $0x428] sm:$0xff] }
  0xfc   :  { %v1190_v0 = vadd.f32 %v7313_v63, %v9140_v57  ;;  %v1184_v1 = vpop.f32.mrb[15].mxu0  ;;  %7471 = vmatmul.mubr.msk.f32.gmra.mrb[120].mxu0 %vm279_vm0, %v135_v59 }
  0xfd   :  { %v9233_v2 = vpack.c.bf16 %v2406_v60, %v2405_v62  ;;  %v1185_v3 = vadd.f32 %v9140_v57, %v1184_v1  ;;  %7473 = vmatprep.mubr.msk.f32.mxu0 %vm279_vm0, %v136_v61  ;;  %v148_v60 = vld [vmem:[%s10887_s0 + $0x430] sm:$0xff] }
  0xfe   :  { %v2408_v5 = vmax.f32 %v1190_v0, 0.0 }
  0xff   :  { %v2407_v7 = vmax.f32 %v1185_v3, 0.0  ;;  %v7316_v8 = vpop.f32.mrb[16].mxu0  ;;  %v149_v3 = vld [vmem:[%s10887_s0 + $0x438] sm:$0xff] }
 0x100   :  { %v1200_v10 = vadd.f32 %v7316_v8, %v9140_v57  ;;  %v1194_v11 = vpop.f32.mrb[17].mxu0  ;;  %7474 = vmatmul.mubr.msk.f32.gmra.mrb[122].mxu0 %vm279_vm0, %v137_v4 }
 0x101   :  { %v9245_v12 = vpack.c.bf16 %v2408_v5, %v2407_v7  ;;  %v1195_v13 = vadd.f32 %v9140_v57, %v1194_v11  ;;  %7476 = vmatprep.mubr.msk.f32.mxu0 %vm279_vm0, %v138_v6  ;;  %v150_v5 = vld [vmem:[%s10887_s0 + $0x440] sm:$0xff] }
 0x102   :  { %v2410_v15 = vmax.f32 %v1200_v10, 0.0 }
 0x103   :  { %v2409_v18 = vmax.f32 %v1195_v13, 0.0  ;;  %v7319_v19 = vpop.f32.mrb[18].mxu0  ;;  %v151_v13 = vld [vmem:[%s10887_s0 + $0x448] sm:$0xff] }
 0x104   :  { %v1210_v20 = vadd.f32 %v7319_v19, %v9140_v57  ;;  %v1204_v21 = vpop.f32.mrb[19].mxu0  ;;  %7477 = vmatmul.mubr.msk.f32.gmra.mrb[124].mxu0 %vm279_vm0, %v139_v14 }
 0x105   :  { %v1205_v22 = vadd.f32 %v9140_v57, %v1204_v21  ;;  %7479 = vmatprep.mubr.msk.f32.mxu0 %vm279_vm0, %v140_v17  ;;  %v8067_v23 = vpack.c.bf16 %v2410_v15, %v2409_v18  ;;  %v152_v15 = vld [vmem:[%s10887_s0 + $0x450] sm:$0xff] }
 0x106   :  { %v2412_v26 = vmax.f32 %v1210_v20, 0.0 }
 0x107   :  { %v2411_v28 = vmax.f32 %v1205_v22, 0.0  ;;  %v7322_v29 = vpop.f32.mrb[20].mxu0  ;;  %8068 = vmatprep.subr.bf16.mxu1 %v8067_v23  ;;  %v153_v22 = vld [vmem:[%s10887_s0 + $0x458] sm:$0xff] }
 0x108   :  { %v1220_v30 = vadd.f32 %v7322_v29, %v9140_v57  ;;  %v1214_v31 = vpop.f32.mrb[21].mxu0  ;;  %7480 = vmatmul.mubr.msk.f32.gmra.mrb[126].mxu0 %vm279_vm0, %v141_v24  ;;  %8070 = vmatpush3.bf16.msra.mxu1 %v9166_v9  ;;  %v154_v24 = vld [vmem:[%s10887_s0 + $0x460] sm:$0xff] }
 0x109   :  { %v8071_v32 = vpack.c.bf16 %v2412_v26, %v2411_v28  ;;  %v1215_v33 = vadd.f32 %v9140_v57, %v1214_v31  ;;  %7482 = vmatprep.mubr.msk.f32.mxu0 %vm279_vm0, %v142_v27  ;;  %v2653_v26 = vadd.s32 384, %v9075_v38 }
 0x10a   :  { %v2414_v36 = vmax.f32 %v1220_v30, 0.0 }
 0x10b   :  { %v2413_v39 = vmax.f32 %v1215_v33, 0.0  ;;  %v7325_v40 = vpop.f32.mrb[22].mxu0  ;;  %8072 = vmatprep.subr.bf16.mxu1 %v8071_v32  ;;  %v155_v32 = vld [vmem:[%s10887_s0 + $0x468] sm:$0xff]  ;;  %vm2672_vm6 = vcmp.ge.s32.totalorder %v2653_v26, %v9081_v42  ;;  %vm2690_vm7 = vcmp.lt.s32.totalorder %v2653_v26, %v9083_v43 }
 0x10c   :  { %v1230_v41 = vadd.f32 %v7325_v40, %v9140_v57  ;;  %v1224_v9 = vpop.f32.mrb[23].mxu0  ;;  %7483 = vmatmul.mubr.msk.f32.gmra.mrb[128].mxu0 %vm279_vm0, %v143_v35  ;;  %8074 = vmatpush3.bf16.msra.mxu1 %v9173_v16  ;;  %vm2706_vm9 = vmand %vm2672_vm6, %vm2690_vm7 }
 0x10d   :  { %v8075_v44 = vpack.c.bf16 %v2414_v36, %v2413_v39  ;;  %v1225_v45 = vadd.f32 %v9140_v57, %v1224_v9  ;;  %7485 = vmatprep.mubr.msk.f32.mxu0 %vm279_vm0, %v144_v37  ;;  %v157_v9 = vld [vmem:[%s10887_s0 + $0x478] sm:$0xff] }
 0x10e   :  { %v2416_v49 = vmax.f32 %v1230_v41, 0.0 }
 0x10f   :  { %v2415_v51 = vmax.f32 %v1225_v45, 0.0  ;;  %v7328_v52 = vpop.f32.mrb[24].mxu0  ;;  %8076 = vmatprep.subr.bf16.mxu1 %v8075_v44  ;;  %v158_v45 = vld [vmem:[%s10887_s0 + $0x480] sm:$0xff] }
 0x110   :  { %v1240_v53 = vadd.f32 %v7328_v52, %v9140_v57  ;;  %v1234_v16 = vpop.f32.mrb[25].mxu0  ;;  %7486 = vmatmul.mubr.msk.f32.gmra.mrb[130].mxu0 %vm279_vm0, %v145_v48  ;;  %8078 = vmatpush3.bf16.msra.mxu1 %v9185_v25 }
 0x111   :  { %v8079_v54 = vpack.c.bf16 %v2416_v49, %v2415_v51  ;;  %v1235_v55 = vadd.f32 %v9140_v57, %v1234_v16  ;;  %7488 = vmatprep.mubr.msk.f32.mxu0 %vm279_vm0, %v146_v50 }
 0x112   :  { %v2418_v59 = vmax.f32 %v1240_v53, 0.0  ;;  %v159_v53 = vld [vmem:[%s10887_s0 + $0x488] sm:$0xff] }
 0x113   :  { %v2417_v61 = vmax.f32 %v1235_v55, 0.0  ;;  %v7331_v62 = vpop.f32.mrb[26].mxu0  ;;  %8080 = vmatprep.subr.bf16.mxu1 %v8079_v54  ;;  %v160_v54 = vld [vmem:[%s10887_s0 + $0x490] sm:$0xff] }
 0x114   :  { %v1250_v63 = vadd.f32 %v7331_v62, %v9140_v57  ;;  %v1244_v25 = vpop.f32.mrb[27].mxu0  ;;  %7489 = vmatmul.mubr.msk.f32.gmra.mrb[132].mxu0 %vm279_vm0, %v147_v58  ;;  %8082 = vmatpush3.bf16.msra.mxu1 %v9197_v34 }
 0x115   :  { %v8083_v0 = vpack.c.bf16 %v2418_v59, %v2417_v61  ;;  %v1245_v1 = vadd.f32 %v9140_v57, %v1244_v25  ;;  %7491 = vmatprep.mubr.msk.f32.mxu0 %vm279_vm0, %v148_v60 }
 0x116   :  { %v2420_v4 = vmax.f32 %v1250_v63, 0.0  ;;  %v161_v63 = vld [vmem:[%s10887_s0 + $0x498] sm:$0xff] }
 0x117   :  { %v2419_v6 = vmax.f32 %v1245_v1, 0.0  ;;  %v7334_v7 = vpop.f32.mrb[28].mxu0  ;;  %8084 = vmatprep.subr.bf16.mxu1 %v8083_v0  ;;  %v162_v0 = vld [vmem:[%s10887_s0 + $0x4a0] sm:$0xff] }
 0x118   :  { %v1260_v8 = vadd.f32 %v7334_v7, %v9140_v57  ;;  %v1254_v34 = vpop.f32.mrb[29].mxu0  ;;  %7492 = vmatmul.mubr.msk.f32.gmra.mrb[134].mxu0 %vm279_vm0, %v149_v3  ;;  %8086 = vmatpush3.bf16.msra.mxu1 %v9209_v47 }
 0x119   :  { %v8087_v10 = vpack.c.bf16 %v2420_v4, %v2419_v6  ;;  %v1255_v11 = vadd.f32 %v9140_v57, %v1254_v34  ;;  %7494 = vmatprep.mubr.msk.f32.mxu0 %vm279_vm0, %v150_v5 }
 0x11a   :  { %v2422_v14 = vmax.f32 %v1260_v8, 0.0  ;;  %v163_v8 = vld [vmem:[%s10887_s0 + $0x4a8] sm:$0xff] }
 0x11b   :  { %v2421_v17 = vmax.f32 %v1255_v11, 0.0  ;;  %v7337_v18 = vpop.f32.mrb[30].mxu0  ;;  %8088 = vmatprep.subr.bf16.mxu1 %v8087_v10  ;;  %v164_v10 = vld [vmem:[%s10887_s0 + $0x4b0] sm:$0xff] }
 0x11c   :  { %v1270_v19 = vadd.f32 %v7337_v18, %v9140_v57  ;;  %v1264_v47 = vpop.f32.mrb[31].mxu0  ;;  %7495 = vmatmul.mubr.msk.f32.gmra.mrb[136].mxu0 %vm279_vm0, %v151_v13  ;;  %8090 = vmatpush3.bf16.msra.mxu1 %v9221_v56 }
 0x11d   :  { %v8091_v20 = vpack.c.bf16 %v2422_v14, %v2421_v17  ;;  %v1265_v21 = vadd.f32 %v9140_v57, %v1264_v47  ;;  %7497 = vmatprep.mubr.msk.f32.mxu0 %vm279_vm0, %v152_v15 }
 0x11e   :  { %v2424_v23 = vmax.f32 %v1270_v19, 0.0  ;;  %v165_v19 = vld [vmem:[%s10887_s0 + $0x4b8] sm:$0xff] }
 0x11f   :  { %v2423_v27 = vmax.f32 %v1265_v21, 0.0  ;;  %v7340_v28 = vpop.f32.mrb[32].mxu0  ;;  %8092 = vmatprep.subr.bf16.mxu1 %v8091_v20  ;;  %v166_v20 = vld [vmem:[%s10887_s0 + $0x4c0] sm:$0xff] }
 0x120   :  { %v1280_v56 = vadd.f32 %v7340_v28, %v9140_v57  ;;  %v1274_v29 = vpop.f32.mrb[33].mxu0  ;;  %7498 = vmatmul.mubr.msk.f32.gmra.mrb[138].mxu0 %vm279_vm0, %v153_v22  ;;  %8094 = vmatpush3.bf16.msra.mxu1 %v9233_v2  ;;  %v156_v2 = vld [vmem:[%s10887_s0 + $0x470] sm:$0xff]  ;;  %v167_v28 = vld [vmem:[%s10887_s0 + $0x4c8] sm:$0xff] }
 0x121   :  { %v8095_v30 = vpack.c.bf16 %v2424_v23, %v2423_v27  ;;  %v1275_v31 = vadd.f32 %v9140_v57, %v1274_v29  ;;  %7500 = vmatprep.mubr.msk.f32.mxu0 %vm279_vm0, %v154_v24  ;;  %v168_v29 = vld [vmem:[%s10887_s0 + $0x4d0] sm:$0xff] }
 0x122   :  { %v2426_v33 = vmax.f32 %v1280_v56, 0.0 }
 0x123   :  { %v2425_v35 = vmax.f32 %v1275_v31, 0.0  ;;  %v7343_v36 = vpop.f32.mrb[34].mxu0  ;;  %8096 = vmatprep.subr.bf16.mxu1 %v8095_v30 }
 0x124   :  { %v1290_v37 = vadd.f32 %v7343_v36, %v9140_v57  ;;  %v1284_v39 = vpop.f32.mrb[35].mxu0  ;;  %7501 = vmatmul.mubr.msk.f32.gmra.mrb[140].mxu0 %vm279_vm0, %v155_v32  ;;  %8098 = vmatpush3.bf16.msra.mxu1 %v9245_v12  ;;  %v169_v36 = vld [vmem:[%s10887_s0 + $0x4d8] sm:$0xff] }
 0x125   :  { %v9352_v40 = vpack.c.bf16 %v2426_v33, %v2425_v35  ;;  %v1285_v41 = vadd.f32 %v9140_v57, %v1284_v39  ;;  %7503 = vmatprep.mubr.msk.f32.mxu0 %vm279_vm0, %v156_v2  ;;  %v170_v39 = vld [vmem:[%s10887_s0 + $0x4e0] sm:$0xff] }
 0x126   :  { %v2428_v44 = vmax.f32 %v1290_v37, 0.0 }
 0x127   :  { %v2427_v48 = vmax.f32 %v1285_v41, 0.0  ;;  %v7346_v49 = vpop.f32.mrb[36].mxu0  ;;  %6488 = vmatmul.mubr.msk.f32.vlgmr.msra.gmra.mrb[0].mxu1 %vm2703_vm8, %v8659_v46 }
 0x128   :  { %v1300_v12 = vadd.f32 %v7346_v49, %v9140_v57  ;;  %v1294_v50 = vpop.f32.mrb[37].mxu0  ;;  %7504 = vmatmul.mubr.msk.f32.gmra.mrb[142].mxu0 %vm279_vm0, %v157_v9  ;;  %6489 = vmatprep.mubr.msk.f32.mxu1 %vm2706_vm9, %v8659_v46 }
 0x129   :  { %v9366_v51 = vpack.c.bf16 %v2428_v44, %v2427_v48  ;;  %v1295_v52 = vadd.f32 %v9140_v57, %v1294_v50  ;;  %7506 = vmatprep.mubr.msk.f32.mxu0 %vm279_vm0, %v158_v45 }
 0x12a   :  { %v2430_v16 = vmax.f32 %v1300_v12, 0.0  ;;  %v171_v12 = vld [vmem:[%s10887_s0 + $0x4e8] sm:$0xff] }
 0x12b   :  { %v2429_v55 = vmax.f32 %v1295_v52, 0.0  ;;  %v7349_v58 = vpop.f32.mrb[38].mxu0  ;;  %v172_v52 = vld [vmem:[%s10887_s0 + $0x4f0] sm:$0xff] }
 0x12c   :  { %v1310_v59 = vadd.f32 %v7349_v58, %v9140_v57  ;;  %v1304_v60 = vpop.f32.mrb[39].mxu0  ;;  %7507 = vmatmul.mubr.msk.f32.gmra.mrb[144].mxu0 %vm279_vm0, %v159_v53 }
 0x12d   :  { %v9378_v61 = vpack.c.bf16 %v2430_v16, %v2429_v55  ;;  %v1305_v62 = vadd.f32 %v9140_v57, %v1304_v60  ;;  %7509 = vmatprep.mubr.msk.f32.mxu0 %vm279_vm0, %v160_v54  ;;  %v173_v60 = vld [vmem:[%s10887_s0 + $0x4f8] sm:$0xff] }
 0x12e   :  { %v2432_v25 = vmax.f32 %v1310_v59, 0.0 }
 0x12f   :  { %v2431_v1 = vmax.f32 %v1305_v62, 0.0  ;;  %v7352_v3 = vpop.f32.mrb[40].mxu0 }
 0x130   :  { %v1320_v4 = vadd.f32 %v7352_v3, %v9140_v57  ;;  %v1314_v5 = vpop.f32.mrb[41].mxu0  ;;  %7510 = vmatmul.mubr.msk.f32.gmra.mrb[146].mxu0 %vm279_vm0, %v161_v63  ;;  %v174_v63 = vld [vmem:[%s10887_s0 + $0x500] sm:$0xff] }
 0x131   :  { %v9390_v6 = vpack.c.bf16 %v2432_v25, %v2431_v1  ;;  %v1315_v7 = vadd.f32 %v9140_v57, %v1314_v5  ;;  %7512 = vmatprep.mubr.msk.f32.mxu0 %vm279_vm0, %v162_v0 }
 0x132   :  { %v2434_v34 = vmax.f32 %v1320_v4, 0.0 }
 0x133   :  { %v2433_v11 = vmax.f32 %v1315_v7, 0.0  ;;  %v7355_v13 = vpop.f32.mrb[42].mxu0  ;;  %v175_v7 = vld [vmem:[%s10887_s0 + $0x508] sm:$0xff] }
 0x134   :  { %v1330_v14 = vadd.f32 %v7355_v13, %v9140_v57  ;;  %v1324_v15 = vpop.f32.mrb[43].mxu0  ;;  %7513 = vmatmul.mubr.msk.f32.gmra.mrb[148].mxu0 %vm279_vm0, %v163_v8 }
 0x135   :  { %v9402_v17 = vpack.c.bf16 %v2434_v34, %v2433_v11  ;;  %v1325_v18 = vadd.f32 %v9140_v57, %v1324_v15  ;;  %7515 = vmatprep.mubr.msk.f32.mxu0 %vm279_vm0, %v164_v10  ;;  %v176_v34 = vld [vmem:[%s10887_s0 + $0x510] sm:$0xff] }
 0x136   :  { %v2436_v47 = vmax.f32 %v1330_v14, 0.0 }
 0x137   :  { %v2435_v21 = vmax.f32 %v1325_v18, 0.0  ;;  %v7358_v22 = vpop.f32.mrb[44].mxu0  ;;  %v177_v18 = vld [vmem:[%s10887_s0 + $0x518] sm:$0xff] }
 0x138   :  { %v1340_v23 = vadd.f32 %v7358_v22, %v9140_v57  ;;  %v1334_v24 = vpop.f32.mrb[45].mxu0  ;;  %7516 = vmatmul.mubr.msk.f32.gmra.mrb[150].mxu0 %vm279_vm0, %v165_v19 }
 0x139   :  { %v9414_v26 = vpack.c.bf16 %v2436_v47, %v2435_v21  ;;  %v1335_v27 = vadd.f32 %v9140_v57, %v1334_v24  ;;  %7518 = vmatprep.mubr.msk.f32.mxu0 %vm279_vm0, %v166_v20  ;;  %v178_v47 = vld [vmem:[%s10887_s0 + $0x520] sm:$0xff] }
 0x13a   :  { %v2438_v56 = vmax.f32 %v1340_v23, 0.0 }
 0x13b   :  { %v2437_v30 = vmax.f32 %v1335_v27, 0.0  ;;  %v7361_v31 = vpop.f32.mrb[46].mxu0  ;;  %v179_v27 = vld [vmem:[%s10887_s0 + $0x528] sm:$0xff] }
 0x13c   :  { %v1350_v32 = vadd.f32 %v7361_v31, %v9140_v57  ;;  %v1344_v33 = vpop.f32.mrb[47].mxu0  ;;  %7519 = vmatmul.mubr.msk.f32.gmra.mrb[152].mxu0 %vm279_vm0, %v167_v28 }
 0x13d   :  { %v9426_v2 = vpack.c.bf16 %v2438_v56, %v2437_v30  ;;  %v1345_v35 = vadd.f32 %v9140_v57, %v1344_v33  ;;  %7521 = vmatprep.mubr.msk.f32.mxu0 %vm279_vm0, %v168_v29  ;;  %v180_v56 = vld [vmem:[%s10887_s0 + $0x530] sm:$0xff] }
 0x13e   :  { %v2440_v37 = vmax.f32 %v1350_v32, 0.0 }
 0x13f   :  { %v2439_v41 = vmax.f32 %v1345_v35, 0.0  ;;  %v7364_v9 = vpop.f32.mrb[48].mxu0  ;;  %v181_v35 = vld [vmem:[%s10887_s0 + $0x538] sm:$0xff] }
 0x140   :  { %v1360_v44 = vadd.f32 %v7364_v9, %v9140_v57  ;;  %v1354_v45 = vpop.f32.mrb[49].mxu0  ;;  %7522 = vmatmul.mubr.msk.f32.gmra.mrb[154].mxu0 %vm279_vm0, %v169_v36 }
 0x141   :  { %v9438_v48 = vpack.c.bf16 %v2440_v37, %v2439_v41  ;;  %v1355_v49 = vadd.f32 %v9140_v57, %v1354_v45  ;;  %7524 = vmatprep.mubr.msk.f32.mxu0 %vm279_vm0, %v170_v39  ;;  %v182_v37 = vld [vmem:[%s10887_s0 + $0x540] sm:$0xff] }
 0x142   :  { %v2442_v50 = vmax.f32 %v1360_v44, 0.0 }
 0x143   :  { %v2441_v53 = vmax.f32 %v1355_v49, 0.0  ;;  %v7367_v16 = vpop.f32.mrb[50].mxu0  ;;  %v183_v49 = vld [vmem:[%s10887_s0 + $0x548] sm:$0xff] }
 0x144   :  { %v1370_v54 = vadd.f32 %v7367_v16, %v9140_v57  ;;  %v1364_v55 = vpop.f32.mrb[51].mxu0  ;;  %7525 = vmatmul.mubr.msk.f32.gmra.mrb[156].mxu0 %vm279_vm0, %v171_v12 }
 0x145   :  { %v8099_v58 = vpack.c.bf16 %v2442_v50, %v2441_v53  ;;  %v1365_v59 = vadd.f32 %v9140_v57, %v1364_v55  ;;  %7527 = vmatprep.mubr.msk.f32.mxu0 %vm279_vm0, %v172_v52  ;;  %v184_v50 = vld [vmem:[%s10887_s0 + $0x550] sm:$0xff] }
 0x146   :  { %v2444_v62 = vmax.f32 %v1370_v54, 0.0 }
 0x147   :  { %v2443_v25 = vmax.f32 %v1365_v59, 0.0  ;;  %v7370_v0 = vpop.f32.mrb[52].mxu0  ;;  %8100 = vmatprep.subr.bf16.mxu1 %v8099_v58  ;;  %v185_v58 = vld [vmem:[%s10887_s0 + $0x558] sm:$0xff]  ;;  %v2652_v59 = vadd.s32 256, %v9075_v38 }
 0x148   :  { %v1380_v1 = vadd.f32 %v7370_v0, %v9140_v57  ;;  %v1374_v3 = vpop.f32.mrb[53].mxu0  ;;  %7528 = vmatmul.mubr.msk.f32.gmra.mrb[158].mxu0 %vm279_vm0, %v173_v60  ;;  %8102 = vmatpush3.bf16.msra.mxu1 %v9352_v40 }
 0x149   :  { %v8103_v4 = vpack.c.bf16 %v2444_v62, %v2443_v25  ;;  %v1375_v5 = vadd.f32 %v9140_v57, %v1374_v3  ;;  %7530 = vmatprep.mubr.msk.f32.mxu0 %vm279_vm0, %v174_v63  ;;  %v186_v62 = vld [vmem:[%s10887_s0 + $0x560] sm:$0xff]  ;;  %v2655_v63 = vadd.s32 640, %v9075_v38  ;;  %vm2671_vm10 = vcmp.ge.s32.totalorder %v2652_v59, %v9081_v42 }
 0x14a   :  { %v2446_v8 = vmax.f32 %v1380_v1, 0.0  ;;  %vm2689_vm11 = vcmp.lt.s32.totalorder %v2652_v59, %v9083_v43 }
 0x14b   :  { %v2445_v10 = vmax.f32 %v1375_v5, 0.0  ;;  %v7373_v11 = vpop.f32.mrb[54].mxu0  ;;  %8104 = vmatprep.subr.bf16.mxu1 %v8103_v4  ;;  %v187_v5 = vld [vmem:[%s10887_s0 + $0x568] sm:$0xff]  ;;  %vm2674_vm12 = vcmp.ge.s32.totalorder %v2655_v63, %v9081_v42  ;;  %vm2692_vm13 = vcmp.lt.s32.totalorder %v2655_v63, %v9083_v43  ;;  %vm2705_vm14 = vmand %vm2671_vm10, %vm2689_vm11 }
 0x14c   :  { %v1390_v13 = vadd.f32 %v7373_v11, %v9140_v57  ;;  %v1384_v40 = vpop.f32.mrb[55].mxu0  ;;  %7531 = vmatmul.mubr.msk.f32.gmra.mrb[160].mxu0 %vm279_vm0, %v175_v7  ;;  %8106 = vmatpush3.bf16.msra.mxu1 %v9366_v51  ;;  %vm2708_vm15 = vmand %vm2674_vm12, %vm2692_vm13 }
 0x14d   :  { %v8107_v14 = vpack.c.bf16 %v2446_v8, %v2445_v10  ;;  %v1385_v15 = vadd.f32 %v9140_v57, %v1384_v40  ;;  %7533 = vmatprep.mubr.msk.f32.mxu0 %vm279_vm0, %v176_v34  ;;  %v188_v8 = vld [vmem:[%s10887_s0 + $0x570] sm:$0xff] }
 0x14e   :  { %v2448_v19 = vmax.f32 %v1390_v13, 0.0 }
 0x14f   :  { %v2447_v20 = vmax.f32 %v1385_v15, 0.0  ;;  %v7376_v21 = vpop.f32.mrb[56].mxu0  ;;  %8108 = vmatprep.subr.bf16.mxu1 %v8107_v14  ;;  %v189_v14 = vld [vmem:[%s10887_s0 + $0x578] sm:$0xff] }
 0x150   :  { %v1400_v22 = vadd.f32 %v7376_v21, %v9140_v57  ;;  %v1394_v51 = vpop.f32.mrb[57].mxu0  ;;  %7534 = vmatmul.mubr.msk.f32.gmra.mrb[162].mxu0 %vm279_vm0, %v177_v18  ;;  %8110 = vmatpush3.bf16.msra.mxu1 %v9378_v61  ;;  %v190_v18 = vld [vmem:[%s10887_s0 + $0x580] sm:$0xff] }
 0x151   :  { %v8111_v23 = vpack.c.bf16 %v2448_v19, %v2447_v20  ;;  %v1395_v24 = vadd.f32 %v9140_v57, %v1394_v51  ;;  %7536 = vmatprep.mubr.msk.f32.mxu0 %vm279_vm0, %v178_v47  ;;  %v191_v51 = vld [vmem:[%s10887_s0 + $0x588] sm:$0xff] }
 0x152   :  { %v2450_v28 = vmax.f32 %v1400_v22, 0.0 }
 0x153   :  { %v2449_v29 = vmax.f32 %v1395_v24, 0.0  ;;  %v7379_v30 = vpop.f32.mrb[58].mxu0  ;;  %8112 = vmatprep.subr.bf16.mxu1 %v8111_v23  ;;  %v192_v24 = vld [vmem:[%s10887_s0 + $0x590] sm:$0xff] }
 0x154   :  { %v1410_v31 = vadd.f32 %v7379_v30, %v9140_v57  ;;  %v1404_v61 = vpop.f32.mrb[59].mxu0  ;;  %7537 = vmatmul.mubr.msk.f32.gmra.mrb[164].mxu0 %vm279_vm0, %v179_v27  ;;  %8114 = vmatpush3.bf16.msra.mxu1 %v9390_v6 }
 0x155   :  { %v8115_v32 = vpack.c.bf16 %v2450_v28, %v2449_v29  ;;  %v1405_v33 = vadd.f32 %v9140_v57, %v1404_v61  ;;  %7539 = vmatprep.mubr.msk.f32.mxu0 %vm279_vm0, %v180_v56  ;;  %v193_v61 = vld [vmem:[%s10887_s0 + $0x598] sm:$0xff] }
 0x156   :  { %v2452_v36 = vmax.f32 %v1410_v31, 0.0 }
 0x157   :  { %v2451_v39 = vmax.f32 %v1405_v33, 0.0  ;;  %v7382_v41 = vpop.f32.mrb[60].mxu0  ;;  %8116 = vmatprep.subr.bf16.mxu1 %v8115_v32  ;;  %v194_v33 = vld [vmem:[%s10887_s0 + $0x5a0] sm:$0xff] }
 0x158   :  { %v1420_v9 = vadd.f32 %v7382_v41, %v9140_v57  ;;  %v1414_v6 = vpop.f32.mrb[61].mxu0  ;;  %7540 = vmatmul.mubr.msk.f32.gmra.mrb[166].mxu0 %vm279_vm0, %v181_v35  ;;  %8118 = vmatpush3.bf16.msra.mxu1 %v9402_v17 }
 0x159   :  { %v8119_v44 = vpack.c.bf16 %v2452_v36, %v2451_v39  ;;  %v1415_v45 = vadd.f32 %v9140_v57, %v1414_v6  ;;  %7542 = vmatprep.mubr.msk.f32.mxu0 %vm279_vm0, %v182_v37  ;;  %v195_v6 = vld [vmem:[%s10887_s0 + $0x5a8] sm:$0xff] }
 0x15a   :  { %v2454_v12 = vmax.f32 %v1420_v9, 0.0 }
 0x15b   :  { %v2453_v52 = vmax.f32 %v1415_v45, 0.0  ;;  %v7385_v53 = vpop.f32.mrb[62].mxu0  ;;  %8120 = vmatprep.subr.bf16.mxu1 %v8119_v44  ;;  %v196_v45 = vld [vmem:[%s10887_s0 + $0x5b0] sm:$0xff] }
 0x15c   :  { %v1430_v16 = vadd.f32 %v7385_v53, %v9140_v57  ;;  %v1424_v17 = vpop.f32.mrb[63].mxu0  ;;  %7543 = vmatmul.mubr.msk.f32.gmra.mrb[168].mxu0 %vm279_vm0, %v183_v49  ;;  %8122 = vmatpush3.bf16.msra.mxu1 %v9414_v26 }
 0x15d   :  { %v8123_v54 = vpack.c.bf16 %v2454_v12, %v2453_v52  ;;  %v1425_v55 = vadd.f32 %v9140_v57, %v1424_v17  ;;  %7545 = vmatprep.mubr.msk.f32.mxu0 %vm279_vm0, %v184_v50  ;;  %v197_v17 = vld [vmem:[%s10887_s0 + $0x5b8] sm:$0xff] }
 0x15e   :  { %v2456_v60 = vmax.f32 %v1430_v16, 0.0 }
 0x15f   :  { %v2455_v25 = vmax.f32 %v1425_v55, 0.0  ;;  %v7388_v26 = vpop.f32.mrb[64].mxu0  ;;  %8124 = vmatprep.subr.bf16.mxu1 %v8123_v54  ;;  %v198_v55 = vld [vmem:[%s10887_s0 + $0x5c0] sm:$0xff] }
 0x160   :  { %v1440_v0 = vadd.f32 %v7388_v26, %v9140_v57  ;;  %v1434_v1 = vpop.f32.mrb[65].mxu0  ;;  %7546 = vmatmul.mubr.msk.f32.gmra.mrb[170].mxu0 %vm279_vm0, %v185_v58  ;;  %8126 = vmatpush3.bf16.msra.mxu1 %v9426_v2  ;;  %v199_v26 = vld [vmem:[%s10887_s0 + $0x5c8] sm:$0xff] }
 0x161   :  { %v8127_v3 = vpack.c.bf16 %v2456_v60, %v2455_v25  ;;  %v1435_v4 = vadd.f32 %v9140_v57, %v1434_v1  ;;  %7548 = vmatprep.mubr.msk.f32.mxu0 %vm279_vm0, %v186_v62  ;;  %v200_v1 = vld [vmem:[%s10887_s0 + $0x5d0] sm:$0xff] }
 0x162   :  { %v2458_v7 = vmax.f32 %v1440_v0, 0.0 }
 0x163   :  { %v2457_v2 = vmax.f32 %v1435_v4, 0.0  ;;  %v7391_v34 = vpop.f32.mrb[66].mxu0  ;;  %8128 = vmatprep.subr.bf16.mxu1 %v8127_v3 }
 0x164   :  { %v1450_v10 = vadd.f32 %v7391_v34, %v9140_v57  ;;  %v1444_v11 = vpop.f32.mrb[67].mxu0  ;;  %7549 = vmatmul.mubr.msk.f32.gmra.mrb[172].mxu0 %vm279_vm0, %v187_v5  ;;  %8130 = vmatpush3.bf16.msra.mxu1 %v9438_v48  ;;  %v201_v34 = vld [vmem:[%s10887_s0 + $0x5d8] sm:$0xff] }
 0x165   :  { %v9544_v13 = vpack.c.bf16 %v2458_v7, %v2457_v2  ;;  %v1445_v40 = vadd.f32 %v9140_v57, %v1444_v11  ;;  %7551 = vmatprep.mubr.msk.f32.mxu0 %vm279_vm0, %v188_v8  ;;  %v202_v11 = vld [vmem:[%s10887_s0 + $0x5e0] sm:$0xff] }
 0x166   :  { %v2460_v15 = vmax.f32 %v1450_v10, 0.0 }
 0x167   :  { %v2459_v19 = vmax.f32 %v1445_v40, 0.0  ;;  %v7394_v47 = vpop.f32.mrb[68].mxu0  ;;  %6490 = vmatmul.mubr.msk.f32.vlgmr.msra.gmra.mrb[2].mxu1 %vm2705_vm14, %v8659_v46 }
 0x168   :  { %v1460_v48 = vadd.f32 %v7394_v47, %v9140_v57  ;;  %v1454_v20 = vpop.f32.mrb[69].mxu0  ;;  %7552 = vmatmul.mubr.msk.f32.gmra.mrb[174].mxu0 %vm279_vm0, %v189_v14  ;;  %6491 = vmatprep.mubr.msk.f32.mxu1 %vm2708_vm15, %v8659_v46 }
 0x169   :  { %v9558_v21 = vpack.c.bf16 %v2460_v15, %v2459_v19  ;;  %v1455_v22 = vadd.f32 %v9140_v57, %v1454_v20  ;;  %7554 = vmatprep.mubr.msk.f32.mxu0 %vm279_vm0, %v190_v18 }
 0x16a   :  { %v2462_v23 = vmax.f32 %v1460_v48, 0.0  ;;  %v203_v48 = vld [vmem:[%s10887_s0 + $0x5e8] sm:$0xff] }
 0x16b   :  { %v2461_v27 = vmax.f32 %v1455_v22, 0.0  ;;  %v7397_v28 = vpop.f32.mrb[70].mxu0  ;;  %v204_v22 = vld [vmem:[%s10887_s0 + $0x5f0] sm:$0xff] }
 0x16c   :  { %v1470_v56 = vadd.f32 %v7397_v28, %v9140_v57  ;;  %v1464_v29 = vpop.f32.mrb[71].mxu0  ;;  %7555 = vmatmul.mubr.msk.f32.gmra.mrb[176].mxu0 %vm279_vm0, %v191_v51 }
 0x16d   :  { %v9570_v30 = vpack.c.bf16 %v2462_v23, %v2461_v27  ;;  %v1465_v31 = vadd.f32 %v9140_v57, %v1464_v29  ;;  %7557 = vmatprep.mubr.msk.f32.mxu0 %vm279_vm0, %v192_v24  ;;  %v205_v29 = vld [vmem:[%s10887_s0 + $0x5f8] sm:$0xff] }
 0x16e   :  { %v2464_v32 = vmax.f32 %v1470_v56, 0.0 }
 0x16f   :  { %v2463_v35 = vmax.f32 %v1465_v31, 0.0  ;;  %v7400_v36 = vpop.f32.mrb[72].mxu0 }
 0x170   :  { %v1480_v37 = vadd.f32 %v7400_v36, %v9140_v57  ;;  %v1474_v39 = vpop.f32.mrb[73].mxu0  ;;  %7558 = vmatmul.mubr.msk.f32.gmra.mrb[178].mxu0 %vm279_vm0, %v193_v61  ;;  %v206_v61 = vld [vmem:[%s10887_s0 + $0x600] sm:$0xff] }
 0x171   :  { %v9582_v41 = vpack.c.bf16 %v2464_v32, %v2463_v35  ;;  %v1475_v9 = vadd.f32 %v9140_v57, %v1474_v39  ;;  %7560 = vmatprep.mubr.msk.f32.mxu0 %vm279_vm0, %v194_v33  ;;  %v9653_v35 = vld [vmem:[%s10886_s2 + $0x20] ss:$0 sm:$0xff] }
 0x172   :  { %v2466_v44 = vmax.f32 %v1480_v37, 0.0 }
 0x173   :  { %v2465_v49 = vmax.f32 %v1475_v9, 0.0  ;;  %v7403_v12 = vpop.f32.mrb[74].mxu0  ;;  %v207_v9 = vld [vmem:[%s10887_s0 + $0x608] sm:$0xff] }
 0x174   :  { %v1490_v50 = vadd.f32 %v7403_v12, %v9140_v57  ;;  %v1484_v52 = vpop.f32.mrb[75].mxu0  ;;  %7561 = vmatmul.mubr.msk.f32.gmra.mrb[180].mxu0 %vm279_vm0, %v195_v6 }
 0x175   :  { %v9594_v53 = vpack.c.bf16 %v2466_v44, %v2465_v49  ;;  %v1485_v16 = vadd.f32 %v9140_v57, %v1484_v52  ;;  %7563 = vmatprep.mubr.msk.f32.mxu0 %vm279_vm0, %v196_v45  ;;  %v208_v44 = vld [vmem:[%s10887_s0 + $0x610] sm:$0xff] }
 0x176   :  { %v2468_v54 = vmax.f32 %v1490_v50, 0.0 }
 0x177   :  { %v2467_v58 = vmax.f32 %v1485_v16, 0.0  ;;  %v7406_v59 = vpop.f32.mrb[76].mxu0  ;;  %v209_v16 = vld [vmem:[%s10887_s0 + $0x618] sm:$0xff] }
 0x178   :  { %v1500_v60 = vadd.f32 %v7406_v59, %v9140_v57  ;;  %v1494_v62 = vpop.f32.mrb[77].mxu0  ;;  %7564 = vmatmul.mubr.msk.f32.gmra.mrb[182].mxu0 %vm279_vm0, %v197_v17 }
 0x179   :  { %v9606_v63 = vpack.c.bf16 %v2468_v54, %v2467_v58  ;;  %v1495_v25 = vadd.f32 %v9140_v57, %v1494_v62  ;;  %7566 = vmatprep.mubr.msk.f32.mxu0 %vm279_vm0, %v198_v55  ;;  %v210_v54 = vld [vmem:[%s10887_s0 + $0x620] sm:$0xff] }
 0x17a   :  { %v2470_v0 = vmax.f32 %v1500_v60, 0.0 }
 0x17b   :  { %v2469_v3 = vmax.f32 %v1495_v25, 0.0  ;;  %v7409_v4 = vpop.f32.mrb[78].mxu0  ;;  %v211_v25 = vld [vmem:[%s10887_s0 + $0x628] sm:$0xff] }
 0x17c   :  { %v1510_v5 = vadd.f32 %v7409_v4, %v9140_v57  ;;  %v1504_v7 = vpop.f32.mrb[79].mxu0  ;;  %7567 = vmatmul.mubr.msk.f32.gmra.mrb[184].mxu0 %vm279_vm0, %v199_v26 }
 0x17d   :  { %v9618_v8 = vpack.c.bf16 %v2470_v0, %v2469_v3  ;;  %v1505_v2 = vadd.f32 %v9140_v57, %v1504_v7  ;;  %7569 = vmatprep.mubr.msk.f32.mxu0 %vm279_vm0, %v200_v1  ;;  %v212_v0 = vld [vmem:[%s10887_s0 + $0x630] sm:$0xff] }
 0x17e   :  { %v2472_v10 = vmax.f32 %v1510_v5, 0.0 }
 0x17f   :  { %v2471_v40 = vmax.f32 %v1505_v2, 0.0  ;;  %v7412_v14 = vpop.f32.mrb[80].mxu0  ;;  %v213_v2 = vld [vmem:[%s10887_s0 + $0x638] sm:$0xff] }
 0x180   :  { %v1520_v15 = vadd.f32 %v7412_v14, %v9140_v57  ;;  %v1514_v18 = vpop.f32.mrb[81].mxu0  ;;  %7570 = vmatmul.mubr.msk.f32.gmra.mrb[186].mxu0 %vm279_vm0, %v201_v34 }
 0x181   :  { %v9630_v19 = vpack.c.bf16 %v2472_v10, %v2471_v40  ;;  %v1515_v47 = vadd.f32 %v9140_v57, %v1514_v18  ;;  %7572 = vmatprep.mubr.msk.f32.mxu0 %vm279_vm0, %v202_v11  ;;  %v214_v10 = vld [vmem:[%s10887_s0 + $0x640] sm:$0xff] }
 0x182   :  { %v2474_v20 = vmax.f32 %v1520_v15, 0.0 }
 0x183   :  { %v2473_v51 = vmax.f32 %v1515_v47, 0.0  ;;  %v7415_v23 = vpop.f32.mrb[82].mxu0  ;;  %v215_v47 = vld [vmem:[%s10887_s0 + $0x648] sm:$0xff] }
 0x184   :  { %v1530_v24 = vadd.f32 %v7415_v23, %v9140_v57  ;;  %v1524_v27 = vpop.f32.mrb[83].mxu0  ;;  %7573 = vmatmul.mubr.msk.f32.gmra.mrb[188].mxu0 %vm279_vm0, %v203_v48 }
 0x185   :  { %v8131_v28 = vpack.c.bf16 %v2474_v20, %v2473_v51  ;;  %v1525_v56 = vadd.f32 %v9140_v57, %v1524_v27  ;;  %7575 = vmatprep.mubr.msk.f32.mxu0 %vm279_vm0, %v204_v22  ;;  %v216_v20 = vld [vmem:[%s10887_s0 + $0x650] sm:$0xff] }
 0x186   :  { %v2476_v31 = vmax.f32 %v1530_v24, 0.0 }
 0x187   :  { %v2475_v32 = vmax.f32 %v1525_v56, 0.0  ;;  %v7418_v33 = vpop.f32.mrb[84].mxu0  ;;  %8132 = vmatprep.subr.bf16.mxu1 %v8131_v28  ;;  %v217_v28 = vld [vmem:[%s10887_s0 + $0x658] sm:$0xff]  ;;  %v2654_v56 = vadd.s32 512, %v9075_v38 }
 0x188   :  { %v1540_v57 = vadd.f32 %v9653_v35, %v7418_v33  ;;  %v1534_v36 = vpop.f32.mrb[85].mxu0  ;;  %7576 = vmatmul.mubr.msk.f32.gmra.mrb[190].mxu0 %vm279_vm0, %v205_v29  ;;  %8134 = vmatpush3.bf16.msra.mxu1 %v9544_v13 }
 0x189   :  { %v8135_v37 = vpack.c.bf16 %v2476_v31, %v2475_v32  ;;  %v1535_v39 = vadd.f32 %v9653_v35, %v1534_v36  ;;  %7578 = vmatprep.mubr.msk.f32.mxu0 %vm279_vm0, %v206_v61  ;;  %v218_v31 = vld [vmem:[%s10887_s0 + $0x660] sm:$0xff]  ;;  %v2657_v61 = vadd.s32 896, %v9075_v38  ;;  %vm2673_vm1 = vcmp.ge.s32.totalorder %v2654_v56, %v9081_v42 }
 0x18a   :  { %v2478_v6 = vmax.f32 %v1540_v57, 0.0  ;;  %vm2691_vm2 = vcmp.lt.s32.totalorder %v2654_v56, %v9083_v43 }
 0x18b   :  { %v2477_v45 = vmax.f32 %v1535_v39, 0.0  ;;  %v7421_v49 = vpop.f32.mrb[86].mxu0  ;;  %8136 = vmatprep.subr.bf16.mxu1 %v8135_v37  ;;  %v219_v39 = vld [vmem:[%s10887_s0 + $0x668] sm:$0xff]  ;;  %vm2676_vm3 = vcmp.ge.s32.totalorder %v2657_v61, %v9081_v42  ;;  %vm2694_vm4 = vcmp.lt.s32.totalorder %v2657_v61, %v9083_v43  ;;  %vm2707_vm5 = vmand %vm2673_vm1, %vm2691_vm2 }
 0x18c   :  { %v1550_v12 = vadd.f32 %v9653_v35, %v7421_v49  ;;  %v1544_v13 = vpop.f32.mrb[87].mxu0  ;;  %7579 = vmatmul.mubr.msk.f32.gmra.mrb[192].mxu0 %vm279_vm0, %v207_v9  ;;  %8138 = vmatpush3.bf16.msra.mxu1 %v9558_v21  ;;  %vm2710_vm6 = vmand %vm2676_vm3, %vm2694_vm4 }
 0x18d   :  { %v8139_v50 = vpack.c.bf16 %v2478_v6, %v2477_v45  ;;  %v1545_v52 = vadd.f32 %v9653_v35, %v1544_v13  ;;  %7581 = vmatprep.mubr.msk.f32.mxu0 %vm279_vm0, %v208_v44  ;;  %v220_v6 = vld [vmem:[%s10887_s0 + $0x670] sm:$0xff] }
 0x18e   :  { %v2480_v17 = vmax.f32 %v1550_v12, 0.0 }
 0x18f   :  { %v2479_v55 = vmax.f32 %v1545_v52, 0.0  ;;  %v7424_v58 = vpop.f32.mrb[88].mxu0  ;;  %8140 = vmatprep.subr.bf16.mxu1 %v8139_v50  ;;  %v221_v50 = vld [vmem:[%s10887_s0 + $0x678] sm:$0xff] }
 0x190   :  { %v1560_v59 = vadd.f32 %v9653_v35, %v7424_v58  ;;  %v1554_v21 = vpop.f32.mrb[89].mxu0  ;;  %7582 = vmatmul.mubr.msk.f32.gmra.mrb[194].mxu0 %vm279_vm0, %v209_v16  ;;  %8142 = vmatpush3.bf16.msra.mxu1 %v9570_v30  ;;  %v222_v16 = vld [vmem:[%s10887_s0 + $0x680] sm:$0xff] }
 0x191   :  { %v8143_v60 = vpack.c.bf16 %v2480_v17, %v2479_v55  ;;  %v1555_v62 = vadd.f32 %v9653_v35, %v1554_v21  ;;  %7584 = vmatprep.mubr.msk.f32.mxu0 %vm279_vm0, %v210_v54  ;;  %v223_v21 = vld [vmem:[%s10887_s0 + $0x688] sm:$0xff] }
 0x192   :  { %v2482_v26 = vmax.f32 %v1560_v59, 0.0 }
 0x193   :  { %v2481_v1 = vmax.f32 %v1555_v62, 0.0  ;;  %v7427_v3 = vpop.f32.mrb[90].mxu0  ;;  %8144 = vmatprep.subr.bf16.mxu1 %v8143_v60  ;;  %v224_v62 = vld [vmem:[%s10887_s0 + $0x690] sm:$0xff] }
 0x194   :  { %v1570_v4 = vadd.f32 %v9653_v35, %v7427_v3  ;;  %v1564_v30 = vpop.f32.mrb[91].mxu0  ;;  %7585 = vmatmul.mubr.msk.f32.gmra.mrb[196].mxu0 %vm279_vm0, %v211_v25  ;;  %8146 = vmatpush3.bf16.msra.mxu1 %v9582_v41 }
 0x195   :  { %v8147_v5 = vpack.c.bf16 %v2482_v26, %v2481_v1  ;;  %v1565_v7 = vadd.f32 %v9653_v35, %v1564_v30  ;;  %7587 = vmatprep.mubr.msk.f32.mxu0 %vm279_vm0, %v212_v0  ;;  %v225_v30 = vld [vmem:[%s10887_s0 + $0x698] sm:$0xff] }
 0x196   :  { %v2484_v34 = vmax.f32 %v1570_v4, 0.0 }
 0x197   :  { %v2483_v11 = vmax.f32 %v1565_v7, 0.0  ;;  %v7430_v40 = vpop.f32.mrb[92].mxu0  ;;  %8148 = vmatprep.subr.bf16.mxu1 %v8147_v5  ;;  %v226_v7 = vld [vmem:[%s10887_s0 + $0x6a0] sm:$0xff] }
 0x198   :  { %v1580_v14 = vadd.f32 %v9653_v35, %v7430_v40  ;;  %v1574_v41 = vpop.f32.mrb[93].mxu0  ;;  %7588 = vmatmul.mubr.msk.f32.gmra.mrb[198].mxu0 %vm279_vm0, %v213_v2  ;;  %8150 = vmatpush3.bf16.msra.mxu1 %v9594_v53 }
 0x199   :  { %v8151_v15 = vpack.c.bf16 %v2484_v34, %v2483_v11  ;;  %v1575_v18 = vadd.f32 %v9653_v35, %v1574_v41  ;;  %7590 = vmatprep.mubr.msk.f32.mxu0 %vm279_vm0, %v214_v10  ;;  %v227_v41 = vld [vmem:[%s10887_s0 + $0x6a8] sm:$0xff] }
 0x19a   :  { %v2486_v48 = vmax.f32 %v1580_v14, 0.0 }
 0x19b   :  { %v2485_v22 = vmax.f32 %v1575_v18, 0.0  ;;  %v7433_v51 = vpop.f32.mrb[94].mxu0  ;;  %8152 = vmatprep.subr.bf16.mxu1 %v8151_v15  ;;  %v228_v18 = vld [vmem:[%s10887_s0 + $0x6b0] sm:$0xff] }
 0x19c   :  { %v1590_v23 = vadd.f32 %v9653_v35, %v7433_v51  ;;  %v1584_v53 = vpop.f32.mrb[95].mxu0  ;;  %7591 = vmatmul.mubr.msk.f32.gmra.mrb[200].mxu0 %vm279_vm0, %v215_v47  ;;  %8154 = vmatpush3.bf16.msra.mxu1 %v9606_v63 }
 0x19d   :  { %v8155_v24 = vpack.c.bf16 %v2486_v48, %v2485_v22  ;;  %v1585_v27 = vadd.f32 %v9653_v35, %v1584_v53  ;;  %7593 = vmatprep.mubr.msk.f32.mxu0 %vm279_vm0, %v216_v20  ;;  %v229_v53 = vld [vmem:[%s10887_s0 + $0x6b8] sm:$0xff] }
 0x19e   :  { %v2488_v29 = vmax.f32 %v1590_v23, 0.0 }
 0x19f   :  { %v2487_v32 = vmax.f32 %v1585_v27, 0.0  ;;  %v7436_v63 = vpop.f32.mrb[96].mxu0  ;;  %8156 = vmatprep.subr.bf16.mxu1 %v8155_v24  ;;  %v230_v27 = vld [vmem:[%s10887_s0 + $0x6c0] sm:$0xff] }
 0x1a0   :  { %v1600_v33 = vadd.f32 %v9653_v35, %v7436_v63  ;;  %v1594_v57 = vpop.f32.mrb[97].mxu0  ;;  %7594 = vmatmul.mubr.msk.f32.gmra.mrb[202].mxu0 %vm279_vm0, %v217_v28  ;;  %8158 = vmatpush3.bf16.msra.mxu1 %v9618_v8  ;;  %v231_v63 = vld [vmem:[%s10887_s0 + $0x6c8] sm:$0xff] }
 0x1a1   :  { %v8159_v36 = vpack.c.bf16 %v2488_v29, %v2487_v32  ;;  %v1595_v37 = vadd.f32 %v9653_v35, %v1594_v57  ;;  %7596 = vmatprep.mubr.msk.f32.mxu0 %vm279_vm0, %v218_v31  ;;  %v232_v57 = vld [vmem:[%s10887_s0 + $0x6d0] sm:$0xff] }
 0x1a2   :  { %v2490_v9 = vmax.f32 %v1600_v33, 0.0 }
 0x1a3   :  { %v2489_v8 = vmax.f32 %v1595_v37, 0.0  ;;  %v7439_v44 = vpop.f32.mrb[98].mxu0  ;;  %8160 = vmatprep.subr.bf16.mxu1 %v8159_v36 }
 0x1a4   :  { %v1610_v45 = vadd.f32 %v9653_v35, %v7439_v44  ;;  %v1604_v49 = vpop.f32.mrb[99].mxu0  ;;  %7597 = vmatmul.mubr.msk.f32.gmra.mrb[204].mxu0 %vm279_vm0, %v219_v39  ;;  %8162 = vmatpush3.bf16.msra.mxu1 %v9630_v19  ;;  %v233_v44 = vld [vmem:[%s10887_s0 + $0x6d8] sm:$0xff] }
 0x1a5   :  { %v9741_v12 = vpack.c.bf16 %v2490_v9, %v2489_v8  ;;  %v1605_v13 = vadd.f32 %v9653_v35, %v1604_v49  ;;  %7599 = vmatprep.mubr.msk.f32.mxu0 %vm279_vm0, %v220_v6  ;;  %v234_v49 = vld [vmem:[%s10887_s0 + $0x6e0] sm:$0xff] }
 0x1a6   :  { %v2492_v52 = vmax.f32 %v1610_v45, 0.0 }
 0x1a7   :  { %v2491_v17 = vmax.f32 %v1605_v13, 0.0  ;;  %v7442_v54 = vpop.f32.mrb[100].mxu0  ;;  %6492 = vmatmul.mubr.msk.f32.vlgmr.msra.gmra.mrb[4].mxu1 %vm2707_vm5, %v8659_v46 }
 0x1a8   :  { %v1620_v19 = vadd.f32 %v9653_v35, %v7442_v54  ;;  %v1614_v55 = vpop.f32.mrb[101].mxu0  ;;  %7600 = vmatmul.mubr.msk.f32.gmra.mrb[206].mxu0 %vm279_vm0, %v221_v50  ;;  %6493 = vmatprep.mubr.msk.f32.mxu1 %vm2710_vm6, %v8659_v46 }
 0x1a9   :  { %v9755_v58 = vpack.c.bf16 %v2492_v52, %v2491_v17  ;;  %v1615_v59 = vadd.f32 %v9653_v35, %v1614_v55  ;;  %7602 = vmatprep.mubr.msk.f32.mxu0 %vm279_vm0, %v222_v16 }
 0x1aa   :  { %v2494_v60 = vmax.f32 %v1620_v19, 0.0  ;;  %v235_v19 = vld [vmem:[%s10887_s0 + $0x6e8] sm:$0xff] }
 0x1ab   :  { %v2493_v25 = vmax.f32 %v1615_v59, 0.0  ;;  %v7445_v26 = vpop.f32.mrb[102].mxu0  ;;  %v236_v59 = vld [vmem:[%s10887_s0 + $0x6f0] sm:$0xff] }
 0x1ac   :  { %v1630_v0 = vadd.f32 %v9653_v35, %v7445_v26  ;;  %v1624_v1 = vpop.f32.mrb[103].mxu0  ;;  %7603 = vmatmul.mubr.msk.f32.gmra.mrb[208].mxu0 %vm279_vm0, %v223_v21 }
 0x1ad   :  { %v9767_v3 = vpack.c.bf16 %v2494_v60, %v2493_v25  ;;  %v1625_v4 = vadd.f32 %v9653_v35, %v1624_v1  ;;  %7605 = vmatprep.mubr.msk.f32.mxu0 %vm279_vm0, %v224_v62  ;;  %v237_v1 = vld [vmem:[%s10887_s0 + $0x6f8] sm:$0xff] }
 0x1ae   :  { %v2496_v5 = vmax.f32 %v1630_v0, 0.0 }
 0x1af   :  { %v2495_v2 = vmax.f32 %v1625_v4, 0.0  ;;  %v7448_v34 = vpop.f32.mrb[104].mxu0 }
 0x1b0   :  { %v1640_v10 = vadd.f32 %v9653_v35, %v7448_v34  ;;  %v1634_v11 = vpop.f32.mrb[105].mxu0  ;;  %7606 = vmatmul.mubr.msk.f32.gmra.mrb[210].mxu0 %vm279_vm0, %v225_v30  ;;  %v238_v30 = vld [vmem:[%s10887_s0 + $0x700] sm:$0xff] }
 0x1b1   :  { %v9779_v40 = vpack.c.bf16 %v2496_v5, %v2495_v2  ;;  %v1635_v14 = vadd.f32 %v9653_v35, %v1634_v11  ;;  %7608 = vmatprep.mubr.msk.f32.mxu0 %vm279_vm0, %v226_v7 }
 0x1b2   :  { %v2498_v15 = vmax.f32 %v1640_v10, 0.0 }
 0x1b3   :  { %v2497_v47 = vmax.f32 %v1635_v14, 0.0  ;;  %v7451_v48 = vpop.f32.mrb[106].mxu0  ;;  %v239_v14 = vld [vmem:[%s10887_s0 + $0x708] sm:$0xff] }
 0x1b4   :  { %v1650_v20 = vadd.f32 %v9653_v35, %v7451_v48  ;;  %v1644_v22 = vpop.f32.mrb[107].mxu0  ;;  %7609 = vmatmul.mubr.msk.f32.gmra.mrb[212].mxu0 %vm279_vm0, %v227_v41 }
 0x1b5   :  { %v9791_v51 = vpack.c.bf16 %v2498_v15, %v2497_v47  ;;  %v1645_v23 = vadd.f32 %v9653_v35, %v1644_v22  ;;  %7611 = vmatprep.mubr.msk.f32.mxu0 %vm279_vm0, %v228_v18  ;;  %v240_v15 = vld [vmem:[%s10887_s0 + $0x710] sm:$0xff] }
 0x1b6   :  { %v2500_v24 = vmax.f32 %v1650_v20, 0.0 }
 0x1b7   :  { %v2499_v28 = vmax.f32 %v1645_v23, 0.0  ;;  %v7454_v56 = vpop.f32.mrb[108].mxu0  ;;  %v241_v23 = vld [vmem:[%s10887_s0 + $0x718] sm:$0xff] }
 0x1b8   :  { %v1660_v29 = vadd.f32 %v9653_v35, %v7454_v56  ;;  %v1654_v31 = vpop.f32.mrb[109].mxu0  ;;  %7612 = vmatmul.mubr.msk.f32.gmra.mrb[214].mxu0 %vm279_vm0, %v229_v53 }
 0x1b9   :  { %v9803_v61 = vpack.c.bf16 %v2500_v24, %v2499_v28  ;;  %v1655_v32 = vadd.f32 %v9653_v35, %v1654_v31  ;;  %7614 = vmatprep.mubr.msk.f32.mxu0 %vm279_vm0, %v230_v27  ;;  %v242_v24 = vld [vmem:[%s10887_s0 + $0x720] sm:$0xff] }
 0x1ba   :  { %v2502_v33 = vmax.f32 %v1660_v29, 0.0 }
 0x1bb   :  { %v2501_v36 = vmax.f32 %v1655_v32, 0.0  ;;  %v7457_v37 = vpop.f32.mrb[110].mxu0  ;;  %v243_v32 = vld [vmem:[%s10887_s0 + $0x728] sm:$0xff] }
 0x1bc   :  { %v1670_v39 = vadd.f32 %v9653_v35, %v7457_v37  ;;  %v1664_v9 = vpop.f32.mrb[111].mxu0  ;;  %7615 = vmatmul.mubr.msk.f32.gmra.mrb[216].mxu0 %vm279_vm0, %v231_v63 }
 0x1bd   :  { %v9815_v6 = vpack.c.bf16 %v2502_v33, %v2501_v36  ;;  %v1665_v8 = vadd.f32 %v9653_v35, %v1664_v9  ;;  %7617 = vmatprep.mubr.msk.f32.mxu0 %vm279_vm0, %v232_v57  ;;  %v244_v33 = vld [vmem:[%s10887_s0 + $0x730] sm:$0xff] }
 0x1be   :  { %v2504_v45 = vmax.f32 %v1670_v39, 0.0 }
 0x1bf   :  { %v2503_v13 = vmax.f32 %v1665_v8, 0.0  ;;  %v7460_v50 = vpop.f32.mrb[112].mxu0  ;;  %v245_v8 = vld [vmem:[%s10887_s0 + $0x738] sm:$0xff] }
 0x1c0   :  { %v1680_v52 = vadd.f32 %v9653_v35, %v7460_v50  ;;  %v1674_v16 = vpop.f32.mrb[113].mxu0  ;;  %7618 = vmatmul.mubr.msk.f32.gmra.mrb[218].mxu0 %vm279_vm0, %v233_v44 }
 0x1c1   :  { %v9827_v17 = vpack.c.bf16 %v2504_v45, %v2503_v13  ;;  %v1675_v54 = vadd.f32 %v9653_v35, %v1674_v16  ;;  %7620 = vmatprep.mubr.msk.f32.mxu0 %vm279_vm0, %v234_v49  ;;  %v246_v45 = vld [vmem:[%s10887_s0 + $0x740] sm:$0xff] }
 0x1c2   :  { %v2506_v55 = vmax.f32 %v1680_v52, 0.0 }
 0x1c3   :  { %v2505_v21 = vmax.f32 %v1675_v54, 0.0  ;;  %v7463_v60 = vpop.f32.mrb[114].mxu0  ;;  %v247_v54 = vld [vmem:[%s10887_s0 + $0x748] sm:$0xff] }
 0x1c4   :  { %v1690_v62 = vadd.f32 %v9653_v35, %v7463_v60  ;;  %v1684_v25 = vpop.f32.mrb[115].mxu0  ;;  %7621 = vmatmul.mubr.msk.f32.gmra.mrb[220].mxu0 %vm279_vm0, %v235_v19 }
 0x1c5   :  { %v8163_v26 = vpack.c.bf16 %v2506_v55, %v2505_v21  ;;  %v1685_v0 = vadd.f32 %v9653_v35, %v1684_v25  ;;  %7623 = vmatprep.mubr.msk.f32.mxu0 %vm279_vm0, %v236_v59  ;;  %v248_v55 = vld [vmem:[%s10887_s0 + $0x750] sm:$0xff] }
 0x1c6   :  { %v2508_v4 = vmax.f32 %v1690_v62, 0.0 }
 0x1c7   :  { %v2507_v5 = vmax.f32 %v1685_v0, 0.0  ;;  %v7466_v7 = vpop.f32.mrb[116].mxu0  ;;  %8164 = vmatprep.subr.bf16.mxu1 %v8163_v26  ;;  %v249_v26 = vld [vmem:[%s10887_s0 + $0x758] sm:$0xff]  ;;  %v2656_v0 = vadd.s32 768, %v9075_v38 }
 0x1c8   :  { %v1700_v2 = vadd.f32 %v9653_v35, %v7466_v7  ;;  %v1694_v34 = vpop.f32.mrb[117].mxu0  ;;  %7624 = vmatmul.mubr.msk.f32.gmra.mrb[222].mxu0 %vm279_vm0, %v237_v1  ;;  %8166 = vmatpush3.bf16.msra.mxu1 %v9741_v12 }
 0x1c9   :  { %v8167_v10 = vpack.c.bf16 %v2508_v4, %v2507_v5  ;;  %v1695_v11 = vadd.f32 %v9653_v35, %v1694_v34  ;;  %7626 = vmatprep.mubr.msk.f32.mxu0 %vm279_vm0, %v238_v30  ;;  %v250_v4 = vld [vmem:[%s10887_s0 + $0x760] sm:$0xff]  ;;  %v2659_v30 = vadd.s32 1152, %v9075_v38  ;;  %vm2675_vm7 = vcmp.ge.s32.totalorder %v2656_v0, %v9081_v42 }
 0x1ca   :  { %v2510_v41 = vmax.f32 %v1700_v2, 0.0  ;;  %vm2693_vm8 = vcmp.lt.s32.totalorder %v2656_v0, %v9083_v43 }
 0x1cb   :  { %v2509_v18 = vmax.f32 %v1695_v11, 0.0  ;;  %v7469_v47 = vpop.f32.mrb[118].mxu0  ;;  %8168 = vmatprep.subr.bf16.mxu1 %v8167_v10  ;;  %v251_v11 = vld [vmem:[%s10887_s0 + $0x768] sm:$0xff]  ;;  %vm2678_vm9 = vcmp.ge.s32.totalorder %v2659_v30, %v9081_v42  ;;  %vm2696_vm10 = vcmp.lt.s32.totalorder %v2659_v30, %v9083_v43  ;;  %vm2709_vm11 = vmand %vm2675_vm7, %vm2693_vm8 }
 0x1cc   :  { %v1710_v48 = vadd.f32 %v9653_v35, %v7469_v47  ;;  %v1704_v12 = vpop.f32.mrb[119].mxu0  ;;  %7627 = vmatmul.mubr.msk.f32.gmra.mrb[224].mxu0 %vm279_vm0, %v239_v14  ;;  %8170 = vmatpush3.bf16.msra.mxu1 %v9755_v58  ;;  %vm2712_vm12 = vmand %vm2678_vm9, %vm2696_vm10 }
 0x1cd   :  { %v8171_v20 = vpack.c.bf16 %v2510_v41, %v2509_v18  ;;  %v1705_v22 = vadd.f32 %v9653_v35, %v1704_v12  ;;  %7629 = vmatprep.mubr.msk.f32.mxu0 %vm279_vm0, %v240_v15  ;;  %v252_v41 = vld [vmem:[%s10887_s0 + $0x770] sm:$0xff] }
 0x1ce   :  { %v2512_v53 = vmax.f32 %v1710_v48, 0.0 }
 0x1cf   :  { %v2511_v27 = vmax.f32 %v1705_v22, 0.0  ;;  %v7472_v28 = vpop.f32.mrb[120].mxu0  ;;  %8172 = vmatprep.subr.bf16.mxu1 %v8171_v20  ;;  %v253_v20 = vld [vmem:[%s10887_s0 + $0x778] sm:$0xff] }
 0x1d0   :  { %v1720_v56 = vadd.f32 %v9653_v35, %v7472_v28  ;;  %v1714_v58 = vpop.f32.mrb[121].mxu0  ;;  %7630 = vmatmul.mubr.msk.f32.gmra.mrb[226].mxu0 %vm279_vm0, %v241_v23  ;;  %8174 = vmatpush3.bf16.msra.mxu1 %v9767_v3  ;;  %v254_v23 = vld [vmem:[%s10887_s0 + $0x780] sm:$0xff] }
 0x1d1   :  { %v8175_v29 = vpack.c.bf16 %v2512_v53, %v2511_v27  ;;  %v1715_v31 = vadd.f32 %v9653_v35, %v1714_v58  ;;  %7632 = vmatprep.mubr.msk.f32.mxu0 %vm279_vm0, %v242_v24  ;;  %v255_v58 = vld [vmem:[%s10887_s0 + $0x788] sm:$0xff] }
 0x1d2   :  { %v2514_v63 = vmax.f32 %v1720_v56, 0.0 }
 0x1d3   :  { %v2513_v57 = vmax.f32 %v1715_v31, 0.0  ;;  %v7475_v36 = vpop.f32.mrb[122].mxu0  ;;  %8176 = vmatprep.subr.bf16.mxu1 %v8175_v29  ;;  %v256_v31 = vld [vmem:[%s10887_s0 + $0x790] sm:$0xff] }
 0x1d4   :  { %v1730_v37 = vadd.f32 %v9653_v35, %v7475_v36  ;;  %v1724_v3 = vpop.f32.mrb[123].mxu0  ;;  %7633 = vmatmul.mubr.msk.f32.gmra.mrb[228].mxu0 %vm279_vm0, %v243_v32  ;;  %8178 = vmatpush3.bf16.msra.mxu1 %v9779_v40 }
 0x1d5   :  { %v8179_v39 = vpack.c.bf16 %v2514_v63, %v2513_v57  ;;  %v1725_v9 = vadd.f32 %v9653_v35, %v1724_v3  ;;  %7635 = vmatprep.mubr.msk.f32.mxu0 %vm279_vm0, %v244_v33  ;;  %v257_v3 = vld [vmem:[%s10887_s0 + $0x798] sm:$0xff] }
 0x1d6   :  { %v2516_v44 = vmax.f32 %v1730_v37, 0.0 }
 0x1d7   :  { %v2515_v49 = vmax.f32 %v1725_v9, 0.0  ;;  %v7478_v13 = vpop.f32.mrb[124].mxu0  ;;  %8180 = vmatprep.subr.bf16.mxu1 %v8179_v39  ;;  %v258_v9 = vld [vmem:[%s10887_s0 + $0x7a0] sm:$0xff] }
 0x1d8   :  { %v1740_v50 = vadd.f32 %v9653_v35, %v7478_v13  ;;  %v1734_v40 = vpop.f32.mrb[125].mxu0  ;;  %7636 = vmatmul.mubr.msk.f32.gmra.mrb[230].mxu0 %vm279_vm0, %v245_v8  ;;  %8182 = vmatpush3.bf16.msra.mxu1 %v9791_v51 }
 0x1d9   :  { %v8183_v52 = vpack.c.bf16 %v2516_v44, %v2515_v49  ;;  %v1735_v16 = vadd.f32 %v9653_v35, %v1734_v40  ;;  %7638 = vmatprep.mubr.msk.f32.mxu0 %vm279_vm0, %v246_v45  ;;  %v259_v40 = vld [vmem:[%s10887_s0 + $0x7a8] sm:$0xff] }
 0x1da   :  { %v2518_v19 = vmax.f32 %v1740_v50, 0.0 }
 0x1db   :  { %v2517_v59 = vmax.f32 %v1735_v16, 0.0  ;;  %v7481_v21 = vpop.f32.mrb[126].mxu0  ;;  %8184 = vmatprep.subr.bf16.mxu1 %v8183_v52  ;;  %v260_v16 = vld [vmem:[%s10887_s0 + $0x7b0] sm:$0xff] }
 0x1dc   :  { %v1750_v60 = vadd.f32 %v9653_v35, %v7481_v21  ;;  %v1744_v51 = vpop.f32.mrb[127].mxu0  ;;  %7639 = vmatmul.mubr.msk.f32.gmra.mrb[232].mxu0 %vm279_vm0, %v247_v54  ;;  %8186 = vmatpush3.bf16.msra.mxu1 %v9803_v61 }
 0x1dd   :  { %v8187_v62 = vpack.c.bf16 %v2518_v19, %v2517_v59  ;;  %v1745_v25 = vadd.f32 %v9653_v35, %v1744_v51  ;;  %7641 = vmatprep.mubr.msk.f32.mxu0 %vm279_vm0, %v248_v55  ;;  %v261_v51 = vld [vmem:[%s10887_s0 + $0x7b8] sm:$0xff] }
 0x1de   :  { %v2520_v1 = vmax.f32 %v1750_v60, 0.0 }
 0x1df   :  { %v2519_v5 = vmax.f32 %v1745_v25, 0.0  ;;  %v7484_v61 = vpop.f32.mrb[128].mxu0  ;;  %8188 = vmatprep.subr.bf16.mxu1 %v8187_v62  ;;  %v262_v25 = vld [vmem:[%s10887_s0 + $0x7c0] sm:$0xff] }
 0x1e0   :  { %v1760_v7 = vadd.f32 %v9653_v35, %v7484_v61  ;;  %v1754_v2 = vpop.f32.mrb[129].mxu0  ;;  %7642 = vmatmul.mubr.msk.f32.gmra.mrb[234].mxu0 %vm279_vm0, %v249_v26  ;;  %8190 = vmatpush3.bf16.msra.mxu1 %v9815_v6  ;;  %v263_v61 = vld [vmem:[%s10887_s0 + $0x7c8] sm:$0xff] }
 0x1e1   :  { %v8191_v34 = vpack.c.bf16 %v2520_v1, %v2519_v5  ;;  %v1755_v10 = vadd.f32 %v9653_v35, %v1754_v2  ;;  %7644 = vmatprep.mubr.msk.f32.mxu0 %vm279_vm0, %v250_v4  ;;  %v264_v2 = vld [vmem:[%s10887_s0 + $0x7d0] sm:$0xff] }
 0x1e2   :  { %v2522_v14 = vmax.f32 %v1760_v7, 0.0 }
 0x1e3   :  { %v2521_v6 = vmax.f32 %v1755_v10, 0.0  ;;  %v7487_v15 = vpop.f32.mrb[130].mxu0  ;;  %8192 = vmatprep.subr.bf16.mxu1 %v8191_v34 }
 0x1e4   :  { %v1770_v18 = vadd.f32 %v9653_v35, %v7487_v15  ;;  %v1764_v47 = vpop.f32.mrb[131].mxu0  ;;  %7645 = vmatmul.mubr.msk.f32.gmra.mrb[236].mxu0 %vm279_vm0, %v251_v11  ;;  %8194 = vmatpush3.bf16.msra.mxu1 %v9827_v17  ;;  %v265_v15 = vld [vmem:[%s10887_s0 + $0x7d8] sm:$0xff] }
 0x1e5   :  { %v9933_v48 = vpack.c.bf16 %v2522_v14, %v2521_v6  ;;  %v1765_v12 = vadd.f32 %v9653_v35, %v1764_v47  ;;  %7647 = vmatprep.mubr.msk.f32.mxu0 %vm279_vm0, %v252_v41  ;;  %v266_v47 = vld [vmem:[%s10887_s0 + $0x7e0] sm:$0xff] }
 0x1e6   :  { %v2524_v22 = vmax.f32 %v1770_v18, 0.0 }
 0x1e7   :  { %v2523_v53 = vmax.f32 %v1765_v12, 0.0  ;;  %v7490_v24 = vpop.f32.mrb[132].mxu0  ;;  %6494 = vmatmul.mubr.msk.f32.vlgmr.msra.gmra.mrb[6].mxu1 %vm2709_vm11, %v8659_v46 }
 0x1e8   :  { %v1780_v17 = vadd.f32 %v9653_v35, %v7490_v24  ;;  %v1774_v27 = vpop.f32.mrb[133].mxu0  ;;  %7648 = vmatmul.mubr.msk.f32.gmra.mrb[238].mxu0 %vm279_vm0, %v253_v20  ;;  %6495 = vmatprep.mubr.msk.f32.mxu1 %vm2712_vm12, %v8659_v46 }
 0x1e9   :  { %v9947_v28 = vpack.c.bf16 %v2524_v22, %v2523_v53  ;;  %v1775_v56 = vadd.f32 %v9653_v35, %v1774_v27  ;;  %7650 = vmatprep.mubr.msk.f32.mxu0 %vm279_vm0, %v254_v23 }
 0x1ea   :  { %v2526_v29 = vmax.f32 %v1780_v17, 0.0  ;;  %v267_v17 = vld [vmem:[%s10887_s0 + $0x7e8] sm:$0xff] }
 0x1eb   :  { %v2525_v32 = vmax.f32 %v1775_v56, 0.0  ;;  %v7493_v63 = vpop.f32.mrb[134].mxu0  ;;  %v268_v56 = vld [vmem:[%s10887_s0 + $0x7f0] sm:$0xff] }
 0x1ec   :  { %v1790_v33 = vadd.f32 %v9653_v35, %v7493_v63  ;;  %v1784_v57 = vpop.f32.mrb[135].mxu0  ;;  %7651 = vmatmul.mubr.msk.f32.gmra.mrb[240].mxu0 %vm279_vm0, %v255_v58 }
 0x1ed   :  { %v9959_v36 = vpack.c.bf16 %v2526_v29, %v2525_v32  ;;  %v1785_v37 = vadd.f32 %v9653_v35, %v1784_v57  ;;  %7653 = vmatprep.mubr.msk.f32.mxu0 %vm279_vm0, %v256_v31  ;;  %v269_v57 = vld [vmem:[%s10887_s0 + $0x7f8] sm:$0xff] }
 0x1ee   :  { %v2528_v39 = vmax.f32 %v1790_v33, 0.0 }
 0x1ef   :  { %v2527_v8 = vmax.f32 %v1785_v37, 0.0  ;;  %v7496_v44 = vpop.f32.mrb[136].mxu0 }
 0x1f0   :  { %v1800_v45 = vadd.f32 %v9653_v35, %v7496_v44  ;;  %v1794_v49 = vpop.f32.mrb[137].mxu0  ;;  %7654 = vmatmul.mubr.msk.f32.gmra.mrb[242].mxu0 %vm279_vm0, %v257_v3 }
 0x1f1   :  { %v9971_v13 = vpack.c.bf16 %v2528_v39, %v2527_v8  ;;  %v1795_v50 = vadd.f32 %v9653_v35, %v1794_v49  ;;  %7656 = vmatprep.mubr.msk.f32.mxu0 %vm279_vm0, %v258_v9 }
 0x1f2   :  { %v2530_v52 = vmax.f32 %v1800_v45, 0.0 }
 0x1f3   :  { %v2529_v54 = vmax.f32 %v1795_v50, 0.0  ;;  %v7499_v19 = vpop.f32.mrb[138].mxu0 }
 0x1f4   :  { %v1810_v55 = vadd.f32 %v9653_v35, %v7499_v19  ;;  %v1804_v59 = vpop.f32.mrb[139].mxu0  ;;  %7657 = vmatmul.mubr.msk.f32.gmra.mrb[244].mxu0 %vm279_vm0, %v259_v40 }
 0x1f5   :  { %v9983_v21 = vpack.c.bf16 %v2530_v52, %v2529_v54  ;;  %v1805_v60 = vadd.f32 %v9653_v35, %v1804_v59  ;;  %7659 = vmatprep.mubr.msk.f32.mxu0 %vm279_vm0, %v260_v16 }
 0x1f6   :  { %v2532_v62 = vmax.f32 %v1810_v55, 0.0 }
 0x1f7   :  { %v2531_v26 = vmax.f32 %v1805_v60, 0.0  ;;  %v7502_v0 = vpop.f32.mrb[140].mxu0 }
 0x1f8   :  { %v1820_v1 = vadd.f32 %v9653_v35, %v7502_v0  ;;  %v1814_v4 = vpop.f32.mrb[141].mxu0  ;;  %7660 = vmatmul.mubr.msk.f32.gmra.mrb[246].mxu0 %vm279_vm0, %v261_v51 }
 0x1f9   :  { %v9995_v30 = vpack.c.bf16 %v2532_v62, %v2531_v26  ;;  %v1815_v5 = vadd.f32 %v9653_v35, %v1814_v4  ;;  %7662 = vmatprep.mubr.msk.f32.mxu0 %vm279_vm0, %v262_v25 }
 0x1fa   :  { %v2534_v7 = vmax.f32 %v1820_v1, 0.0 }
 0x1fb   :  { %v2533_v34 = vmax.f32 %v1815_v5, 0.0  ;;  %v7505_v10 = vpop.f32.mrb[142].mxu0 }
 0x1fc   :  { %v1830_v11 = vadd.f32 %v9653_v35, %v7505_v10  ;;  %v1824_v14 = vpop.f32.mrb[143].mxu0  ;;  %7663 = vmatmul.mubr.msk.f32.gmra.mrb[248].mxu0 %vm279_vm0, %v263_v61 }
 0x1fd   :  { %v10007_v41 = vpack.c.bf16 %v2534_v7, %v2533_v34  ;;  %v1825_v6 = vadd.f32 %v9653_v35, %v1824_v14  ;;  %7665 = vmatprep.mubr.msk.f32.mxu0 %vm279_vm0, %v264_v2 }
 0x1fe   :  { %v2536_v18 = vmax.f32 %v1830_v11, 0.0 }
 0x1ff   :  { %v2535_v12 = vmax.f32 %v1825_v6, 0.0  ;;  %v7508_v20 = vpop.f32.mrb[144].mxu0 }
 0x200   :  { %v1840_v22 = vadd.f32 %v9653_v35, %v7508_v20  ;;  %v1834_v23 = vpop.f32.mrb[145].mxu0  ;;  %7666 = vmatmul.mubr.msk.f32.gmra.mrb[250].mxu0 %vm279_vm0, %v265_v15 }
 0x201   :  { %v10019_v53 = vpack.c.bf16 %v2536_v18, %v2535_v12  ;;  %v1835_v24 = vadd.f32 %v9653_v35, %v1834_v23  ;;  %7668 = vmatprep.mubr.msk.f32.mxu0 %vm279_vm0, %v266_v47 }
 0x202   :  { %v2538_v27 = vmax.f32 %v1840_v22, 0.0  ;;  %v2658_v22 = vadd.s32 1024, %v9075_v38 }
 0x203   :  { %v2537_v58 = vmax.f32 %v1835_v24, 0.0  ;;  %v7511_v29 = vpop.f32.mrb[146].mxu0 }
 0x204   :  { %v1850_v31 = vadd.f32 %v9653_v35, %v7511_v29  ;;  %v1844_v32 = vpop.f32.mrb[147].mxu0  ;;  %7669 = vmatmul.mubr.msk.f32.gmra.mrb[252].mxu0 %vm279_vm0, %v267_v17  ;;  %vm2677_vm13 = vcmp.ge.s32.totalorder %v2658_v22, %v9081_v42  ;;  %vm2695_vm14 = vcmp.lt.s32.totalorder %v2658_v22, %v9083_v43 }
 0x205   :  { %v8195_v63 = vpack.c.bf16 %v2538_v27, %v2537_v58  ;;  %v1845_v33 = vadd.f32 %v9653_v35, %v1844_v32  ;;  %7671 = vmatprep.mubr.msk.f32.mxu0 %vm279_vm0, %v268_v56  ;;  %vm2711_vm2 = vmand %vm2677_vm13, %vm2695_vm14 }
 0x206   :  { %v2540_v37 = vmax.f32 %v1850_v31, 0.0 }
 0x207   :  { %v2539_v3 = vmax.f32 %v1845_v33, 0.0  ;;  %v7514_v39 = vpop.f32.mrb[148].mxu0  ;;  %8196 = vmatprep.subr.bf16.mxu1 %v8195_v63 }
 0x208   :  { %v1860_v9 = vadd.f32 %v9653_v35, %v7514_v39  ;;  %v1854_v8 = vpop.f32.mrb[149].mxu0  ;;  %7672 = vmatmul.mubr.msk.f32.gmra.mrb[254].mxu0 %vm279_vm0, %v269_v57  ;;  %8198 = vmatpush3.bf16.msra.mxu1 %v9933_v48 }
 0x209   :  { %v8199_v44 = vpack.c.bf16 %v2540_v37, %v2539_v3  ;;  %v1855_v45 = vadd.f32 %v9653_v35, %v1854_v8 }
 0x20a   :  { %v2542_v49 = vmax.f32 %v1860_v9, 0.0 }
 0x20b   :  { %v2541_v50 = vmax.f32 %v1855_v45, 0.0  ;;  %v7517_v40 = vpop.f32.mrb[150].mxu0  ;;  %8200 = vmatprep.subr.bf16.mxu1 %v8199_v44 }
 0x20c   :  { %v1870_v52 = vadd.f32 %v9653_v35, %v7517_v40  ;;  %v1864_v16 = vpop.f32.mrb[151].mxu0  ;;  %8202 = vmatpush3.bf16.msra.mxu1 %v9947_v28 }
 0x20d   :  { %v8203_v54 = vpack.c.bf16 %v2542_v49, %v2541_v50  ;;  %v1865_v19 = vadd.f32 %v9653_v35, %v1864_v16 }
 0x20e   :  { %v2544_v55 = vmax.f32 %v1870_v52, 0.0 }
 0x20f   :  { %v2543_v59 = vmax.f32 %v1865_v19, 0.0  ;;  %v7520_v60 = vpop.f32.mrb[152].mxu0  ;;  %8204 = vmatprep.subr.bf16.mxu1 %v8203_v54 }
 0x210   :  { %v1880_v48 = vadd.f32 %v9653_v35, %v7520_v60  ;;  %v1874_v51 = vpop.f32.mrb[153].mxu0  ;;  %8206 = vmatpush3.bf16.msra.mxu1 %v9959_v36 }
 0x211   :  { %v8207_v62 = vpack.c.bf16 %v2544_v55, %v2543_v59  ;;  %v1875_v25 = vadd.f32 %v9653_v35, %v1874_v51 }
 0x212   :  { %v2546_v26 = vmax.f32 %v1880_v48, 0.0 }
 0x213   :  { %v2545_v0 = vmax.f32 %v1875_v25, 0.0  ;;  %v7523_v1 = vpop.f32.mrb[154].mxu0  ;;  %8208 = vmatprep.subr.bf16.mxu1 %v8207_v62 }
 0x214   :  { %v1890_v28 = vadd.f32 %v9653_v35, %v7523_v1  ;;  %v1884_v4 = vpop.f32.mrb[155].mxu0  ;;  %8210 = vmatpush3.bf16.msra.mxu1 %v9971_v13 }
 0x215   :  { %v8211_v5 = vpack.c.bf16 %v2546_v26, %v2545_v0  ;;  %v1885_v61 = vadd.f32 %v9653_v35, %v1884_v4 }
 0x216   :  { %v2548_v7 = vmax.f32 %v1890_v28, 0.0 }
 0x217   :  { %v2547_v2 = vmax.f32 %v1885_v61, 0.0  ;;  %v7526_v34 = vpop.f32.mrb[156].mxu0  ;;  %8212 = vmatprep.subr.bf16.mxu1 %v8211_v5 }
 0x218   :  { %v1900_v36 = vadd.f32 %v9653_v35, %v7526_v34  ;;  %v1894_v10 = vpop.f32.mrb[157].mxu0  ;;  %8214 = vmatpush3.bf16.msra.mxu1 %v9983_v21  ;;  %v2661_v21 = vadd.s32 1408, %v9075_v38  ;;  %v10090_v34 = vld [vmem:[%s10886_s2 + $0x20] ss:$0 sm:$0xff] }
 0x219   :  { %v8215_v11 = vpack.c.bf16 %v2548_v7, %v2547_v2  ;;  %v1895_v14 = vadd.f32 %v9653_v35, %v1894_v10 }
 0x21a   :  { %v2550_v6 = vmax.f32 %v1900_v36, 0.0  ;;  %vm2680_vm15 = vcmp.ge.s32.totalorder %v2661_v21, %v9081_v42  ;;  %vm2698_vm1 = vcmp.lt.s32.totalorder %v2661_v21, %v9083_v43 }
 0x21b   :  { %v2549_v15 = vmax.f32 %v1895_v14, 0.0  ;;  %v7529_v18 = vpop.f32.mrb[158].mxu0  ;;  %8216 = vmatprep.subr.bf16.mxu1 %v8215_v11  ;;  %vm2714_vm3 = vmand %vm2680_vm15, %vm2698_vm1 }
 0x21c   :  { %v1910_v13 = vadd.f32 %v9653_v35, %v7529_v18  ;;  %v1904_v47 = vpop.f32.mrb[159].mxu0  ;;  %8218 = vmatpush3.bf16.msra.mxu1 %v9995_v30 }
 0x21d   :  { %v8219_v12 = vpack.c.bf16 %v2550_v6, %v2549_v15  ;;  %v1905_v20 = vadd.f32 %v9653_v35, %v1904_v47 }
 0x21e   :  { %v2552_v23 = vmax.f32 %v1910_v13, 0.0 }
 0x21f   :  { %v2551_v24 = vmax.f32 %v1905_v20, 0.0  ;;  %v7532_v17 = vpop.f32.mrb[160].mxu0  ;;  %8220 = vmatprep.subr.bf16.mxu1 %v8219_v12 }
 0x220   :  { %v1920_v27 = vadd.f32 %v9653_v35, %v7532_v17  ;;  %v1914_v56 = vpop.f32.mrb[161].mxu0  ;;  %8222 = vmatpush3.bf16.msra.mxu1 %v10007_v41 }
 0x221   :  { %v8223_v58 = vpack.c.bf16 %v2552_v23, %v2551_v24  ;;  %v1915_v29 = vadd.f32 %v9653_v35, %v1914_v56 }
 0x222   :  { %v2554_v30 = vmax.f32 %v1920_v27, 0.0 }
 0x223   :  { %v2553_v31 = vmax.f32 %v1915_v29, 0.0  ;;  %v7535_v32 = vpop.f32.mrb[162].mxu0  ;;  %8224 = vmatprep.subr.bf16.mxu1 %v8223_v58 }
 0x224   :  { %v1930_v63 = vadd.f32 %v9653_v35, %v7535_v32  ;;  %v1924_v33 = vpop.f32.mrb[163].mxu0  ;;  %8226 = vmatpush3.bf16.msra.mxu1 %v10019_v53 }
 0x225   :  { %v10066_v41 = vpack.c.bf16 %v2554_v30, %v2553_v31  ;;  %v1925_v57 = vadd.f32 %v9653_v35, %v1924_v33 }
 0x226   :  { %v2556_v37 = vmax.f32 %v1930_v63, 0.0 }
 0x227   :  { %v2555_v3 = vmax.f32 %v1925_v57, 0.0  ;;  %v7538_v39 = vpop.f32.mrb[164].mxu0  ;;  %6496 = vmatmul.mubr.msk.f32.vlgmr.msra.gmra.mrb[8].mxu1 %vm2711_vm2, %v8659_v46 }
 0x228   :  { %v1940_v9 = vadd.f32 %v9653_v35, %v7538_v39  ;;  %v1934_v8 = vpop.f32.mrb[165].mxu0  ;;  %6497 = vmatprep.mubr.msk.f32.mxu1 %vm2714_vm3, %v8659_v46 }
 0x229   :  { %v10072_v44 = vpack.c.bf16 %v2556_v37, %v2555_v3  ;;  %v1935_v53 = vadd.f32 %v9653_v35, %v1934_v8 }
 0x22a   :  { %v2558_v45 = vmax.f32 %v1940_v9, 0.0 }
 0x22b   :  { %v2557_v49 = vmax.f32 %v1935_v53, 0.0  ;;  %v7541_v50 = vpop.f32.mrb[166].mxu0 }
 0x22c   :  { %v1950_v40 = vadd.f32 %v9653_v35, %v7541_v50  ;;  %v1944_v52 = vpop.f32.mrb[167].mxu0 }
 0x22d   :  { %v10076_v16 = vpack.c.bf16 %v2558_v45, %v2557_v49  ;;  %v1945_v54 = vadd.f32 %v9653_v35, %v1944_v52 }
 0x22e   :  { %v2560_v19 = vmax.f32 %v1950_v40, 0.0 }
 0x22f   :  { %v2559_v55 = vmax.f32 %v1945_v54, 0.0  ;;  %v7544_v59 = vpop.f32.mrb[168].mxu0 }
 0x230   :  { %v1960_v60 = vadd.f32 %v9653_v35, %v7544_v59  ;;  %v1954_v48 = vpop.f32.mrb[169].mxu0 }
 0x231   :  { %v10080_v51 = vpack.c.bf16 %v2560_v19, %v2559_v55  ;;  %v1955_v62 = vadd.f32 %v9653_v35, %v1954_v48 }
 0x232   :  { %v2562_v25 = vmax.f32 %v1960_v60, 0.0 }
 0x233   :  { %v2561_v26 = vmax.f32 %v1955_v62, 0.0  ;;  %v7547_v0 = vpop.f32.mrb[170].mxu0 }
 0x234   :  { %v1970_v1 = vadd.f32 %v9653_v35, %v7547_v0  ;;  %v1964_v28 = vpop.f32.mrb[171].mxu0 }
 0x235   :  { %v10084_v4 = vpack.c.bf16 %v2562_v25, %v2561_v26  ;;  %v1965_v5 = vadd.f32 %v9653_v35, %v1964_v28 }
 0x236   :  { %v2564_v61 = vmax.f32 %v1970_v1, 0.0 }
 0x237   :  { %v2563_v7 = vmax.f32 %v1965_v5, 0.0  ;;  %v7550_v2 = vpop.f32.mrb[172].mxu0 }
 0x238   :  { %v1980_v36 = vadd.f32 %v10090_v34, %v7550_v2  ;;  %v1974_v10 = vpop.f32.mrb[173].mxu0 }
 0x239   :  { %v10093_v11 = vpack.c.bf16 %v2564_v61, %v2563_v7  ;;  %v1975_v14 = vadd.f32 %v10090_v34, %v1974_v10  ;;  %v6852_v10 = vpop.f32.mrb[0].mxu1 }
 0x23a   :  { %v2566_v6 = vmax.f32 %v1980_v36, 0.0 }
 0x23b   :  { %v2565_v15 = vmax.f32 %v1975_v14, 0.0  ;;  %v7553_v18 = vpop.f32.mrb[174].mxu0 }
 0x23c   :  { %v1990_v35 = vadd.f32 %v10090_v34, %v7553_v18  ;;  %v1984_v13 = vpop.f32.mrb[175].mxu0 }
 0x23d   :  { %v10097_v47 = vpack.c.bf16 %v2566_v6, %v2565_v15  ;;  %v1985_v12 = vadd.f32 %v10090_v34, %v1984_v13  ;;  %v6853_v15 = vpop.f32.mrb[1].mxu1 }
 0x23e   :  { %v2568_v20 = vmax.f32 %v1990_v35, 0.0  ;;  %v6887_v35 = vpop.f32.mrb[2].mxu1 }
 0x23f   :  { %v2567_v22 = vmax.f32 %v1985_v12, 0.0  ;;  %v7556_v23 = vpop.f32.mrb[176].mxu0  ;;  %v6888_v12 = vpop.f32.mrb[3].mxu1 }
 0x240   :  { %v2000_v21 = vadd.f32 %v10090_v34, %v7556_v23  ;;  %v1994_v24 = vpop.f32.mrb[177].mxu0  ;;  %v6854_v23 = vadd.f32 %v6853_v15, %v6852_v10 }
 0x241   :  { %v10101_v17 = vpack.c.bf16 %v2568_v20, %v2567_v22  ;;  %v1995_v27 = vadd.f32 %v10090_v34, %v1994_v24 }
 0x242   :  { %v2570_v56 = vmax.f32 %v2000_v21, 0.0  ;;  %v6889_v21 = vadd.f32 %v6888_v12, %v6887_v35 }
 0x243   :  { %v2569_v58 = vmax.f32 %v1995_v27, 0.0  ;;  %v7559_v29 = vpop.f32.mrb[178].mxu0  ;;  %v2660_v27 = vadd.s32 1280, %v9075_v38 }
 0x244   :  { %v2010_v30 = vadd.f32 %v10090_v34, %v7559_v29  ;;  %v2004_v31 = vpop.f32.mrb[179].mxu0  ;;  %v10126_v29 = vadd.f32 %v6889_v21, %v6854_v23 }
 0x245   :  { %v8227_v32 = vpack.c.bf16 %v2570_v56, %v2569_v58  ;;  %v2005_v63 = vadd.f32 %v10090_v34, %v2004_v31  ;;  %v2663_v58 = vadd.s32 1664, %v9075_v38  ;;  %vm2679_vm4 = vcmp.ge.s32.totalorder %v2660_v27, %v9081_v42 }
 0x246   :  { %v2572_v33 = vmax.f32 %v2010_v30, 0.0  ;;  %vm2697_vm5 = vcmp.lt.s32.totalorder %v2660_v27, %v9083_v43 }
 0x247   :  { %v2571_v57 = vmax.f32 %v2005_v63, 0.0  ;;  %v7562_v37 = vpop.f32.mrb[180].mxu0  ;;  %8228 = vmatprep.subr.bf16.mxu1 %v8227_v32  ;;  %vm2682_vm6 = vcmp.ge.s32.totalorder %v2663_v58, %v9081_v42  ;;  %vm2700_vm7 = vcmp.lt.s32.totalorder %v2663_v58, %v9083_v43  ;;  %vm2713_vm8 = vmand %vm2679_vm4, %vm2697_vm5  ;;  %vm8661_vm4 = vmmov 0  }
 0x248   :  { %v2020_v3 = vadd.f32 %v10090_v34, %v7562_v37  ;;  %v2014_v39 = vpop.f32.mrb[181].mxu0  ;;  %8230 = vmatpush3.bf16.msra.mxu1 %v10066_v41  ;;  %vm2716_vm9 = vmand %vm2682_vm6, %vm2700_vm7  ;;  %vm3301_vm5 = vcmask 64512   ;;  %vm3389_vm7 = vcmask 523264  }
 0x249   :  { %v8231_v9 = vpack.c.bf16 %v2572_v33, %v2571_v57  ;;  %v2015_v8 = vadd.f32 %v10090_v34, %v2014_v39 }
 0x24a   :  { %v2574_v53 = vmax.f32 %v2020_v3, 0.0 }
 0x24b   :  { %v2573_v45 = vmax.f32 %v2015_v8, 0.0  ;;  %v7565_v49 = vpop.f32.mrb[182].mxu0  ;;  %8232 = vmatprep.subr.bf16.mxu1 %v8231_v9 }
 0x24c   :  { %v2030_v50 = vadd.f32 %v10090_v34, %v7565_v49  ;;  %v2024_v40 = vpop.f32.mrb[183].mxu0  ;;  %8234 = vmatpush3.bf16.msra.mxu1 %v10072_v44 }
 0x24d   :  { %v8235_v52 = vpack.c.bf16 %v2574_v53, %v2573_v45  ;;  %v2025_v54 = vadd.f32 %v10090_v34, %v2024_v40 }
 0x24e   :  { %v2576_v19 = vmax.f32 %v2030_v50, 0.0 }
 0x24f   :  { %v2575_v55 = vmax.f32 %v2025_v54, 0.0  ;;  %v7568_v59 = vpop.f32.mrb[184].mxu0  ;;  %8236 = vmatprep.subr.bf16.mxu1 %v8235_v52 }
 0x250   :  { %v2040_v41 = vadd.f32 %v10090_v34, %v7568_v59  ;;  %v2034_v60 = vpop.f32.mrb[185].mxu0  ;;  %8238 = vmatpush3.bf16.msra.mxu1 %v10076_v16 }
 0x251   :  { %v8239_v48 = vpack.c.bf16 %v2576_v19, %v2575_v55  ;;  %v2035_v62 = vadd.f32 %v10090_v34, %v2034_v60 }
 0x252   :  { %v2578_v25 = vmax.f32 %v2040_v41, 0.0 }
 0x253   :  { %v2577_v26 = vmax.f32 %v2035_v62, 0.0  ;;  %v7571_v0 = vpop.f32.mrb[186].mxu0  ;;  %8240 = vmatprep.subr.bf16.mxu1 %v8239_v48 }
 0x254   :  { %v2050_v44 = vadd.f32 %v10090_v34, %v7571_v0  ;;  %v2044_v1 = vpop.f32.mrb[187].mxu0  ;;  %8242 = vmatpush3.bf16.msra.mxu1 %v10080_v51 }
 0x255   :  { %v8243_v28 = vpack.c.bf16 %v2578_v25, %v2577_v26  ;;  %v2045_v5 = vadd.f32 %v10090_v34, %v2044_v1 }
 0x256   :  { %v2580_v61 = vmax.f32 %v2050_v44, 0.0 }
 0x257   :  { %v2579_v7 = vmax.f32 %v2045_v5, 0.0  ;;  %v7574_v2 = vpop.f32.mrb[188].mxu0  ;;  %8244 = vmatprep.subr.bf16.mxu1 %v8243_v28 }
 0x258   :  { %v2060_v16 = vadd.f32 %v10090_v34, %v7574_v2  ;;  %v2054_v36 = vpop.f32.mrb[189].mxu0  ;;  %8246 = vmatpush3.bf16.msra.mxu1 %v10084_v4 }
 0x259   :  { %v8247_v14 = vpack.c.bf16 %v2580_v61, %v2579_v7  ;;  %v2055_v6 = vadd.f32 %v10090_v34, %v2054_v36 }
 0x25a   :  { %v2582_v18 = vmax.f32 %v2060_v16, 0.0 }
 0x25b   :  { %v2581_v51 = vmax.f32 %v2055_v6, 0.0  ;;  %v7577_v13 = vpop.f32.mrb[190].mxu0  ;;  %8248 = vmatprep.subr.bf16.mxu1 %v8247_v14 }
 0x25c   :  { %v2070_v20 = vadd.f32 %v10090_v34, %v7577_v13  ;;  %v2064_v22 = vpop.f32.mrb[191].mxu0  ;;  %8250 = vmatpush3.bf16.msra.mxu1 %v10093_v11 }
 0x25d   :  { %v8251_v24 = vpack.c.bf16 %v2582_v18, %v2581_v51  ;;  %v2065_v4 = vadd.f32 %v10090_v34, %v2064_v22 }
 0x25e   :  { %v2584_v56 = vmax.f32 %v2070_v20, 0.0 }
 0x25f   :  { %v2583_v30 = vmax.f32 %v2065_v4, 0.0  ;;  %v7580_v31 = vpop.f32.mrb[192].mxu0  ;;  %8252 = vmatprep.subr.bf16.mxu1 %v8251_v24 }
 0x260   :  { %v2080_v32 = vadd.f32 %v10090_v34, %v7580_v31  ;;  %v2074_v63 = vpop.f32.mrb[193].mxu0  ;;  %8254 = vmatpush3.bf16.msra.mxu1 %v10097_v47 }
 0x261   :  { %v8255_v11 = vpack.c.bf16 %v2584_v56, %v2583_v30  ;;  %v2075_v33 = vadd.f32 %v10090_v34, %v2074_v63 }
 0x262   :  { %v2586_v57 = vmax.f32 %v2080_v32, 0.0 }
 0x263   :  { %v2585_v37 = vmax.f32 %v2075_v33, 0.0  ;;  %v7583_v3 = vpop.f32.mrb[194].mxu0  ;;  %8256 = vmatprep.subr.bf16.mxu1 %v8255_v11 }
 0x264   :  { %v2090_v39 = vadd.f32 %v10090_v34, %v7583_v3  ;;  %v2084_v9 = vpop.f32.mrb[195].mxu0  ;;  %8258 = vmatpush3.bf16.msra.mxu1 %v10101_v17 }
 0x265   :  { %v10137_v47 = vpack.c.bf16 %v2586_v57, %v2585_v37  ;;  %v2085_v8 = vadd.f32 %v10090_v34, %v2084_v9 }
 0x266   :  { %v2588_v53 = vmax.f32 %v2090_v39, 0.0 }
 0x267   :  { %v2587_v45 = vmax.f32 %v2085_v8, 0.0  ;;  %v7586_v49 = vpop.f32.mrb[196].mxu0  ;;  %6498 = vmatmul.mubr.msk.f32.vlgmr.msra.gmra.mrb[10].mxu1 %vm2713_vm8, %v8659_v46 }
 0x268   :  { %v2100_v50 = vadd.f32 %v10090_v34, %v7586_v49  ;;  %v2094_v40 = vpop.f32.mrb[197].mxu0  ;;  %6499 = vmatprep.mubr.msk.f32.mxu1 %vm2716_vm9, %v8659_v46 }
 0x269   :  { %v10143_v52 = vpack.c.bf16 %v2588_v53, %v2587_v45  ;;  %v2095_v17 = vadd.f32 %v10090_v34, %v2094_v40 }
 0x26a   :  { %v2590_v54 = vmax.f32 %v2100_v50, 0.0 }
 0x26b   :  { %v2589_v19 = vmax.f32 %v2095_v17, 0.0  ;;  %v7589_v55 = vpop.f32.mrb[198].mxu0 }
 0x26c   :  { %v2110_v59 = vadd.f32 %v10090_v34, %v7589_v55  ;;  %v2104_v41 = vpop.f32.mrb[199].mxu0 }
 0x26d   :  { %v10147_v60 = vpack.c.bf16 %v2590_v54, %v2589_v19  ;;  %v2105_v48 = vadd.f32 %v10090_v34, %v2104_v41 }
 0x26e   :  { %v2592_v62 = vmax.f32 %v2110_v59, 0.0 }
 0x26f   :  { %v2591_v25 = vmax.f32 %v2105_v48, 0.0  ;;  %v7592_v26 = vpop.f32.mrb[200].mxu0 }
 0x270   :  { %v2120_v0 = vadd.f32 %v10090_v34, %v7592_v26  ;;  %v2114_v44 = vpop.f32.mrb[201].mxu0 }
 0x271   :  { %v10151_v1 = vpack.c.bf16 %v2592_v62, %v2591_v25  ;;  %v2115_v28 = vadd.f32 %v10090_v34, %v2114_v44 }
 0x272   :  { %v2594_v5 = vmax.f32 %v2120_v0, 0.0 }
 0x273   :  { %v2593_v61 = vmax.f32 %v2115_v28, 0.0  ;;  %v7595_v7 = vpop.f32.mrb[202].mxu0 }
 0x274   :  { %v2130_v2 = vadd.f32 %v10090_v34, %v7595_v7  ;;  %v2124_v16 = vpop.f32.mrb[203].mxu0 }
 0x275   :  { %v10155_v36 = vpack.c.bf16 %v2594_v5, %v2593_v61  ;;  %v2125_v10 = vadd.f32 %v10090_v34, %v2124_v16 }
 0x276   :  { %v2596_v14 = vmax.f32 %v2130_v2, 0.0 }
 0x277   :  { %v2595_v6 = vmax.f32 %v2125_v10, 0.0  ;;  %v7598_v15 = vpop.f32.mrb[204].mxu0 }
 0x278   :  { %v2140_v18 = vadd.f32 %v10090_v34, %v7598_v15  ;;  %v2134_v35 = vpop.f32.mrb[205].mxu0 }
 0x279   :  { %v10159_v51 = vpack.c.bf16 %v2596_v14, %v2595_v6  ;;  %v2135_v13 = vadd.f32 %v10090_v34, %v2134_v35 }
 0x27a   :  { %v2598_v12 = vmax.f32 %v2140_v18, 0.0  ;;  %v6922_v20 = vpop.f32.mrb[4].mxu1 }
 0x27b   :  { %v2597_v22 = vmax.f32 %v2135_v13, 0.0  ;;  %v7601_v23 = vpop.f32.mrb[206].mxu0  ;;  %v6923_v21 = vpop.f32.mrb[5].mxu1 }
 0x27c   :  { %v2150_v24 = vadd.f32 %v10090_v34, %v7601_v23  ;;  %v2144_v4 = vpop.f32.mrb[207].mxu0  ;;  %v6924_v27 = vadd.f32 %v6923_v21, %v6922_v20 }
 0x27d   :  { %v10163_v56 = vpack.c.bf16 %v2598_v12, %v2597_v22  ;;  %v2145_v58 = vadd.f32 %v10090_v34, %v2144_v4 }
 0x27e   :  { %v2600_v30 = vmax.f32 %v2150_v24, 0.0  ;;  %v10167_v31 = vadd.f32 %v6924_v27, %v10126_v29 }
 0x27f   :  { %v2599_v32 = vmax.f32 %v2145_v58, 0.0  ;;  %v7604_v63 = vpop.f32.mrb[208].mxu0 }
 0x280   :  { %v2160_v11 = vadd.f32 %v10090_v34, %v7604_v63  ;;  %v2154_v33 = vpop.f32.mrb[209].mxu0 }
 0x281   :  { %v10170_v57 = vpack.c.bf16 %v2600_v30, %v2599_v32  ;;  %v2155_v37 = vadd.f32 %v10090_v34, %v2154_v33  ;;  %v2662_v32 = vadd.s32 1536, %v9075_v38 }
 0x282   :  { %v2602_v3 = vmax.f32 %v2160_v11, 0.0 }
 0x283   :  { %v2601_v39 = vmax.f32 %v2155_v37, 0.0  ;;  %v7607_v9 = vpop.f32.mrb[210].mxu0  ;;  %vm2681_vm10 = vcmp.ge.s32.totalorder %v2662_v32, %v9081_v42  ;;  %vm2699_vm11 = vcmp.lt.s32.totalorder %v2662_v32, %v9083_v43 }
 0x284   :  { %v2170_v8 = vadd.f32 %v10090_v34, %v7607_v9  ;;  %v2164_v53 = vpop.f32.mrb[211].mxu0  ;;  %vm2715_vm14 = vmand %vm2681_vm10, %vm2699_vm11 }
 0x285   :  { %v8259_v45 = vpack.c.bf16 %v2602_v3, %v2601_v39  ;;  %v2165_v49 = vadd.f32 %v10090_v34, %v2164_v53 }
 0x286   :  { %v2604_v29 = vmax.f32 %v2170_v8, 0.0 }
 0x287   :  { %v2603_v50 = vmax.f32 %v2165_v49, 0.0  ;;  %v7610_v40 = vpop.f32.mrb[212].mxu0  ;;  %8260 = vmatprep.subr.bf16.mxu1 %v8259_v45 }
 0x288   :  { %v2180_v17 = vadd.f32 %v10090_v34, %v7610_v40  ;;  %v2174_v54 = vpop.f32.mrb[213].mxu0  ;;  %8262 = vmatpush3.bf16.msra.mxu1 %v10137_v47 }
 0x289   :  { %v8263_v19 = vpack.c.bf16 %v2604_v29, %v2603_v50  ;;  %v2175_v55 = vadd.f32 %v10090_v34, %v2174_v54 }
 0x28a   :  { %v2606_v59 = vmax.f32 %v2180_v17, 0.0 }
 0x28b   :  { %v2605_v41 = vmax.f32 %v2175_v55, 0.0  ;;  %v7613_v48 = vpop.f32.mrb[214].mxu0  ;;  %8264 = vmatprep.subr.bf16.mxu1 %v8263_v19 }
 0x28c   :  { %v2190_v62 = vadd.f32 %v10090_v34, %v7613_v48  ;;  %v2184_v25 = vpop.f32.mrb[215].mxu0  ;;  %8266 = vmatpush3.bf16.msra.mxu1 %v10143_v52 }
 0x28d   :  { %v8267_v26 = vpack.c.bf16 %v2606_v59, %v2605_v41  ;;  %v2185_v0 = vadd.f32 %v10090_v34, %v2184_v25 }
 0x28e   :  { %v2608_v44 = vmax.f32 %v2190_v62, 0.0 }
 0x28f   :  { %v2607_v28 = vmax.f32 %v2185_v0, 0.0  ;;  %v7616_v5 = vpop.f32.mrb[216].mxu0  ;;  %8268 = vmatprep.subr.bf16.mxu1 %v8267_v26 }
 0x290   :  { %v2200_v47 = vadd.f32 %v10090_v34, %v7616_v5  ;;  %v2194_v61 = vpop.f32.mrb[217].mxu0  ;;  %8270 = vmatpush3.bf16.msra.mxu1 %v10147_v60 }
 0x291   :  { %v8271_v7 = vpack.c.bf16 %v2608_v44, %v2607_v28  ;;  %v2195_v2 = vadd.f32 %v10090_v34, %v2194_v61 }
 0x292   :  { %v2610_v16 = vmax.f32 %v2200_v47, 0.0 }
 0x293   :  { %v2609_v10 = vmax.f32 %v2195_v2, 0.0  ;;  %v7619_v14 = vpop.f32.mrb[218].mxu0  ;;  %8272 = vmatprep.subr.bf16.mxu1 %v8271_v7 }
 0x294   :  { %v2210_v52 = vadd.f32 %v10090_v34, %v7619_v14  ;;  %v2204_v6 = vpop.f32.mrb[219].mxu0  ;;  %8274 = vmatpush3.bf16.msra.mxu1 %v10151_v1 }
 0x295   :  { %v8275_v15 = vpack.c.bf16 %v2610_v16, %v2609_v10  ;;  %v2205_v18 = vadd.f32 %v10090_v34, %v2204_v6 }
 0x296   :  { %v2612_v35 = vmax.f32 %v2210_v52, 0.0 }
 0x297   :  { %v2611_v13 = vmax.f32 %v2205_v18, 0.0  ;;  %v7622_v12 = vpop.f32.mrb[220].mxu0  ;;  %8276 = vmatprep.subr.bf16.mxu1 %v8275_v15 }
 0x298   :  { %v2220_v60 = vadd.f32 %v10090_v34, %v7622_v12  ;;  %v2214_v20 = vpop.f32.mrb[221].mxu0  ;;  %8278 = vmatpush3.bf16.msra.mxu1 %v10155_v36  ;;  %v2665_v36 = vadd.s32 1920, %v9075_v38 }
 0x299   :  { %v8279_v22 = vpack.c.bf16 %v2612_v35, %v2611_v13  ;;  %v2215_v23 = vadd.f32 %v10090_v34, %v2214_v20 }
 0x29a   :  { %v2614_v21 = vmax.f32 %v2220_v60, 0.0  ;;  %vm2684_vm12 = vcmp.ge.s32.totalorder %v2665_v36, %v9081_v42  ;;  %vm2702_vm13 = vcmp.lt.s32.totalorder %v2665_v36, %v9083_v43 }
 0x29b   :  { %v2613_v24 = vmax.f32 %v2215_v23, 0.0  ;;  %v7625_v4 = vpop.f32.mrb[222].mxu0  ;;  %8280 = vmatprep.subr.bf16.mxu1 %v8279_v22  ;;  %vm2718_vm15 = vmand %vm2684_vm12, %vm2702_vm13 }
 0x29c   :  { %v2230_v1 = vadd.f32 %v10090_v34, %v7625_v4  ;;  %v2224_v27 = vpop.f32.mrb[223].mxu0  ;;  %8282 = vmatpush3.bf16.msra.mxu1 %v10159_v51 }
 0x29d   :  { %v8283_v58 = vpack.c.bf16 %v2614_v21, %v2613_v24  ;;  %v2225_v30 = vadd.f32 %v10090_v34, %v2224_v27 }
 0x29e   :  { %v2616_v63 = vmax.f32 %v2230_v1, 0.0 }
 0x29f   :  { %v2615_v11 = vmax.f32 %v2225_v30, 0.0  ;;  %v7628_v33 = vpop.f32.mrb[224].mxu0  ;;  %8284 = vmatprep.subr.bf16.mxu1 %v8283_v58 }
 0x2a0   :  { %v2240_v37 = vadd.f32 %v10090_v34, %v7628_v33  ;;  %v2234_v3 = vpop.f32.mrb[225].mxu0  ;;  %8286 = vmatpush3.bf16.msra.mxu1 %v10163_v56 }
 0x2a1   :  { %v8287_v39 = vpack.c.bf16 %v2616_v63, %v2615_v11  ;;  %v2235_v9 = vadd.f32 %v10090_v34, %v2234_v3 }
 0x2a2   :  { %v2618_v51 = vmax.f32 %v2240_v37, 0.0 }
 0x2a3   :  { %v2617_v8 = vmax.f32 %v2235_v9, 0.0  ;;  %v7631_v53 = vpop.f32.mrb[226].mxu0  ;;  %8288 = vmatprep.subr.bf16.mxu1 %v8287_v39 }
 0x2a4   :  { %v2250_v45 = vadd.f32 %v10090_v34, %v7631_v53  ;;  %v2244_v49 = vpop.f32.mrb[227].mxu0  ;;  %8290 = vmatpush3.bf16.msra.mxu1 %v10170_v57 }
 0x2a5   :  { %v10204_v56 = vpack.c.bf16 %v2618_v51, %v2617_v8  ;;  %v2245_v29 = vadd.f32 %v10090_v34, %v2244_v49 }
 0x2a6   :  { %v2620_v50 = vmax.f32 %v2250_v45, 0.0 }
 0x2a7   :  { %v2619_v40 = vmax.f32 %v2245_v29, 0.0  ;;  %v7634_v17 = vpop.f32.mrb[228].mxu0  ;;  %6500 = vmatmul.mubr.msk.f32.vlgmr.msra.gmra.mrb[12].mxu1 %vm2715_vm14, %v8659_v46 }
 0x2a8   :  { %v2260_v54 = vadd.f32 %v10090_v34, %v7634_v17  ;;  %v2254_v19 = vpop.f32.mrb[229].mxu0  ;;  %6501 = vmatprep.mubr.msk.f32.mxu1 %vm2718_vm15, %v8659_v46  ;;  %vm3682_vm15 = vcmask 130048  }
 0x2a9   :  { %v10210_v55 = vpack.c.bf16 %v2620_v50, %v2619_v40  ;;  %v2255_v57 = vadd.f32 %v10090_v34, %v2254_v19 }
 0x2aa   :  { %v2622_v59 = vmax.f32 %v2260_v54, 0.0 }
 0x2ab   :  { %v2621_v41 = vmax.f32 %v2255_v57, 0.0  ;;  %v7637_v48 = vpop.f32.mrb[230].mxu0 }
 0x2ac   :  { %v2270_v62 = vadd.f32 %v10090_v34, %v7637_v48  ;;  %v2264_v25 = vpop.f32.mrb[231].mxu0 }
 0x2ad   :  { %v10214_v26 = vpack.c.bf16 %v2622_v59, %v2621_v41  ;;  %v2265_v0 = vadd.f32 %v10090_v34, %v2264_v25 }
 0x2ae   :  { %v2624_v44 = vmax.f32 %v2270_v62, 0.0 }
 0x2af   :  { %v2623_v28 = vmax.f32 %v2265_v0, 0.0  ;;  %v7640_v5 = vpop.f32.mrb[232].mxu0 }
 0x2b0   :  { %v2280_v47 = vadd.f32 %v10090_v34, %v7640_v5  ;;  %v2274_v61 = vpop.f32.mrb[233].mxu0 }
 0x2b1   :  { %v10218_v7 = vpack.c.bf16 %v2624_v44, %v2623_v28  ;;  %v2275_v2 = vadd.f32 %v10090_v34, %v2274_v61 }
 0x2b2   :  { %v2626_v16 = vmax.f32 %v2280_v47, 0.0 }
 0x2b3   :  { %v2625_v10 = vmax.f32 %v2275_v2, 0.0  ;;  %v7643_v14 = vpop.f32.mrb[234].mxu0 }
 0x2b4   :  { %v2290_v52 = vadd.f32 %v10090_v34, %v7643_v14  ;;  %v2284_v6 = vpop.f32.mrb[235].mxu0 }
 0x2b5   :  { %v10222_v15 = vpack.c.bf16 %v2626_v16, %v2625_v10  ;;  %v2285_v18 = vadd.f32 %v10090_v34, %v2284_v6 }
 0x2b6   :  { %v2628_v35 = vmax.f32 %v2290_v52, 0.0 }
 0x2b7   :  { %v2627_v13 = vmax.f32 %v2285_v18, 0.0  ;;  %v7646_v12 = vpop.f32.mrb[236].mxu0 }
 0x2b8   :  { %v2300_v60 = vadd.f32 %v10090_v34, %v7646_v12  ;;  %v2294_v20 = vpop.f32.mrb[237].mxu0 }
 0x2b9   :  { %v10226_v22 = vpack.c.bf16 %v2628_v35, %v2627_v13  ;;  %v2295_v23 = vadd.f32 %v10090_v34, %v2294_v20 }
 0x2ba   :  { %v2630_v21 = vmax.f32 %v2300_v60, 0.0  ;;  %v6957_v24 = vpop.f32.mrb[6].mxu1 }
 0x2bb   :  { %v2629_v4 = vmax.f32 %v2295_v23, 0.0  ;;  %v7649_v1 = vpop.f32.mrb[238].mxu0  ;;  %v6958_v27 = vpop.f32.mrb[7].mxu1 }
 0x2bc   :  { %v2310_v58 = vadd.f32 %v10090_v34, %v7649_v1  ;;  %v2304_v30 = vpop.f32.mrb[239].mxu0  ;;  %v6959_v32 = vadd.f32 %v6958_v27, %v6957_v24 }
 0x2bd   :  { %v10230_v63 = vpack.c.bf16 %v2630_v21, %v2629_v4  ;;  %v2305_v36 = vadd.f32 %v10090_v34, %v2304_v30 }
 0x2be   :  { %v2632_v11 = vmax.f32 %v2310_v58, 0.0  ;;  %v10234_v33 = vadd.f32 %v6959_v32, %v10167_v31 }
 0x2bf   :  { %v2631_v37 = vmax.f32 %v2305_v36, 0.0  ;;  %v7652_v3 = vpop.f32.mrb[240].mxu0 }
 0x2c0   :  { %v2320_v39 = vadd.f32 %v10090_v34, %v7652_v3  ;;  %v2314_v9 = vpop.f32.mrb[241].mxu0 }
 0x2c1   :  { %v10237_v51 = vpack.c.bf16 %v2632_v11, %v2631_v37  ;;  %v2315_v8 = vadd.f32 %v10090_v34, %v2314_v9  ;;  %v2664_v37 = vadd.s32 1792, %v9075_v38 }
 0x2c2   :  { %v2634_v53 = vmax.f32 %v2320_v39, 0.0 }
 0x2c3   :  { %v2633_v45 = vmax.f32 %v2315_v8, 0.0  ;;  %v7655_v49 = vpop.f32.mrb[242].mxu0  ;;  %vm2683_vm1 = vcmp.ge.s32.totalorder %v2664_v37, %v9081_v42  ;;  %vm2701_vm2 = vcmp.lt.s32.totalorder %v2664_v37, %v9083_v43  ;;  %v3295_v42 = vld [vmem:[%s10886_s2 + $0x28] sm:$0xff]  ;;  %v8662_v43 = vmov 0  }
 0x2c4   :  { %v2330_v29 = vadd.f32 %v10090_v34, %v7655_v49  ;;  %v2324_v50 = vpop.f32.mrb[243].mxu0  ;;  %vm2717_vm3 = vmand %vm2683_vm1, %vm2701_vm2  ;;  %8565 = vset.pattern.permute.xlu0 %v8662_v43  ;;  %8566 = vset.pattern.permute.xlu1 %v8662_v43  ;;  %vm3671_vm1 = vcmp.ge.s32.totalorder %v9075_v38, 64  ;;  %vm3672_vm2 = vcmp.lt.s32.totalorder %v9075_v38, 96 }
 0x2c5   :  { %v8291_v40 = vpack.c.bf16 %v2634_v53, %v2633_v45  ;;  %v2325_v17 = vadd.f32 %v10090_v34, %v2324_v50  ;;  %v3473_v50 = vld [vmem:[%s10888_s1 + $0x18] sm:$0xff] }
 0x2c6   :  { %v2636_v31 = vmax.f32 %v2330_v29, 0.0  ;;  %v8660_v29 = vmov 0.0  }
 0x2c7   :  { %v2635_v54 = vmax.f32 %v2325_v17, 0.0  ;;  %v7658_v19 = vpop.f32.mrb[244].mxu0  ;;  %8292 = vmatprep.subr.bf16.mxu1 %v8291_v40  ;;  %8038 = vmatprep.mubr.msk.f32.mxu0 %vm8661_vm4, %v8660_v29  ;;  %v8663_v40 = vmov 0.0|0.0   ;;  %v3474_v17 = vld [vmem:[%s10888_s1 + $0x20] sm:$0xff] }
 0x2c8   :  { %v2340_v57 = vadd.f32 %v10090_v34, %v7658_v19  ;;  %v2334_v59 = vpop.f32.mrb[245].mxu0  ;;  %8294 = vmatpush3.bf16.msra.mxu1 %v10204_v56  ;;  %8499 = vmatprep.subr.bf16.mxu0 %v8663_v40  ;;  %v3477_v19 = vld [vmem:[%s10888_s1 + $0x38] sm:$0xff] }
 0x2c9   :  { %v8295_v41 = vpack.c.bf16 %v2636_v31, %v2635_v54  ;;  %v2335_v48 = vadd.f32 %v10090_v34, %v2334_v59  ;;  %v3475_v31 = vld [vmem:[%s10888_s1 + $0x28] sm:$0xff]  ;;  %v3476_v54 = vld [vmem:[%s10888_s1 + $0x30] sm:$0xff] }
 0x2ca   :  { %v2638_v62 = vmax.f32 %v2340_v57, 0.0 }
 0x2cb   :  { %v2637_v25 = vmax.f32 %v2335_v48, 0.0  ;;  %v7661_v0 = vpop.f32.mrb[246].mxu0  ;;  %8296 = vmatprep.subr.bf16.mxu1 %v8295_v41 }
 0x2cc   :  { %v2350_v44 = vadd.f32 %v10090_v34, %v7661_v0  ;;  %v2344_v28 = vpop.f32.mrb[247].mxu0  ;;  %8298 = vmatpush3.bf16.msra.mxu1 %v10210_v55  ;;  %v3377_v0 = vld [vmem:[%s10886_s2 + $0x40] sm:$0xff] }
 0x2cd   :  { %v8299_v5 = vpack.c.bf16 %v2638_v62, %v2637_v25  ;;  %v2345_v47 = vadd.f32 %v10090_v34, %v2344_v28  ;;  %v3376_v25 = vld [vmem:[%s10886_s2 + $0x38] sm:$0xff] }
 0x2ce   :  { %v2640_v61 = vmax.f32 %v2350_v44, 0.0 }
 0x2cf   :  { %v2639_v2 = vmax.f32 %v2345_v47, 0.0  ;;  %v7664_v16 = vpop.f32.mrb[248].mxu0  ;;  %8300 = vmatprep.subr.bf16.mxu1 %v8299_v5  ;;  %v8324_v5 = vpack.c.bf16 %v3377_v0, %v3376_v25 }
 0x2d0   :  { %v2360_v56 = vadd.f32 %v10090_v34, %v7664_v16  ;;  %v2354_v10 = vpop.f32.mrb[249].mxu0  ;;  %8302 = vmatpush3.bf16.msra.mxu1 %v10214_v26 }
 0x2d1   :  { %v8303_v14 = vpack.c.bf16 %v2640_v61, %v2639_v2  ;;  %v2355_v52 = vadd.f32 %v10090_v34, %v2354_v10  ;;  %v3378_v61 = vld [vmem:[%s10886_s2 + $0x48] sm:$0xff]  ;;  %v3379_v2 = vld [vmem:[%s10886_s2 + $0x50] sm:$0xff]  ;;  %v3381_v10 = vld [vmem:[%s10886_s2 + $0x60] sm:$0xff] }
 0x2d2   :  { %v2642_v6 = vmax.f32 %v2360_v56, 0.0  ;;  %v8327_v16 = vpack.c.bf16 %v3379_v2, %v3378_v61  ;;  %v3380_v56 = vld [vmem:[%s10886_s2 + $0x58] sm:$0xff] }
 0x2d3   :  { %v2641_v18 = vmax.f32 %v2355_v52, 0.0  ;;  %v7667_v35 = vpop.f32.mrb[250].mxu0  ;;  %8304 = vmatprep.subr.bf16.mxu1 %v8303_v14  ;;  %v8330_v14 = vpack.c.bf16 %v3381_v10, %v3380_v56  ;;  %v3382_v52 = vld [vmem:[%s10886_s2 + $0x68] sm:$0xff] }
 0x2d4   :  { %v2370_v55 = vadd.f32 %v10090_v34, %v7667_v35  ;;  %v2364_v13 = vpop.f32.mrb[251].mxu0  ;;  %8306 = vmatpush3.bf16.msra.mxu1 %v10218_v7  ;;  %v3526_v35 = vld [vmem:[%s10886_s2 + $0x80] sm:$0xff] }
 0x2d5   :  { %v8307_v12 = vpack.c.bf16 %v2642_v6, %v2641_v18  ;;  %v2365_v60 = vadd.f32 %v10090_v34, %v2364_v13  ;;  %v3383_v6 = vld [vmem:[%s10886_s2 + $0x70] sm:$0xff] }
 0x2d6   :  { %v2644_v20 = vmax.f32 %v2370_v55, 0.0  ;;  %v8333_v18 = vpack.c.bf16 %v3383_v6, %v3382_v52  ;;  %v3527_v55 = vld [vmem:[%s10886_s2 + $0x88] sm:$0xff] }
 0x2d7   :  { %v2643_v23 = vmax.f32 %v2365_v60, 0.0  ;;  %v7670_v21 = vpop.f32.mrb[252].mxu0  ;;  %8308 = vmatprep.subr.bf16.mxu1 %v8307_v12  ;;  %v8335_v13 = vpack.c.bf16 %v3527_v55, %v3526_v35  ;;  %v6503_v12 = vld [vmem:[%s10886_s2 + $0x30] ss:$0 sm:$0xff] }
 0x2d8   :  { %v2380_v26 = vadd.f32 %v10090_v34, %v7670_v21  ;;  %v2374_v24 = vpop.f32.mrb[253].mxu0  ;;  %8310 = vmatpush3.bf16.msra.mxu1 %v10222_v15  ;;  %v3529_v21 = vld [vmem:[%s10886_s2 + $0x98] sm:$0xff] }
 0x2d9   :  { %v8311_v4 = vpack.c.bf16 %v2644_v20, %v2643_v23  ;;  %v2375_v1 = vadd.f32 %v10090_v34, %v2374_v24  ;;  %v3528_v23 = vld [vmem:[%s10886_s2 + $0x90] sm:$0xff] }
 0x2da   :  { %v2646_v27 = vmax.f32 %v2380_v26, 0.0 }
 0x2db   :  { %v2645_v58 = vmax.f32 %v2375_v1, 0.0  ;;  %v7673_v30 = vpop.f32.mrb[254].mxu0  ;;  %8312 = vmatprep.subr.bf16.mxu1 %v8311_v4 }
 0x2dc   :  { %v2390_v7 = vadd.f32 %v10090_v34, %v7673_v30  ;;  %v2384_v32 = vpop.f32.mrb[255].mxu0  ;;  %8314 = vmatpush3.bf16.msra.mxu1 %v10226_v22  ;;  %v3531_v30 = vld [vmem:[%s10886_s2 + $0xa8] sm:$0xff] }
 0x2dd   :  { %v8315_v36 = vpack.c.bf16 %v2646_v27, %v2645_v58  ;;  %v2385_v11 = vadd.f32 %v10090_v34, %v2384_v32  ;;  %v8339_v27 = vpack.c.bf16 %v3529_v21, %v3528_v23  ;;  %v3530_v58 = vld [vmem:[%s10886_s2 + $0xa0] sm:$0xff] }
 0x2de   :  { %v2648_v3 = vmax.f32 %v2390_v7, 0.0  ;;  %v8343_v7 = vpack.c.bf16 %v3531_v30, %v3530_v58  ;;  %v5978_v30 = vld [vmem:[%s10886_s2 + $0x188] sm:$0xff] }
 0x2df   :  { %v2647_v39 = vmax.f32 %v2385_v11, 0.0  ;;  %8316 = vmatprep.subr.bf16.mxu1 %v8315_v36  ;;  %v3532_v36 = vld [vmem:[%s10886_s2 + $0xb0] sm:$0xff]  ;;  %v3533_v11 = vld [vmem:[%s10886_s2 + $0xb8] sm:$0xff] }
 0x2e0   :  { %8318 = vmatpush3.bf16.msra.mxu1 %v10230_v63 }
 0x2e1   :  { %v8319_v15 = vpack.c.bf16 %v2648_v3, %v2647_v39  ;;  %v8347_v3 = vpack.c.bf16 %v3533_v11, %v3532_v36  ;;  %v8664_v36 = vmov 0.5  }
 0x2e3   :  { %8320 = vmatprep.subr.bf16.mxu1 %v8319_v15 }
 0x2e4   :  { %8322 = vmatpush3.bf16.msra.mxu1 %v10237_v51  ;;  %v3471_v51 = vld [vmem:[%s10888_s1 + $0x8] sm:$0xff] }
 0x2e5   :  { %7674 = vmatprep.subr.mxu1 %v8660_v29 }
 0x2e7   :  { %6502 = vmatmul.mubr.msk.f32.vlgmr.msra.gmra.mrb[14].mxu1 %vm2717_vm3, %v8659_v46  ;;  %v3470_v46 = vld [vmem:[%s10888_s1] sm:$0xff]  ;;  %vm10441_vm3 = vmand %vm3671_vm1, %vm3672_vm2 }
 0x2e8   :  { %7675 = vmatpush3.msra.mxu1 %v3295_v42  ;;  %7676 = vmatprep.mubr.msk.f32.mxu1 %vm8661_vm4, %v8660_v29  ;;  %v10449_v11 = vsel %vm10441_vm3, 1.0, %v8664_v36 }
 0x2e9   :  { %3479 = vperm.xlu0 %8565, %v3470_v46   ;;  %8323 = vmatprep.subr.bf16.mxu1 %v8663_v40  ;;  %v3675_v46 = vld [vmem:[%s10886_s2 + $0xc0] sm:$0xff] }
 0x2ed   :  { %3482 = vperm.xlu0 %8565, %v3471_v51  }
 0x2f1   :  { %3491 = vperm.xlu0 %8565, %v3474_v17  }
 0x2f5   :  { %3497 = vperm.xlu0 %8565, %v3476_v54  }
 0x2fa   :  { %v6992_v22 = vpop.f32.mrb[8].mxu1 }
 0x2fb   :  { %v6993_v34 = vpop.f32.mrb[9].mxu1 }
 0x2fc   :  { %v6994_v9 = vadd.f32 %v6993_v34, %v6992_v22 }
 0x2fe   :  { %v3082_v8 = vadd.f32 %v6994_v9, %v10234_v33  ;;  %v3472_v33 = vld [vmem:[%s10888_s1 + $0x10] sm:$0xff] }
 0x2ff   :  { %3485 = vperm.xlu1 %8566, %v3472_v33   ;;  %v3676_v33 = vld [vmem:[%s10886_s2 + $0xc8] sm:$0xff] }
 0x300   :  { %v8351_v51 = vpack.c.bf16 %v3676_v33, %v3675_v46  ;;  %v3818_v46 = vld [vmem:[%s10886_s2 + $0x108] sm:$0xff] }
 0x303   :  { %3488 = vperm.xlu1 %8566, %v3473_v50  }
 0x307   :  { %3494 = vperm.xlu1 %8566, %v3475_v31  }
 0x30b   :  { %3500 = vperm.xlu1 %8566, %v3477_v19  }
 0x33a   :  { %v7027_v53 = vpop.f32.mrb[10].mxu1 }
 0x33b   :  { %v7028_v45 = vpop.f32.mrb[11].mxu1 }
 0x33c   :  { %v7029_v49 = vadd.f32 %v7028_v45, %v7027_v53 }
 0x33e   :  { %v3152_v63 = vadd.f32 %v7029_v49, %v3082_v8 }
 0x368   :  { %v3480_v60 = vpop.permute.xlu0 %3479 }
 0x369   :  { %vm3502_vm6 = vcmp.eq.s32.totalorder %v9075_v38, %v3480_v60 }
 0x36a   :  { %v6507_v1 = vsel %vm3502_vm6, 1.0, %v8660_v29 }
 0x36c   :  { %v3483_v37 = vpop.permute.xlu0 %3482 }
 0x36d   :  { %vm3503_vm9 = vcmp.eq.s32.totalorder %v9075_v38, %v3483_v37 }
 0x36e   :  { %v6508_v34 = vsel %vm3503_vm9, 1.0, %v8660_v29 }
 0x370   :  { %v3492_v15 = vpop.permute.xlu0 %3491 }
 0x371   :  { %vm3506_vm11 = vcmp.eq.s32.totalorder %v9075_v38, %v3492_v15 }
 0x372   :  { %v6511_v45 = vsel %vm3506_vm11, 1.0, %v8660_v29 }
 0x374   :  { %v3498_v8 = vpop.permute.xlu0 %3497 }
 0x375   :  { %vm3508_vm13 = vcmp.eq.s32.totalorder %v9075_v38, %v3498_v8 }
 0x376   :  { %v6513_v42 = vsel %vm3508_vm13, 1.0, %v8660_v29 }
 0x37a   :  { %v7062_v57 = vpop.f32.mrb[12].mxu1 }
 0x37b   :  { %v7063_v59 = vpop.f32.mrb[13].mxu1 }
 0x37c   :  { %v7064_v41 = vadd.f32 %v7063_v59, %v7062_v57 }
 0x37e   :  { %v3222_v48 = vadd.f32 %v7064_v41, %v3152_v63  ;;  %v3486_v32 = vpop.permute.xlu1 %3485  ;;  %v3812_v41 = vld [vmem:[%s10886_s2 + $0xd0] sm:$0xff] }
 0x37f   :  { %vm3504_vm8 = vcmp.eq.s32.totalorder %v9075_v38, %v3486_v32 }
 0x380   :  { %v6509_v22 = vsel %vm3504_vm8, 1.0, %v8660_v29 }
 0x382   :  { %v3489_v39 = vpop.permute.xlu1 %3488 }
 0x383   :  { %vm3505_vm10 = vcmp.eq.s32.totalorder %v9075_v38, %v3489_v39 }
 0x384   :  { %v6510_v53 = vsel %vm3505_vm10, 1.0, %v8660_v29 }
 0x386   :  { %v3495_v9 = vpop.permute.xlu1 %3494 }
 0x387   :  { %vm3507_vm12 = vcmp.eq.s32.totalorder %v9075_v38, %v3495_v9 }
 0x388   :  { %v6512_v63 = vsel %vm3507_vm12, 1.0, %v8660_v29 }
 0x38a   :  { %v3501_v49 = vpop.permute.xlu1 %3500 }
 0x38b   :  { %vm3509_vm14 = vcmp.eq.s32.totalorder %v9075_v38, %v3501_v49 }
 0x38c   :  { %v6514_v43 = vsel %vm3509_vm14, 1.0, %v8660_v29 }
 0x3ba   :  { %v7097_v62 = vpop.f32.mrb[14].mxu1 }
 0x3bb   :  { %v7098_v44 = vpop.f32.mrb[15].mxu1 }
 0x3bc   :  { %v7099_v28 = vadd.f32 %v7098_v44, %v7097_v62 }
 0x3be   :  { %v3292_v47 = vadd.f32 %v7099_v28, %v3222_v48  ;;  %v3813_v48 = vld [vmem:[%s10886_s2 + $0xd8] sm:$0xff]  ;;  %v3814_v28 = vld [vmem:[%s10886_s2 + $0xe0] sm:$0xff] }
 0x3bf   :  { %v10397_v25 = vpack.c.bf16 %v3813_v48, %v3812_v41  ;;  %v3822_v48 = vld [vmem:[%s10886_s2 + $0x128] sm:$0xff] }
 0x3c0   :  { %7677 = vmatmul.mubr.msk.f32.vlgmr.msra.gmra.mrb[16].mxu1 %vm3301_vm5, %v3292_v47  ;;  %vm5967_vm5 = vcmask 785408  }
 0x3c1   :  { %8325 = vmatpush3.bf16.msra.mxu1 %v8324_v5  ;;  %7695 = vmatprep.mubr.msk.f32.mxu1 %vm8661_vm4, %v8660_v29  ;;  %v3815_v5 = vld [vmem:[%s10886_s2 + $0xe8] sm:$0xff] }
 0x3c2   :  { %8326 = vmatprep.subr.bf16.mxu1 %v8663_v40  ;;  %v10408_v2 = vpack.c.bf16 %v3815_v5, %v3814_v28  ;;  %v10521_v28 = vld [vmem:[%s10886_s2 + $0x138] ss:$0 sm:$0xff] }
 0x3c5   :  { %8328 = vmatpush3.bf16.msra.mxu1 %v8327_v16 }
 0x3c6   :  { %8329 = vmatprep.subr.bf16.mxu1 %v8663_v40 }
 0x3c9   :  { %8331 = vmatpush3.bf16.msra.mxu1 %v8330_v14 }
 0x3ca   :  { %8332 = vmatprep.subr.bf16.mxu1 %v8663_v40 }
 0x3cd   :  { %8334 = vmatpush3.bf16.msra.mxu1 %v8333_v18  ;;  %v6523_v18 = vld [vmem:[%s10886_s2 + $0xf0] ss:$0 sm:$0xff] }
 0x3ce   :  { %8336 = vmatprep.subr.bf16.mxu1 %v8335_v13 }
 0x493   :  { %v3371_v20 = vpop.f32.mrb[16].mxu1 }
 0x494   :  { %v3372_v26 = vadd.f32 %v6503_v12, %v3371_v20  ;;  %v7678_v24 = vpop.f32.mrb[17].mxu1 }
 0x496   :  { %v3375_v4 = vmax.f32 %v3372_v26, 0.0 }
 0x498   :  { %7696 = vmatmul.mubr.msk.f32.vlgmr.msra.gmra.mrb[18].mxu1 %vm3389_vm7, %v3375_v4 }
 0x499   :  { %8338 = vmatpush3.bf16.msra.mxu1 %v8335_v13  ;;  %7714 = vmatprep.mubr.msk.f32.mxu1 %vm3389_vm7, %v6507_v1 }
 0x49a   :  { %8340 = vmatprep.subr.bf16.mxu1 %v8339_v27 }
 0x49d   :  { %8342 = vmatpush3.bf16.msra.mxu1 %v8339_v27 }
 0x49e   :  { %8344 = vmatprep.subr.bf16.mxu1 %v8343_v7 }
 0x4a1   :  { %8346 = vmatpush3.bf16.msra.mxu1 %v8343_v7 }
 0x4a2   :  { %8348 = vmatprep.subr.bf16.mxu1 %v8347_v3 }
 0x4a5   :  { %8350 = vmatpush3.bf16.msra.mxu1 %v8347_v3 }
 0x4a6   :  { %8352 = vmatprep.subr.bf16.mxu1 %v8351_v51 }
 0x4a8   :  { %7715 = vmatmul.mubr.msk.f32.vlgmr.msra.gmra.mrb[20].mxu1 %vm3389_vm7, %v6508_v34 }
 0x4a9   :  { %7717 = vmatprep.mubr.msk.f32.mxu1 %vm3389_vm7, %v6509_v22  ;;  %8354 = vmatpush3.bf16.msra.mxu1 %v8351_v51  ;;  %v3819_v51 = vld [vmem:[%s10886_s2 + $0x110] sm:$0xff] }
 0x4aa   :  { %8355 = vmatprep.subr.bf16.mxu1 %v8663_v40 }
 0x4ac   :  { %7718 = vmatmul.mubr.msk.f32.gmra.mrb[22].mxu1 %vm3389_vm7, %v6510_v53 }
 0x4ad   :  { %7720 = vmatprep.mubr.msk.f32.mxu1 %vm3389_vm7, %v6511_v45 }
 0x4b0   :  { %7721 = vmatmul.mubr.msk.f32.gmra.mrb[24].mxu1 %vm3389_vm7, %v6512_v63 }
 0x4b1   :  { %7723 = vmatprep.mubr.msk.f32.mxu1 %vm3389_vm7, %v6513_v42  ;;  %v3816_v42 = vld [vmem:[%s10886_s2 + $0xf8] sm:$0xff] }
 0x4b4   :  { %7724 = vmatmul.mubr.msk.f32.gmra.mrb[26].mxu1 %vm3389_vm7, %v6514_v43  ;;  %v3817_v43 = vld [vmem:[%s10886_s2 + $0x100] sm:$0xff] }
 0x4b5   :  { %v10468_v33 = vpack.c.bf16 %v3817_v43, %v3816_v42 }
 0x56b   :  { %v10389_v50 = vpop.f32.mrb[18].mxu1 }
 0x56c   :  { %v7697_v17 = vpop.f32.mrb[19].mxu1 }
 0x56d   :  { %v10474_v17 = vpack.c.bf16 %v3819_v51, %v3818_v46 }
 0x57b   :  { %v7716_v31 = vpop.f32.mrb[20].mxu1 }
 0x57c   :  { %v3624_v54 = vpop.f32.mrb[21].mxu1 }
 0x57d   :  { %8567 = vtanh.f32 %v3624_v54 }
 0x57e   :  { %8569 = vtanh.f32 %v7716_v31 }
 0x57f   :  { %v7719_v19 = vpop.f32.mrb[22].mxu1 }
 0x580   :  { %v3634_v57 = vpop.f32.mrb[23].mxu1 }
 0x581   :  { %8571 = vtanh.f32 %v3634_v57  ;;  %v3820_v57 = vld [vmem:[%s10886_s2 + $0x118] sm:$0xff] }
 0x582   :  { %8573 = vtanh.f32 %v7719_v19 }
 0x583   :  { %v7722_v59 = vpop.f32.mrb[24].mxu1 }
 0x584   :  { %v3644_v62 = vpop.f32.mrb[25].mxu1 }
 0x585   :  { %8575 = vtanh.f32 %v3644_v62  ;;  %v3823_v62 = vld [vmem:[%s10886_s2 + $0x130] sm:$0xff] }
 0x586   :  { %8577 = vtanh.f32 %v7722_v59  ;;  %v3821_v59 = vld [vmem:[%s10886_s2 + $0x120] sm:$0xff] }
 0x587   :  { %v8568_v0 = vpop.eup %8567  ;;  %v7725_v44 = vpop.f32.mrb[26].mxu1  ;;  %v10487_v41 = vpack.c.bf16 %v3821_v59, %v3820_v57 }
 0x588   :  { %v8570_v47 = vpop.eup %8569  ;;  %v3654_v61 = vpop.f32.mrb[27].mxu1  ;;  %7730 = vmatprep.mubr.msk.f32.mxu1 %vm3682_vm15, %v8568_v0 }
 0x589   :  { %8579 = vtanh.f32 %v3654_v61  ;;  %7731 = vmatmul.mubr.msk.f32.vlgmr.msra.gmra.mrb[28].mxu1 %vm3682_vm15, %v8570_v47 }
 0x58a   :  { %8581 = vtanh.f32 %v7725_v44  ;;  %8357 = vmatpush3.bf16.msra.mxu1 %v10397_v25  ;;  %v10497_v44 = vpack.c.bf16 %v3823_v62, %v3822_v48 }
 0x58b   :  { %v8572_v16 = vpop.eup %8571  ;;  %8358 = vmatprep.subr.bf16.mxu1 %v8663_v40 }
 0x58c   :  { %v8574_v56 = vpop.eup %8573  ;;  %7733 = vmatprep.mubr.msk.f32.mxu1 %vm3682_vm15, %v8572_v16 }
 0x58d   :  { %7734 = vmatmul.mubr.msk.f32.gmra.mrb[30].mxu1 %vm3682_vm15, %v8574_v56 }
 0x58e   :  { %8360 = vmatpush3.bf16.msra.mxu1 %v10408_v2 }
 0x58f   :  { %v8576_v10 = vpop.eup %8575  ;;  %8361 = vmatprep.subr.bf16.mxu1 %v8663_v40 }
 0x590   :  { %v8578_v14 = vpop.eup %8577  ;;  %7736 = vmatprep.mubr.msk.f32.mxu1 %vm3682_vm15, %v8576_v10 }
 0x591   :  { %7737 = vmatmul.mubr.msk.f32.gmra.mrb[32].mxu1 %vm3682_vm15, %v8578_v14 }
 0x593   :  { %v8580_v52 = vpop.eup %8579 }
 0x594   :  { %v8582_v6 = vpop.eup %8581  ;;  %7739 = vmatprep.mubr.msk.f32.mxu1 %vm3682_vm15, %v8580_v52 }
 0x595   :  { %7740 = vmatmul.mubr.msk.f32.gmra.mrb[34].mxu1 %vm3682_vm15, %v8582_v6 }
 0x596   :  { %7750 = vmatprep.mubr.msk.f32.mxu1 %vm8661_vm4, %v8660_v29 }
 0x599   :  { %7751 = vmatmul.mubr.f32.vlgmr.msra.gmra.mrb[36].mxu1 %v8660_v29 }
 0x59a   :  { %7761 = vmatprep.mubr.msk.f32.mxu1 %vm8661_vm4, %v8660_v29  ;;  %8363 = vmatpush3.bf16.msra.mxu1 %v10468_v33 }
 0x59b   :  { %8364 = vmatprep.subr.bf16.mxu1 %v8663_v40 }
 0x59e   :  { %8366 = vmatpush3.bf16.msra.mxu1 %v10474_v17 }
 0x59f   :  { %8367 = vmatprep.subr.bf16.mxu1 %v8663_v40 }
 0x65c   :  { %v7732_v35 = vpop.f32.mrb[28].mxu1 }
 0x65d   :  { %v10427_v55 = vadd.f32 %v7732_v35, %v6523_v18  ;;  %v3773_v13 = vpop.f32.mrb[29].mxu1 }
 0x65e   :  { %v3774_v32 = vadd.f32 %v6523_v18, %v3773_v13 }
 0x660   :  { %v7735_v12 = vpop.f32.mrb[30].mxu1 }
 0x661   :  { %v10429_v60 = vadd.f32 %v7735_v12, %v6523_v18  ;;  %v3783_v20 = vpop.f32.mrb[31].mxu1 }
 0x662   :  { %v10431_v23 = vadd.f32 %v6523_v18, %v3783_v20 }
 0x664   :  { %v7738_v21 = vpop.f32.mrb[32].mxu1 }
 0x665   :  { %v10433_v26 = vadd.f32 %v7738_v21, %v6523_v18  ;;  %v3793_v24 = vpop.f32.mrb[33].mxu1 }
 0x666   :  { %v10435_v4 = vadd.f32 %v6523_v18, %v3793_v24 }
 0x668   :  { %v7741_v1 = vpop.f32.mrb[34].mxu1 }
 0x669   :  { %v10439_v27 = vadd.f32 %v7741_v1, %v6523_v18  ;;  %v3803_v58 = vpop.f32.mrb[35].mxu1 }
 0x66a   :  { %v10445_v7 = vadd.f32 %v6523_v18, %v3803_v58 }
 0x66c   :  { %v3894_v37 = vpop.f32.mrb[36].mxu1 }
 0x66d   :  { %v3898_v3 = vadd.f32 %v3894_v37, %v3774_v32  ;;  %v7752_v39 = vpop.f32.mrb[37].mxu1 }
 0x66f   :  { %v3899_v38 = vmul.f32 %v3898_v3, %v10449_v11 }
 0x671   :  { %8583 = vtanh.f32 %v3899_v38 }
 0x67b   :  { %v8584_v15 = vpop.eup %8583 }
 0x67c   :  { %v3901_v22 = vmul.f32 0.5, %v8584_v15 }
 0x67e   :  { %v3902_v34 = vadd.f32 0.5, %v3901_v22 }
 0x680   :  { %v3903_v9 = vsel %vm10441_vm3, %v8584_v15, %v3902_v34 }
 0x681   :  { %3906 = vrot.lane.b32.xlu0 %v3903_v9, %s8665_s5  ;;  %v3904_v45 = vmul.f32 0.0, %v3903_v9 }
 0x6f3   :  { %v3907_v8 = vpop.permute.xlu0 %3906 }
 0x6f4   :  { %v3909_v53 = vmul.f32 %v3907_v8, %v3903_v9 }
 0x6f6   :  { %3911 = vrot.lane.b32.xlu1 %v3909_v53, %s8666_s6 }
 0x768   :  { %v3912_v49 = vpop.permute.xlu1 %3911 }
 0x769   :  { %v10456_v63 = vadd.f32 %v3912_v49, %v3904_v45 }
 0x76b   :  { %8585 = vtanh.f32 %v10456_v63 }
 0x775   :  { %v8586_v31 = vpop.eup %8585 }
 0x776   :  { %3917 = vrot.lane.b32.xlu0 %v8586_v31, %s8665_s5 }
 0x7e8   :  { %v3918_v54 = vpop.permute.xlu0 %3917 }
 0x7e9   :  { %v3920_v19 = vmul.f32 %v3918_v54, %v3903_v9 }
 0x7eb   :  { %3926 = vrot.lane.b32.xlu1 %v3920_v19, %s8666_s6 }
 0x85d   :  { %v3927_v0 = vpop.permute.xlu1 %3926 }
 0x85e   :  { %7762 = vmatmul.mubr.msk.f32.vlgmr.msra.gmra.mrb[38].mxu1 %vm279_vm0, %v3927_v0 }
 0x85f   :  { %8369 = vmatpush3.bf16.msra.mxu1 %v10487_v41  ;;  %7772 = vmatprep.mubr.msk.f32.mxu1 %vm8661_vm4, %v8660_v29 }
 0x860   :  { %8370 = vmatprep.subr.bf16.mxu1 %v8663_v40 }
 0x863   :  { %8372 = vmatpush3.bf16.msra.mxu1 %v10497_v44 }
 0x864   :  { %8373 = vmatprep.subr.bf16.mxu1 %v8663_v40 }
 0x866   :  { %7773 = vmatmul.mubr.f32.vlgmr.msra.gmra.mrb[38].mxu1 %v8660_v29 }
 0x867   :  { %8375 = vmatpush3.bf16.msra.mxu1 %v10397_v25  ;;  %7783 = vmatprep.mubr.msk.f32.mxu1 %vm8661_vm4, %v8660_v29 }
 0x868   :  { %8376 = vmatprep.subr.bf16.mxu1 %v8663_v40 }
 0x86b   :  { %8378 = vmatpush3.bf16.msra.mxu1 %v10408_v2 }
 0x86c   :  { %8379 = vmatprep.subr.bf16.mxu1 %v8663_v40 }
 0x86e   :  { %7784 = vmatmul.mubr.msk.f32.vlgmr.msra.gmra.mrb[40].mxu1 %vm279_vm0, %v3927_v0 }
 0x86f   :  { %8381 = vmatpush3.bf16.msra.mxu1 %v10468_v33  ;;  %7794 = vmatprep.mubr.msk.f32.mxu1 %vm8661_vm4, %v8660_v29 }
 0x870   :  { %8382 = vmatprep.subr.bf16.mxu1 %v8663_v40 }
 0x873   :  { %8384 = vmatpush3.bf16.msra.mxu1 %v10474_v17 }
 0x874   :  { %8385 = vmatprep.subr.bf16.mxu1 %v8663_v40 }
 0x939   :  { %v4066_v5 = vpop.f32.mrb[38].mxu1 }
 0x93a   :  { %v8532_v47 = vadd.f32 %v10521_v28, %v4066_v5  ;;  %v7774_v61 = vpop.f32.mrb[39].mxu1 }
 0x93c   :  { %v4071_v16 = vmul.f32 %v8532_v47, %v10449_v11 }
 0x93e   :  { %8587 = vtanh.f32 %v4071_v16 }
 0x941   :  { %v4159_v56 = vpop.f32.mrb[40].mxu1 }
 0x942   :  { %v4163_v10 = vadd.f32 %v4159_v56, %v10427_v55  ;;  %v7785_v14 = vpop.f32.mrb[41].mxu1 }
 0x944   :  { %v4164_v52 = vmul.f32 %v4163_v10, %v10449_v11 }
 0x946   :  { %8589 = vtanh.f32 %v4164_v52 }
 0x948   :  { %v8588_v6 = vpop.eup %8587 }
 0x949   :  { %v4073_v18 = vmul.f32 0.5, %v8588_v6 }
 0x94b   :  { %v4074_v35 = vadd.f32 0.5, %v4073_v18 }
 0x94d   :  { %v4075_v13 = vsel %vm10441_vm3, %v8588_v6, %v4074_v35 }
 0x94e   :  { %4078 = vrot.lane.b32.xlu1 %v4075_v13, %s8665_s5  ;;  %v4076_v36 = vmul.f32 0.0, %v4075_v13 }
 0x950   :  { %v8590_v12 = vpop.eup %8589 }
 0x951   :  { %v4166_v20 = vmul.f32 0.5, %v8590_v12 }
 0x953   :  { %v4167_v21 = vadd.f32 0.5, %v4166_v20 }
 0x955   :  { %v4168_v24 = vsel %vm10441_vm3, %v8590_v12, %v4167_v21 }
 0x956   :  { %4171 = vrot.lane.b32.xlu0 %v4168_v24, %s8665_s5  ;;  %v4169_v39 = vmul.f32 %v4168_v24, %v10456_v63 }
 0x9c0   :  { %v4079_v55 = vpop.permute.xlu1 %4078 }
 0x9c1   :  { %v4081_v1 = vmul.f32 %v4079_v55, %v4075_v13 }
 0x9c3   :  { %4083 = vrot.lane.b32.xlu1 %v4081_v1, %s8666_s6 }
 0x9c8   :  { %v4172_v58 = vpop.permute.xlu0 %4171 }
 0x9c9   :  { %v4174_v32 = vmul.f32 %v4172_v58, %v4168_v24 }
 0x9cb   :  { %4176 = vrot.lane.b32.xlu0 %v4174_v32, %s8666_s6 }
 0xa35   :  { %v4084_v37 = vpop.permute.xlu1 %4083 }
 0xa36   :  { %v4086_v3 = vadd.f32 %v4084_v37, %v4076_v36 }
 0xa38   :  { %8591 = vtanh.f32 %v4086_v3 }
 0xa3d   :  { %v4177_v38 = vpop.permute.xlu0 %4176 }
 0xa3e   :  { %v4179_v15 = vadd.f32 %v4177_v38, %v4169_v39 }
 0xa40   :  { %8593 = vtanh.f32 %v4179_v15 }
 0xa42   :  { %v8592_v22 = vpop.eup %8591 }
 0xa43   :  { %4089 = vrot.lane.b32.xlu1 %v8592_v22, %s8665_s5 }
 0xa4a   :  { %v8594_v34 = vpop.eup %8593 }
 0xa4b   :  { %4182 = vrot.lane.b32.xlu0 %v8594_v34, %s8665_s5 }
 0xab5   :  { %v4090_v9 = vpop.permute.xlu1 %4089 }
 0xab6   :  { %v4092_v8 = vmul.f32 %v4090_v9, %v4075_v13 }
 0xab8   :  { %4262 = vrot.lane.b32.xlu1 %v4092_v8, %s8666_s6 }
 0xabd   :  { %v4183_v53 = vpop.permute.xlu0 %4182 }
 0xabe   :  { %v4185_v45 = vmul.f32 %v4183_v53, %v4168_v24 }
 0xac0   :  { %4187 = vrot.lane.b32.xlu0 %v4185_v45, %s8666_s6 }
 0xb2a   :  { %v4263_v63 = vpop.permute.xlu1 %4262 }
 0xb32   :  { %v4188_v49 = vpop.permute.xlu0 %4187 }
 0xb33   :  { %7795 = vmatmul.mubr.msk.f32.vlgmr.msra.gmra.mrb[42].mxu1 %vm279_vm0, %v4188_v49 }
 0xb34   :  { %8387 = vmatpush3.bf16.msra.mxu1 %v10487_v41  ;;  %7805 = vmatprep.mubr.msk.f32.mxu1 %vm8661_vm4, %v8660_v29 }
 0xb35   :  { %8388 = vmatprep.subr.bf16.mxu1 %v8663_v40 }
 0xb38   :  { %8390 = vmatpush3.bf16.msra.mxu1 %v10497_v44 }
 0xb39   :  { %8391 = vmatprep.subr.bf16.mxu1 %v8663_v40 }
 0xb3b   :  { %7806 = vmatmul.mubr.msk.f32.vlgmr.msra.gmra.mrb[42].mxu1 %vm279_vm0, %v4263_v63 }
 0xb3c   :  { %8393 = vmatpush3.bf16.msra.mxu1 %v10397_v25  ;;  %7816 = vmatprep.mubr.msk.f32.mxu1 %vm8661_vm4, %v8660_v29 }
 0xb3d   :  { %8394 = vmatprep.subr.bf16.mxu1 %v8663_v40 }
 0xb40   :  { %8396 = vmatpush3.bf16.msra.mxu1 %v10408_v2 }
 0xb41   :  { %8397 = vmatprep.subr.bf16.mxu1 %v8663_v40 }
 0xb43   :  { %7817 = vmatmul.mubr.msk.f32.vlgmr.msra.gmra.mrb[44].mxu1 %vm279_vm0, %v4188_v49 }
 0xb44   :  { %8399 = vmatpush3.bf16.msra.mxu1 %v10468_v33  ;;  %7827 = vmatprep.mubr.msk.f32.mxu1 %vm8661_vm4, %v8660_v29 }
 0xb45   :  { %8400 = vmatprep.subr.bf16.mxu1 %v8663_v40 }
 0xb48   :  { %8402 = vmatpush3.bf16.msra.mxu1 %v10474_v17 }
 0xb49   :  { %8403 = vmatprep.subr.bf16.mxu1 %v8663_v40 }
 0xc0e   :  { %v4332_v42 = vpop.f32.mrb[42].mxu1 }
 0xc0f   :  { %v8533_v43 = vadd.f32 %v10521_v28, %v4332_v42  ;;  %v7807_v46 = vpop.f32.mrb[43].mxu1 }
 0xc11   :  { %v4337_v51 = vmul.f32 %v8533_v43, %v10449_v11 }
 0xc13   :  { %8595 = vtanh.f32 %v4337_v51 }
 0xc16   :  { %v4425_v31 = vpop.f32.mrb[44].mxu1 }
 0xc17   :  { %v4429_v54 = vadd.f32 %v4425_v31, %v10431_v23  ;;  %v7818_v19 = vpop.f32.mrb[45].mxu1 }
 0xc19   :  { %v4430_v57 = vmul.f32 %v4429_v54, %v10449_v11 }
 0xc1b   :  { %8597 = vtanh.f32 %v4430_v57 }
 0xc1d   :  { %v8596_v59 = vpop.eup %8595 }
 0xc1e   :  { %v4339_v48 = vmul.f32 0.5, %v8596_v59 }
 0xc20   :  { %v4340_v62 = vadd.f32 0.5, %v4339_v48 }
 0xc22   :  { %v4341_v0 = vsel %vm10441_vm3, %v8596_v59, %v4340_v62 }
 0xc23   :  { %4344 = vrot.lane.b32.xlu1 %v4341_v0, %s8665_s5  ;;  %v4342_v52 = vmul.f32 %v4341_v0, %v4086_v3 }
 0xc25   :  { %v8598_v5 = vpop.eup %8597 }
 0xc26   :  { %v4432_v47 = vmul.f32 0.5, %v8598_v5 }
 0xc28   :  { %v4433_v61 = vadd.f32 0.5, %v4432_v47 }
 0xc2a   :  { %v4434_v16 = vsel %vm10441_vm3, %v8598_v5, %v4433_v61 }
 0xc2b   :  { %4437 = vrot.lane.b32.xlu0 %v4434_v16, %s8665_s5  ;;  %v4435_v35 = vmul.f32 %v4434_v16, %v4179_v15 }
 0xc95   :  { %v4345_v23 = vpop.permute.xlu1 %4344 }
 0xc96   :  { %v4347_v56 = vmul.f32 %v4345_v23, %v4341_v0 }
 0xc98   :  { %4349 = vrot.lane.b32.xlu1 %v4347_v56, %s8666_s6 }
 0xc9d   :  { %v4438_v10 = vpop.permute.xlu0 %4437 }
 0xc9e   :  { %v4440_v14 = vmul.f32 %v4438_v10, %v4434_v16 }
 0xca0   :  { %4442 = vrot.lane.b32.xlu0 %v4440_v14, %s8666_s6 }
 0xd0a   :  { %v4350_v6 = vpop.permute.xlu1 %4349 }
 0xd0b   :  { %v4352_v18 = vadd.f32 %v4350_v6, %v4342_v52 }
 0xd0d   :  { %8599 = vtanh.f32 %v4352_v18 }
 0xd12   :  { %v4443_v13 = vpop.permute.xlu0 %4442 }
 0xd13   :  { %v4445_v12 = vadd.f32 %v4443_v13, %v4435_v35 }
 0xd15   :  { %8601 = vtanh.f32 %v4445_v12 }
 0xd17   :  { %v8600_v20 = vpop.eup %8599 }
 0xd18   :  { %4355 = vrot.lane.b32.xlu1 %v8600_v20, %s8665_s5 }
 0xd1f   :  { %v8602_v21 = vpop.eup %8601 }
 0xd20   :  { %4448 = vrot.lane.b32.xlu0 %v8602_v21, %s8665_s5 }
 0xd8a   :  { %v4356_v24 = vpop.permute.xlu1 %4355 }
 0xd8b   :  { %v4358_v55 = vmul.f32 %v4356_v24, %v4341_v0 }
 0xd8d   :  { %4528 = vrot.lane.b32.xlu1 %v4358_v55, %s8666_s6 }
 0xd92   :  { %v4449_v1 = vpop.permute.xlu0 %4448 }
 0xd93   :  { %v4451_v58 = vmul.f32 %v4449_v1, %v4434_v16 }
 0xd95   :  { %4453 = vrot.lane.b32.xlu0 %v4451_v58, %s8666_s6 }
 0xdff   :  { %v4529_v36 = vpop.permute.xlu1 %4528 }
 0xe07   :  { %v4454_v32 = vpop.permute.xlu0 %4453 }
 0xe08   :  { %7828 = vmatmul.mubr.msk.f32.vlgmr.msra.gmra.mrb[46].mxu1 %vm279_vm0, %v4454_v32 }
 0xe09   :  { %8405 = vmatpush3.bf16.msra.mxu1 %v10487_v41  ;;  %7838 = vmatprep.mubr.msk.f32.mxu1 %vm8661_vm4, %v8660_v29 }
 0xe0a   :  { %8406 = vmatprep.subr.bf16.mxu1 %v8663_v40 }
 0xe0d   :  { %8408 = vmatpush3.bf16.msra.mxu1 %v10497_v44 }
 0xe0e   :  { %8409 = vmatprep.subr.bf16.mxu1 %v8663_v40 }
 0xe10   :  { %7839 = vmatmul.mubr.msk.f32.vlgmr.msra.gmra.mrb[46].mxu1 %vm279_vm0, %v4529_v36 }
 0xe11   :  { %8411 = vmatpush3.bf16.msra.mxu1 %v10397_v25  ;;  %7849 = vmatprep.mubr.msk.f32.mxu1 %vm8661_vm4, %v8660_v29 }
 0xe12   :  { %8412 = vmatprep.subr.bf16.mxu1 %v8663_v40 }
 0xe15   :  { %8414 = vmatpush3.bf16.msra.mxu1 %v10408_v2 }
 0xe16   :  { %8415 = vmatprep.subr.bf16.mxu1 %v8663_v40 }
 0xe18   :  { %7850 = vmatmul.mubr.msk.f32.vlgmr.msra.gmra.mrb[48].mxu1 %vm279_vm0, %v4454_v32 }
 0xe19   :  { %8417 = vmatpush3.bf16.msra.mxu1 %v10468_v33  ;;  %7860 = vmatprep.mubr.msk.f32.mxu1 %vm8661_vm4, %v8660_v29 }
 0xe1a   :  { %8418 = vmatprep.subr.bf16.mxu1 %v8663_v40 }
 0xe1d   :  { %8420 = vmatpush3.bf16.msra.mxu1 %v10474_v17 }
 0xe1e   :  { %8421 = vmatprep.subr.bf16.mxu1 %v8663_v40 }
 0xee3   :  { %v4598_v37 = vpop.f32.mrb[46].mxu1 }
 0xee4   :  { %v8534_v3 = vadd.f32 %v10521_v28, %v4598_v37  ;;  %v7840_v39 = vpop.f32.mrb[47].mxu1 }
 0xee6   :  { %v4603_v38 = vmul.f32 %v8534_v3, %v10449_v11 }
 0xee8   :  { %8603 = vtanh.f32 %v4603_v38 }
 0xeeb   :  { %v4691_v15 = vpop.f32.mrb[48].mxu1 }
 0xeec   :  { %v4695_v22 = vadd.f32 %v4691_v15, %v10429_v60  ;;  %v7851_v34 = vpop.f32.mrb[49].mxu1 }
 0xeee   :  { %v4696_v9 = vmul.f32 %v4695_v22, %v10449_v11 }
 0xef0   :  { %8605 = vtanh.f32 %v4696_v9 }
 0xef2   :  { %v8604_v8 = vpop.eup %8603 }
 0xef3   :  { %v4605_v53 = vmul.f32 0.5, %v8604_v8 }
 0xef5   :  { %v4606_v45 = vadd.f32 0.5, %v4605_v53 }
 0xef7   :  { %v4607_v49 = vsel %vm10441_vm3, %v8604_v8, %v4606_v45 }
 0xef8   :  { %4610 = vrot.lane.b32.xlu1 %v4607_v49, %s8665_s5  ;;  %v4608_v19 = vmul.f32 %v4607_v49, %v4352_v18 }
 0xefa   :  { %v8606_v63 = vpop.eup %8605 }
 0xefb   :  { %v4698_v42 = vmul.f32 0.5, %v8606_v63 }
 0xefd   :  { %v4699_v43 = vadd.f32 0.5, %v4698_v42 }
 0xeff   :  { %v4700_v46 = vsel %vm10441_vm3, %v8606_v63, %v4699_v43 }
 0xf00   :  { %4703 = vrot.lane.b32.xlu0 %v4700_v46, %s8665_s5  ;;  %v4701_v48 = vmul.f32 %v4700_v46, %v4445_v12 }
 0xf6a   :  { %v4611_v60 = vpop.permute.xlu1 %4610 }
 0xf6b   :  { %v4613_v51 = vmul.f32 %v4611_v60, %v4607_v49 }
 0xf6d   :  { %4615 = vrot.lane.b32.xlu1 %v4613_v51, %s8666_s6 }
 0xf72   :  { %v4704_v31 = vpop.permute.xlu0 %4703 }
 0xf73   :  { %v4706_v54 = vmul.f32 %v4704_v31, %v4700_v46 }
 0xf75   :  { %4708 = vrot.lane.b32.xlu0 %v4706_v54, %s8666_s6 }
 0xfdf   :  { %v4616_v57 = vpop.permute.xlu1 %4615 }
 0xfe0   :  { %v4618_v59 = vadd.f32 %v4616_v57, %v4608_v19 }
 0xfe2   :  { %8607 = vtanh.f32 %v4618_v59 }
 0xfe7   :  { %v4709_v62 = vpop.permute.xlu0 %4708 }
 0xfe8   :  { %v4711_v0 = vadd.f32 %v4709_v62, %v4701_v48 }
 0xfea   :  { %8609 = vtanh.f32 %v4711_v0 }
 0xfec   :  { %v8608_v5 = vpop.eup %8607 }
 0xfed   :  { %4621 = vrot.lane.b32.xlu1 %v8608_v5, %s8665_s5 }
 0xff4   :  { %v8610_v47 = vpop.eup %8609 }
 0xff5   :  { %4714 = vrot.lane.b32.xlu0 %v8610_v47, %s8665_s5 }
0x105f   :  { %v4622_v61 = vpop.permute.xlu1 %4621 }
0x1060   :  { %v4624_v16 = vmul.f32 %v4622_v61, %v4607_v49 }
0x1062   :  { %4794 = vrot.lane.b32.xlu1 %v4624_v16, %s8666_s6 }
0x1067   :  { %v4715_v23 = vpop.permute.xlu0 %4714 }
0x1068   :  { %v4717_v56 = vmul.f32 %v4715_v23, %v4700_v46 }
0x106a   :  { %4719 = vrot.lane.b32.xlu0 %v4717_v56, %s8666_s6 }
0x10d4   :  { %v4795_v14 = vpop.permute.xlu1 %4794 }
0x10dc   :  { %v4720_v10 = vpop.permute.xlu0 %4719 }
0x10dd   :  { %7861 = vmatmul.mubr.msk.f32.vlgmr.msra.gmra.mrb[50].mxu1 %vm279_vm0, %v4720_v10 }
0x10de   :  { %8423 = vmatpush3.bf16.msra.mxu1 %v10487_v41  ;;  %7871 = vmatprep.mubr.msk.f32.mxu1 %vm8661_vm4, %v8660_v29 }
0x10df   :  { %8424 = vmatprep.subr.bf16.mxu1 %v8663_v40 }
0x10e2   :  { %8426 = vmatpush3.bf16.msra.mxu1 %v10497_v44 }
0x10e3   :  { %8427 = vmatprep.subr.bf16.mxu1 %v8663_v40 }
0x10e5   :  { %7872 = vmatmul.mubr.msk.f32.vlgmr.msra.gmra.mrb[50].mxu1 %vm279_vm0, %v4795_v14 }
0x10e6   :  { %8429 = vmatpush3.bf16.msra.mxu1 %v10397_v25  ;;  %7882 = vmatprep.mubr.msk.f32.mxu1 %vm8661_vm4, %v8660_v29 }
0x10e7   :  { %8430 = vmatprep.subr.bf16.mxu1 %v8663_v40 }
0x10ea   :  { %8432 = vmatpush3.bf16.msra.mxu1 %v10408_v2 }
0x10eb   :  { %8433 = vmatprep.subr.bf16.mxu1 %v8663_v40 }
0x10ed   :  { %7883 = vmatmul.mubr.msk.f32.vlgmr.msra.gmra.mrb[52].mxu1 %vm279_vm0, %v4720_v10 }
0x10ee   :  { %8435 = vmatpush3.bf16.msra.mxu1 %v10468_v33  ;;  %7893 = vmatprep.mubr.msk.f32.mxu1 %vm8661_vm4, %v8660_v29 }
0x10ef   :  { %8436 = vmatprep.subr.bf16.mxu1 %v8663_v40 }
0x10f2   :  { %8438 = vmatpush3.bf16.msra.mxu1 %v10474_v17 }
0x10f3   :  { %8439 = vmatprep.subr.bf16.mxu1 %v8663_v40 }
0x11b8   :  { %v4864_v52 = vpop.f32.mrb[50].mxu1 }
0x11b9   :  { %v8535_v6 = vadd.f32 %v10521_v28, %v4864_v52  ;;  %v7873_v18 = vpop.f32.mrb[51].mxu1 }
0x11bb   :  { %v4869_v35 = vmul.f32 %v8535_v6, %v10449_v11 }
0x11bd   :  { %8611 = vtanh.f32 %v4869_v35 }
0x11c0   :  { %v4957_v13 = vpop.f32.mrb[52].mxu1 }
0x11c1   :  { %v4961_v12 = vadd.f32 %v4957_v13, %v10435_v4  ;;  %v7884_v20 = vpop.f32.mrb[53].mxu1 }
0x11c3   :  { %v4962_v21 = vmul.f32 %v4961_v12, %v10449_v11 }
0x11c5   :  { %8613 = vtanh.f32 %v4962_v21 }
0x11c7   :  { %v8612_v24 = vpop.eup %8611 }
0x11c8   :  { %v4871_v55 = vmul.f32 0.5, %v8612_v24 }
0x11ca   :  { %v4872_v1 = vadd.f32 0.5, %v4871_v55 }
0x11cc   :  { %v4873_v58 = vsel %vm10441_vm3, %v8612_v24, %v4872_v1 }
0x11cd   :  { %4876 = vrot.lane.b32.xlu1 %v4873_v58, %s8665_s5  ;;  %v4874_v22 = vmul.f32 %v4873_v58, %v4618_v59 }
0x11cf   :  { %v8614_v32 = vpop.eup %8613 }
0x11d0   :  { %v4964_v36 = vmul.f32 0.5, %v8614_v32 }
0x11d2   :  { %v4965_v37 = vadd.f32 0.5, %v4964_v36 }
0x11d4   :  { %v4966_v3 = vsel %vm10441_vm3, %v8614_v32, %v4965_v37 }
0x11d5   :  { %4969 = vrot.lane.b32.xlu0 %v4966_v3, %s8665_s5  ;;  %v4967_v8 = vmul.f32 %v4966_v3, %v4711_v0 }
0x123f   :  { %v4877_v4 = vpop.permute.xlu1 %4876 }
0x1240   :  { %v4879_v39 = vmul.f32 %v4877_v4, %v4873_v58 }
0x1242   :  { %4881 = vrot.lane.b32.xlu1 %v4879_v39, %s8666_s6 }
0x1247   :  { %v4970_v38 = vpop.permute.xlu0 %4969 }
0x1248   :  { %v4972_v15 = vmul.f32 %v4970_v38, %v4966_v3 }
0x124a   :  { %4974 = vrot.lane.b32.xlu0 %v4972_v15, %s8666_s6 }
0x12b4   :  { %v4882_v34 = vpop.permute.xlu1 %4881 }
0x12b5   :  { %v4884_v9 = vadd.f32 %v4882_v34, %v4874_v22 }
0x12b7   :  { %8615 = vtanh.f32 %v4884_v9 }
0x12bc   :  { %v4975_v53 = vpop.permute.xlu0 %4974 }
0x12bd   :  { %v4977_v45 = vadd.f32 %v4975_v53, %v4967_v8 }
0x12bf   :  { %8617 = vtanh.f32 %v4977_v45 }
0x12c1   :  { %v8616_v49 = vpop.eup %8615 }
0x12c2   :  { %4887 = vrot.lane.b32.xlu1 %v8616_v49, %s8665_s5 }
0x12c9   :  { %v8618_v63 = vpop.eup %8617 }
0x12ca   :  { %4980 = vrot.lane.b32.xlu0 %v8618_v63, %s8665_s5 }
0x1334   :  { %v4888_v42 = vpop.permute.xlu1 %4887 }
0x1335   :  { %v4890_v43 = vmul.f32 %v4888_v42, %v4873_v58 }
0x1337   :  { %5060 = vrot.lane.b32.xlu1 %v4890_v43, %s8666_s6 }
0x133c   :  { %v4981_v46 = vpop.permute.xlu0 %4980 }
0x133d   :  { %v4983_v60 = vmul.f32 %v4981_v46, %v4966_v3 }
0x133f   :  { %4985 = vrot.lane.b32.xlu0 %v4983_v60, %s8666_s6 }
0x13a9   :  { %v5061_v31 = vpop.permute.xlu1 %5060 }
0x13b1   :  { %v4986_v51 = vpop.permute.xlu0 %4985 }
0x13b2   :  { %7894 = vmatmul.mubr.msk.f32.vlgmr.msra.gmra.mrb[54].mxu1 %vm279_vm0, %v4986_v51 }
0x13b3   :  { %8441 = vmatpush3.bf16.msra.mxu1 %v10487_v41  ;;  %7904 = vmatprep.mubr.msk.f32.mxu1 %vm8661_vm4, %v8660_v29 }
0x13b4   :  { %8442 = vmatprep.subr.bf16.mxu1 %v8663_v40 }
0x13b7   :  { %8444 = vmatpush3.bf16.msra.mxu1 %v10497_v44 }
0x13b8   :  { %8445 = vmatprep.subr.bf16.mxu1 %v8663_v40 }
0x13ba   :  { %7905 = vmatmul.mubr.msk.f32.vlgmr.msra.gmra.mrb[54].mxu1 %vm279_vm0, %v5061_v31 }
0x13bb   :  { %8447 = vmatpush3.bf16.msra.mxu1 %v10397_v25  ;;  %7915 = vmatprep.mubr.msk.f32.mxu1 %vm8661_vm4, %v8660_v29 }
0x13bc   :  { %8448 = vmatprep.subr.bf16.mxu1 %v8663_v40 }
0x13bf   :  { %8450 = vmatpush3.bf16.msra.mxu1 %v10408_v2 }
0x13c0   :  { %8451 = vmatprep.subr.bf16.mxu1 %v8663_v40 }
0x13c2   :  { %7916 = vmatmul.mubr.msk.f32.vlgmr.msra.gmra.mrb[56].mxu1 %vm279_vm0, %v4986_v51 }
0x13c3   :  { %8453 = vmatpush3.bf16.msra.mxu1 %v10468_v33  ;;  %7926 = vmatprep.mubr.msk.f32.mxu1 %vm8661_vm4, %v8660_v29 }
0x13c4   :  { %8454 = vmatprep.subr.bf16.mxu1 %v8663_v40 }
0x13c7   :  { %8456 = vmatpush3.bf16.msra.mxu1 %v10474_v17 }
0x13c8   :  { %8457 = vmatprep.subr.bf16.mxu1 %v8663_v40 }
0x148d   :  { %v5130_v54 = vpop.f32.mrb[54].mxu1 }
0x148e   :  { %v8536_v19 = vadd.f32 %v10521_v28, %v5130_v54  ;;  %v7906_v57 = vpop.f32.mrb[55].mxu1 }
0x1490   :  { %v5135_v59 = vmul.f32 %v8536_v19, %v10449_v11 }
0x1492   :  { %8619 = vtanh.f32 %v5135_v59 }
0x1495   :  { %v5223_v48 = vpop.f32.mrb[56].mxu1 }
0x1496   :  { %v5227_v62 = vadd.f32 %v5223_v48, %v10433_v26  ;;  %v7917_v0 = vpop.f32.mrb[57].mxu1 }
0x1498   :  { %v5228_v5 = vmul.f32 %v5227_v62, %v10449_v11 }
0x149a   :  { %8621 = vtanh.f32 %v5228_v5 }
0x149c   :  { %v8620_v47 = vpop.eup %8619 }
0x149d   :  { %v5137_v61 = vmul.f32 0.5, %v8620_v47 }
0x149f   :  { %v5138_v16 = vadd.f32 0.5, %v5137_v61 }
0x14a1   :  { %v5139_v23 = vsel %vm10441_vm3, %v8620_v47, %v5138_v16 }
0x14a2   :  { %5142 = vrot.lane.b32.xlu1 %v5139_v23, %s8665_s5  ;;  %v5140_v13 = vmul.f32 %v5139_v23, %v4884_v9 }
0x14a4   :  { %v8622_v56 = vpop.eup %8621 }
0x14a5   :  { %v5230_v10 = vmul.f32 0.5, %v8622_v56 }
0x14a7   :  { %v5231_v14 = vadd.f32 0.5, %v5230_v10 }
0x14a9   :  { %v5232_v52 = vsel %vm10441_vm3, %v8622_v56, %v5231_v14 }
0x14aa   :  { %5235 = vrot.lane.b32.xlu0 %v5232_v52, %s8665_s5  ;;  %v5233_v21 = vmul.f32 %v5232_v52, %v4977_v45 }
0x1514   :  { %v5143_v26 = vpop.permute.xlu1 %5142 }
0x1515   :  { %v5145_v6 = vmul.f32 %v5143_v26, %v5139_v23 }
0x1517   :  { %5147 = vrot.lane.b32.xlu1 %v5145_v6, %s8666_s6 }
0x151c   :  { %v5236_v18 = vpop.permute.xlu0 %5235 }
0x151d   :  { %v5238_v35 = vmul.f32 %v5236_v18, %v5232_v52 }
0x151f   :  { %5240 = vrot.lane.b32.xlu0 %v5238_v35, %s8666_s6 }
0x1589   :  { %v5148_v12 = vpop.permute.xlu1 %5147 }
0x158a   :  { %v5150_v20 = vadd.f32 %v5148_v12, %v5140_v13 }
0x158c   :  { %8623 = vtanh.f32 %v5150_v20 }
0x1591   :  { %v5241_v24 = vpop.permute.xlu0 %5240 }
0x1592   :  { %v5243_v55 = vadd.f32 %v5241_v24, %v5233_v21 }
0x1594   :  { %8625 = vtanh.f32 %v5243_v55 }
0x1596   :  { %v8624_v1 = vpop.eup %8623 }
0x1597   :  { %5153 = vrot.lane.b32.xlu1 %v8624_v1, %s8665_s5 }
0x159e   :  { %v8626_v58 = vpop.eup %8625 }
0x159f   :  { %5246 = vrot.lane.b32.xlu0 %v8626_v58, %s8665_s5 }
0x1609   :  { %v5154_v32 = vpop.permute.xlu1 %5153 }
0x160a   :  { %v5156_v36 = vmul.f32 %v5154_v32, %v5139_v23 }
0x160c   :  { %5326 = vrot.lane.b32.xlu1 %v5156_v36, %s8666_s6 }
0x1611   :  { %v5247_v37 = vpop.permute.xlu0 %5246 }
0x1612   :  { %v5249_v3 = vmul.f32 %v5247_v37, %v5232_v52 }
0x1614   :  { %5251 = vrot.lane.b32.xlu0 %v5249_v3, %s8666_s6 }
0x167e   :  { %v5327_v39 = vpop.permute.xlu1 %5326 }
0x1686   :  { %v5252_v4 = vpop.permute.xlu0 %5251 }
0x1687   :  { %7927 = vmatmul.mubr.msk.f32.vlgmr.msra.gmra.mrb[58].mxu1 %vm279_vm0, %v5252_v4 }
0x1688   :  { %8459 = vmatpush3.bf16.msra.mxu1 %v10487_v41  ;;  %7937 = vmatprep.mubr.msk.f32.mxu1 %vm8661_vm4, %v8660_v29 }
0x1689   :  { %8460 = vmatprep.subr.bf16.mxu1 %v8663_v40 }
0x168c   :  { %8462 = vmatpush3.bf16.msra.mxu1 %v10497_v44 }
0x168d   :  { %8463 = vmatprep.subr.bf16.mxu1 %v8663_v40 }
0x168f   :  { %7938 = vmatmul.mubr.msk.f32.vlgmr.msra.gmra.mrb[58].mxu1 %vm279_vm0, %v5327_v39 }
0x1690   :  { %8465 = vmatpush3.bf16.msra.mxu1 %v10397_v25  ;;  %7948 = vmatprep.mubr.msk.f32.mxu1 %vm8661_vm4, %v8660_v29 }
0x1691   :  { %8466 = vmatprep.subr.bf16.mxu1 %v8663_v40 }
0x1694   :  { %8468 = vmatpush3.bf16.msra.mxu1 %v10408_v2 }
0x1695   :  { %8469 = vmatprep.subr.bf16.mxu1 %v8663_v40 }
0x1697   :  { %7949 = vmatmul.mubr.msk.f32.vlgmr.msra.gmra.mrb[60].mxu1 %vm279_vm0, %v5252_v4 }
0x1698   :  { %8471 = vmatpush3.bf16.msra.mxu1 %v10468_v33  ;;  %7959 = vmatprep.mubr.msk.f32.mxu1 %vm8661_vm4, %v8660_v29 }
0x1699   :  { %8472 = vmatprep.subr.bf16.mxu1 %v8663_v40 }
0x169c   :  { %8474 = vmatpush3.bf16.msra.mxu1 %v10474_v17 }
0x169d   :  { %8475 = vmatprep.subr.bf16.mxu1 %v8663_v40 }
0x1762   :  { %v5396_v38 = vpop.f32.mrb[58].mxu1 }
0x1763   :  { %v8537_v15 = vadd.f32 %v10521_v28, %v5396_v38  ;;  %v7939_v22 = vpop.f32.mrb[59].mxu1 }
0x1765   :  { %v5401_v34 = vmul.f32 %v8537_v15, %v10449_v11 }
0x1767   :  { %8627 = vtanh.f32 %v5401_v34 }
0x176a   :  { %v5489_v9 = vpop.f32.mrb[60].mxu1 }
0x176b   :  { %v5493_v8 = vadd.f32 %v5489_v9, %v10445_v7  ;;  %v7950_v53 = vpop.f32.mrb[61].mxu1 }
0x176d   :  { %v5494_v45 = vmul.f32 %v5493_v8, %v10449_v11 }
0x176f   :  { %8629 = vtanh.f32 %v5494_v45 }
0x1771   :  { %v8628_v49 = vpop.eup %8627 }
0x1772   :  { %v5403_v63 = vmul.f32 0.5, %v8628_v49 }
0x1774   :  { %v5404_v42 = vadd.f32 0.5, %v5403_v63  ;;  %v5970_v63 = vld [vmem:[%s10886_s2 + $0x148] sm:$0xff] }
0x1776   :  { %v5405_v43 = vsel %vm10441_vm3, %v8628_v49, %v5404_v42  ;;  %v5969_v49 = vld [vmem:[%s10886_s2 + $0x140] sm:$0xff] }
0x1777   :  { %5408 = vrot.lane.b32.xlu1 %v5405_v43, %s8665_s5  ;;  %v5406_v59 = vmul.f32 %v5405_v43, %v5150_v20  ;;  %v8500_v42 = vpack.c.bf16 %v5970_v63, %v5969_v49 }
0x1779   :  { %v8630_v46 = vpop.eup %8629  ;;  %8501 = vmatpush3.bf16.msra.mxu0 %v8500_v42  ;;  %v6555_v42 = vld [vmem:[%s10886_s2 + $0x1c0] ss:$0 sm:$0xff] }
0x177a   :  { %v5496_v60 = vmul.f32 0.5, %v8630_v46  ;;  %8502 = vmatprep.subr.bf16.mxu0 %v8663_v40 }
0x177c   :  { %v5497_v51 = vadd.f32 0.5, %v5496_v60 }
0x177e   :  { %v5498_v31 = vsel %vm10441_vm3, %v8630_v46, %v5497_v51 }
0x177f   :  { %5501 = vrot.lane.b32.xlu0 %v5498_v31, %s8665_s5  ;;  %v5499_v0 = vmul.f32 %v5498_v31, %v5243_v55 }
0x17e9   :  { %v5409_v7 = vpop.permute.xlu1 %5408 }
0x17ea   :  { %v5411_v54 = vmul.f32 %v5409_v7, %v5405_v43 }
0x17ec   :  { %5413 = vrot.lane.b32.xlu1 %v5411_v54, %s8666_s6  ;;  %v5974_v54 = vld [vmem:[%s10886_s2 + $0x168] sm:$0xff] }
0x17f1   :  { %v5502_v19 = vpop.permute.xlu0 %5501 }
0x17f2   :  { %v5504_v57 = vmul.f32 %v5502_v19, %v5498_v31 }
0x17f4   :  { %5506 = vrot.lane.b32.xlu0 %v5504_v57, %s8666_s6 }
0x185e   :  { %v5414_v48 = vpop.permute.xlu1 %5413 }
0x185f   :  { %v5416_v62 = vadd.f32 %v5414_v48, %v5406_v59 }
0x1861   :  { %8631 = vtanh.f32 %v5416_v62 }
0x1866   :  { %v5507_v5 = vpop.permute.xlu0 %5506 }
0x1867   :  { %v5509_v47 = vadd.f32 %v5507_v5, %v5499_v0 }
0x1869   :  { %8633 = vtanh.f32 %v5509_v47 }
0x186b   :  { %v8632_v61 = vpop.eup %8631 }
0x186c   :  { %5419 = vrot.lane.b32.xlu1 %v8632_v61, %s8665_s5 }
0x1873   :  { %v8634_v16 = vpop.eup %8633 }
0x1874   :  { %5512 = vrot.lane.b32.xlu0 %v8634_v16, %s8665_s5  ;;  %v5975_v16 = vld [vmem:[%s10886_s2 + $0x170] sm:$0xff] }
0x18de   :  { %v5420_v23 = vpop.permute.xlu1 %5419 }
0x18df   :  { %v5422_v56 = vmul.f32 %v5420_v23, %v5405_v43 }
0x18e1   :  { %5592 = vrot.lane.b32.xlu1 %v5422_v56, %s8666_s6 }
0x18e6   :  { %v5513_v10 = vpop.permute.xlu0 %5512 }
0x18e7   :  { %v5515_v14 = vmul.f32 %v5513_v10, %v5498_v31  ;;  %v5971_v31 = vld [vmem:[%s10886_s2 + $0x150] sm:$0xff] }
0x18e9   :  { %5517 = vrot.lane.b32.xlu0 %v5515_v14, %s8666_s6 }
0x1953   :  { %v5593_v26 = vpop.permute.xlu1 %5592 }
0x195b   :  { %v5518_v52 = vpop.permute.xlu0 %5517 }
0x195c   :  { %7960 = vmatmul.mubr.msk.f32.vlgmr.msra.gmra.mrb[62].mxu1 %vm279_vm0, %v5518_v52 }
0x195d   :  { %8477 = vmatpush3.bf16.msra.mxu1 %v10487_v41  ;;  %7970 = vmatprep.mubr.msk.f32.mxu1 %vm8661_vm4, %v8660_v29 }
0x195e   :  { %8478 = vmatprep.subr.bf16.mxu1 %v8663_v40 }
0x1961   :  { %8480 = vmatpush3.bf16.msra.mxu1 %v10497_v44 }
0x1962   :  { %8481 = vmatprep.subr.bf16.mxu1 %v8663_v40 }
0x1964   :  { %7971 = vmatmul.mubr.msk.f32.vlgmr.msra.gmra.mrb[62].mxu1 %vm279_vm0, %v5593_v26  ;;  %v5980_v26 = vld [vmem:[%s10886_s2 + $0x198] sm:$0xff] }
0x1965   :  { %8483 = vmatpush3.bf16.msra.mxu1 %v10397_v25  ;;  %7981 = vmatprep.mubr.msk.f32.mxu1 %vm8661_vm4, %v8660_v29 }
0x1966   :  { %8484 = vmatprep.subr.bf16.mxu1 %v8663_v40 }
0x1969   :  { %8486 = vmatpush3.bf16.msra.mxu1 %v10408_v2 }
0x196a   :  { %8487 = vmatprep.subr.bf16.mxu1 %v8663_v40 }
0x196c   :  { %7982 = vmatmul.mubr.msk.f32.vlgmr.msra.gmra.mrb[64].mxu1 %vm279_vm0, %v5518_v52  ;;  %v5979_v52 = vld [vmem:[%s10886_s2 + $0x190] sm:$0xff] }
0x196d   :  { %8489 = vmatpush3.bf16.msra.mxu1 %v10468_v33  ;;  %7992 = vmatprep.mubr.msk.f32.mxu1 %vm8661_vm4, %v8660_v29 }
0x196e   :  { %8490 = vmatprep.subr.bf16.mxu1 %v8663_v40 }
0x1971   :  { %8492 = vmatpush3.bf16.msra.mxu1 %v10474_v17 }
0x1972   :  { %8493 = vmatprep.subr.bf16.mxu1 %v8663_v40 }
0x1a37   :  { %v5662_v25 = vpop.f32.mrb[62].mxu1 }
0x1a38   :  { %v8538_v6 = vadd.f32 %v10521_v28, %v5662_v25  ;;  %v7972_v18 = vpop.f32.mrb[63].mxu1  ;;  %v8515_v25 = vpack.c.bf16 %v5980_v26, %v5979_v52 }
0x1a39   :  { %v6505_v18 = vld [vmem:[%s10886_s2 + $0x78] ss:$0 sm:$0xff] }
0x1a3a   :  { %v5667_v2 = vmul.f32 %v8538_v6, %v10449_v11 }
0x1a3c   :  { %8635 = vtanh.f32 %v5667_v2  ;;  %v3460_v2 = vadd.f32 %v6505_v18, %v10389_v50 }
0x1a3f   :  { %v5755_v35 = vpop.f32.mrb[64].mxu1 }
0x1a40   :  { %v5759_v13 = vadd.f32 %v5755_v35, %v10439_v27  ;;  %v7983_v33 = vpop.f32.mrb[65].mxu1  ;;  %v3463_v35 = vmul.f32 %v3460_v2, %v3460_v2 }
0x1a42   :  { %v5760_v12 = vmul.f32 %v5759_v13, %v10449_v11  ;;  %v3464_v13 = vsel %vm279_vm0, %v3463_v35, 0.0 }
0x1a44   :  { %8637 = vtanh.f32 %v5760_v12 }
0x1a46   :  { %v8636_v20 = vpop.eup %8635 }
0x1a47   :  { %v5669_v21 = vmul.f32 0.5, %v8636_v20 }
0x1a49   :  { %v5670_v24 = vadd.f32 0.5, %v5669_v21  ;;  %v5981_v21 = vld [vmem:[%s10886_s2 + $0x1a0] sm:$0xff] }
0x1a4b   :  { %v5671_v17 = vsel %vm10441_vm3, %v8636_v20, %v5670_v24  ;;  %v5982_v24 = vld [vmem:[%s10886_s2 + $0x1a8] sm:$0xff] }
0x1a4c   :  { %5674 = vrot.lane.b32.xlu1 %v5671_v17, %s8665_s5  ;;  %v5672_v4 = vmul.f32 %v5671_v17, %v5416_v62 }
0x1a4e   :  { %v8638_v55 = vpop.eup %8637 }
0x1a4f   :  { %v5762_v1 = vmul.f32 0.5, %v8638_v55 }
0x1a51   :  { %v5763_v58 = vadd.f32 0.5, %v5762_v1  ;;  %v5984_v1 = vld [vmem:[%s10886_s2 + $0x1b8] sm:$0xff] }
0x1a53   :  { %v5764_v32 = vsel %vm10441_vm3, %v8638_v55, %v5763_v58  ;;  %v5983_v55 = vld [vmem:[%s10886_s2 + $0x1b0] sm:$0xff] }
0x1a54   :  { %5767 = vrot.lane.b32.xlu0 %v5764_v32, %s8665_s5  ;;  %v5765_v15 = vmul.f32 %v5764_v32, %v5509_v47  ;;  %v8521_v58 = vpack.c.bf16 %v5984_v1, %v5983_v55 }
0x1abe   :  { %v5675_v27 = vpop.permute.xlu1 %5674 }
0x1abf   :  { %v5677_v36 = vmul.f32 %v5675_v27, %v5671_v17 }
0x1ac1   :  { %5679 = vrot.lane.b32.xlu1 %v5677_v36, %s8666_s6 }
0x1ac6   :  { %v5768_v37 = vpop.permute.xlu0 %5767 }
0x1ac7   :  { %v5770_v3 = vmul.f32 %v5768_v37, %v5764_v32 }
0x1ac9   :  { %5772 = vrot.lane.b32.xlu0 %v5770_v3, %s8666_s6 }
0x1b33   :  { %v5680_v39 = vpop.permute.xlu1 %5679 }
0x1b34   :  { %v10758_v38 = vadd.f32 %v5680_v39, %v5672_v4 }
0x1b36   :  { %8639 = vtanh.f32 %v10758_v38 }
0x1b3b   :  { %v5773_v22 = vpop.permute.xlu0 %5772 }
0x1b3c   :  { %v5775_v34 = vadd.f32 %v5773_v22, %v5765_v15  ;;  %v6062_v15 = vld [vmem:[%s10886_s2 + $0x1c8] sm:$0xff]  ;;  %v6063_v22 = vld [vmem:[%s10886_s2 + $0x1d0] sm:$0xff] }
0x1b3e   :  { %8641 = vtanh.f32 %v5775_v34  ;;  %v6064_v34 = vld [vmem:[%s10886_s2 + $0x1d8] sm:$0xff] }
0x1b40   :  { %v8640_v9 = vpop.eup %8639 }
0x1b41   :  { %5685 = vrot.lane.b32.xlu1 %v8640_v9, %s8665_s5  ;;  %v8524_v9 = vpack.c.bf16 %v6063_v22, %v6062_v15 }
0x1b48   :  { %v10762_v8 = vpop.eup %8641 }
0x1b49   :  { %5778 = vrot.lane.b32.xlu0 %v10762_v8, %s8665_s5 }
0x1bb3   :  { %v5686_v53 = vpop.permute.xlu1 %5685 }
0x1bb4   :  { %v5688_v45 = vmul.f32 %v5686_v53, %v5671_v17  ;;  %v8518_v17 = vpack.c.bf16 %v5982_v24, %v5981_v21 }
0x1bb6   :  { %5858 = vrot.lane.b32.xlu1 %v5688_v45, %s8666_s6 }
0x1bbb   :  { %v5779_v43 = vpop.permute.xlu0 %5778 }
0x1bbc   :  { %v5781_v46 = vmul.f32 %v5779_v43, %v5764_v32 }
0x1bbe   :  { %5783 = vrot.lane.b32.xlu0 %v5781_v46, %s8666_s6 }
0x1c28   :  { %v5859_v51 = vpop.permute.xlu1 %5858 }
0x1c30   :  { %v5784_v60 = vpop.permute.xlu0 %5783 }
0x1c31   :  { %7993 = vmatmul.mubr.msk.f32.vlgmr.msra.gmra.mrb[66].mxu1 %vm279_vm0, %v5784_v60 }
0x1c32   :  { %8495 = vmatpush3.bf16.msra.mxu1 %v10487_v41  ;;  %8003 = vmatprep.mubr.msk.f32.mxu1 %vm8661_vm4, %v8660_v29  ;;  %v5972_v41 = vld [vmem:[%s10886_s2 + $0x158] sm:$0xff] }
0x1c33   :  { %8496 = vmatprep.subr.bf16.mxu1 %v8663_v40  ;;  %v8503_v7 = vpack.c.bf16 %v5972_v41, %v5971_v31 }
0x1c35   :  { %8504 = vmatpush3.bf16.msra.mxu0 %v8503_v7 }
0x1c36   :  { %8498 = vmatpush3.bf16.msra.mxu1 %v10497_v44  ;;  %v5973_v44 = vld [vmem:[%s10886_s2 + $0x160] sm:$0xff]  ;;  %8505 = vmatprep.subr.bf16.mxu0 %v8663_v40 }
0x1c37   :  { %8523 = vmatprep.subr.bf16.mxu1 %v8663_v40  ;;  %v8506_v19 = vpack.c.bf16 %v5974_v54, %v5973_v44  ;;  %v6146_v44 = vld [vmem:[%s10886_s2 + $0x1f8] sm:$0xff]  ;;  %v6556_v54 = vld [vmem:[%s10886_s2 + $0x1e8] ss:$0 sm:$0xff] }
0x1c39   :  { %8004 = vmatmul.mubr.msk.f32.vlgmr.msra.gmra.mrb[66].mxu1 %vm279_vm0, %v5859_v51  ;;  %8507 = vmatpush3.bf16.msra.mxu0 %v8506_v19 }
0x1c3a   :  { %8049 = vmatprep.mubr.msk.f32.mxu1 %vm8661_vm4, %v8660_v29  ;;  %8508 = vmatprep.subr.bf16.mxu0 %v8663_v40 }
0x1c3b   :  { %8525 = vmatpush3.bf16.msra.mxu1 %v8524_v9 }
0x1c3c   :  { %8526 = vmatprep.subr.bf16.mxu1 %v8663_v40 }
0x1d0c   :  { %v5928_v57 = vpop.f32.mrb[66].mxu1 }
0x1d0d   :  { %v8539_v59 = vadd.f32 %v10521_v28, %v5928_v57  ;;  %v8005_v48 = vpop.f32.mrb[67].mxu1  ;;  %v5976_v28 = vld [vmem:[%s10886_s2 + $0x178] sm:$0xff] }
0x1d0e   :  { %v8509_v23 = vpack.c.bf16 %v5976_v28, %v5975_v16 }
0x1d0f   :  { %v5933_v62 = vmul.f32 %v8539_v59, %v10449_v11  ;;  %v5977_v11 = vld [vmem:[%s10886_s2 + $0x180] sm:$0xff] }
0x1d10   :  { %8510 = vmatpush3.bf16.msra.mxu0 %v8509_v23  ;;  %v8512_v56 = vpack.c.bf16 %v5978_v30, %v5977_v11 }
0x1d11   :  { %8643 = vtanh.f32 %v5933_v62  ;;  %8511 = vmatprep.subr.bf16.mxu0 %v8663_v40 }
0x1d12   :  { %8645 = vtanh.f32 %v5781_v46 }
0x1d14   :  { %8513 = vmatpush3.bf16.msra.mxu0 %v8512_v56 }
0x1d15   :  { %8514 = vmatprep.subr.bf16.mxu0 %v8663_v40 }
0x1d18   :  { %8516 = vmatpush3.bf16.msra.mxu0 %v8515_v25 }
0x1d19   :  { %8517 = vmatprep.subr.bf16.mxu0 %v8663_v40 }
0x1d1b   :  { %v8644_v0 = vpop.eup %8643 }
0x1d1c   :  { %v5935_v5 = vmul.f32 0.5, %v8644_v0  ;;  %v8646_v6 = vpop.eup %8645  ;;  %8519 = vmatpush3.bf16.msra.mxu0 %v8518_v17 }
0x1d1d   :  { %8520 = vmatprep.subr.bf16.mxu0 %v8663_v40 }
0x1d1e   :  { %v5936_v47 = vadd.f32 0.5, %v5935_v5 }
0x1d20   :  { %v5937_v61 = vsel %vm10441_vm3, %v8644_v0, %v5936_v47  ;;  %8522 = vmatpush3.bf16.msra.mxu0 %v8521_v58 }
0x1d21   :  { %5940 = vrot.lane.b32.xlu0 %v5937_v61, %s8665_s5  ;;  %v5938_v33 = vmul.f32 %v5937_v61, %v10758_v38 }
0x1d93   :  { %v5941_v10 = vpop.permute.xlu0 %5940 }
0x1d94   :  { %v5943_v14 = vmul.f32 %v5941_v10, %v5937_v61 }
0x1d96   :  { %5945 = vrot.lane.b32.xlu1 %v5943_v14, %s8666_s6 }
0x1d9a   :  { %5958 = vrot.lane.b32.xlu1 %v8646_v6, %s8666_s6 }
0x1dbe   :  { %3465 = vadd.xlane.f32.xlu1 %v3464_v13 }
0x1e08   :  { %v5946_v12 = vpop.permute.xlu1 %5945 }
0x1e09   :  { %v5948_v20 = vadd.f32 %v5946_v12, %v5938_v33 }
0x1e0b   :  { %8647 = vtanh.f32 %v5948_v20 }
0x1e0c   :  { %v5959_v37 = vpop.permute.xlu1 %5958 }
0x1e0d   :  { %v5965_v3 = vsel %vm279_vm0, %v5959_v37, %v10762_v8  ;;  %v6065_v8 = vld [vmem:[%s10886_s2 + $0x1e0] sm:$0xff] }
0x1e0e   :  { %v8527_v53 = vpack.c.bf16 %v6065_v8, %v6064_v34 }
0x1e10   :  { %8528 = vmatpush3.bf16.msra.mxu1 %v8527_v53 }
0x1e11   :  { %8529 = vmatprep.subr.bf16.mxu1 %v8663_v40  ;;  %v6145_v40 = vld [vmem:[%s10886_s2 + $0x1f0] sm:$0xff] }
0x1e12   :  { %v8530_v7 = vpack.c.bf16 %v6146_v44, %v6145_v40 }
0x1e15   :  { %v8648_v50 = vpop.eup %8647 }
0x1e16   :  { %5951 = vrot.lane.b32.xlu0 %v8648_v50, %s8665_s5 }
0x1e4b   :  { %v3466_v45 = vpop.xlane.xlu1 %3465 }
0x1e4c   :  { %v3467_v49 = vadd.f32 1e-12, %v3466_v45 }
0x1e88   :  { %v5952_v32 = vpop.permute.xlu0 %5951 }
0x1e89   :  { %v5954_v27 = vmul.f32 %v5952_v32, %v5937_v61 }
0x1e8b   :  { %8649 = vtanh.f32 %v5954_v27 }
0x1e8c   :  { %8651 = vrsqrt.f32 %v3467_v49 }
0x1e95   :  { %v8650_v36 = vpop.eup %8649 }
0x1e96   :  { %5962 = vrot.lane.b32.xlu0 %v8650_v36, %s8667_s29  ;;  %v8652_v63 = vpop.eup %8651 }
0x1e97   :  { %v3469_v46 = vmul.f32 %v8652_v63, %v3460_v2 }
0x1f08   :  { %v5963_v4 = vpop.permute.xlu0 %5962 }
0x1f09   :  { %v5966_v39 = vsel %vm3389_vm7, %v5965_v3, %v5963_v4 }
0x1f0a   :  { %v5968_v38 = vsel %vm5967_vm5, %v5966_v39, %v5952_v32 }
0x1f0b   :  { %8039 = vmatmul.mubr.f32.vlgmr.msra.gmra.mrb[0].mxu0 %v5968_v38 }
0x1fde   :  { %v6056_v43 = vpop.f32.mrb[0].mxu0 }
0x1fdf   :  { %v6057_v60 = vadd.f32 %v6555_v42, %v6056_v43  ;;  %v8040_v51 = vpop.f32.mrb[1].mxu0 }
0x1fe1   :  { %v6060_v31 = vmul.f32 %v6057_v60, %v3469_v46 }
0x1fe3   :  { %8653 = vtanh.f32 %v6060_v31 }
0x1fed   :  { %v8654_v41 = vpop.eup %8653 }
0x1fee   :  { %8050 = vmatmul.mubr.msk.f32.vlgmr.msra.gmra.mrb[68].mxu1 %vm279_vm0, %v8654_v41 }
0x1fef   :  { %8056 = vmatprep.mubr.msk.f32.mxu1 %vm8661_vm4, %v8660_v29  ;;  %8531 = vmatpush3.bf16.msra.mxu1 %v8530_v7  ;;  %v6558_v29 = vld [vmem:[%s10886_s2 + $0x200] ss:$0 sm:$0xff] }
0x20c1   :  { %v6140_v19 = vpop.f32.mrb[68].mxu1 }
0x20c2   :  { %v6141_v57 = vadd.f32 %v6556_v54, %v6140_v19  ;;  %v8051_v59 = vpop.f32.mrb[69].mxu1 }
0x20c4   :  { %8655 = vtanh.f32 %v6141_v57 }
0x20ce   :  { %v8656_v48 = vpop.eup %8655 }
0x20cf   :  { %8057 = vmatmul.mubr.msk.f32.vlgmr.msra.gmra.mrb[70].mxu1 %vm3682_vm15, %v8656_v48 }
0x21a2   :  { %v6221_v62 = vpop.f32.mrb[70].mxu1 }
0x21a3   :  { %v6222_v0 = vadd.f32 %v6558_v29, %v6221_v62  ;;  %v8058_v5 = vpop.f32.mrb[71].mxu1 }
0x21a5   :  { %6225 = vst [vmem:[%s10889_s3] sm:$0xff] %v6222_v0 }

</bundles_post_ra>
